<compile_context>
chip_gen: v7x
topology: tpu7x:2x2x1
jax: 0.10.0
libtpu: 0.0.40
codegen_flags: <defaults>
</compile_context>

<pallas_src>
import numpy as np
import jax
import jax.numpy as jnp
from jax.experimental import pallas as pl
from jax.experimental.pallas import tpu as pltpu

EPS = 1e-5
LEAKY_SLOPE = 0.01          # nn.LeakyReLU() default
B_TILE = 8                  # images per grid step (M=256 on 32-high convs)
MXU_DTYPE = jnp.float32     # jnp.bfloat16 on v6e/v7x doubles MXU rate


def _leaky(y):
    return jnp.where(y > 0, y, LEAKY_SLOPE * y)


def _mm(a, b):
    """Matmul with operands cast to the (possibly bf16) weight dtype, f32 acc."""
    return jnp.dot(a.astype(b.dtype), b, preferred_element_type=jnp.float32)


# ----------------------------------------------------------------------------
# Fused kernel: whole net_deep forward for B_TILE images per grid step.
# ----------------------------------------------------------------------------
def net_deep_kernel(x_ref, a1, a2, a3, a4, a5, p1, q1, p2, q2,
                    wl1, wl2, wl3, wl4, sb, o_ref):
    """x_ref : (B*32, 96)        stacked images, layout (b*H+h, w*Cin+ci)
    a*    : (3, W*Cin, W*Cout)   banded conv weights, one slab per kh tap
    p*,q* : pooling matrices, pooled = (p @ y) @ q  (0.25 folded in);
            p2 rows are pre-permuted to (local_h major, batch minor) order
    wl*   : linear weights (in, out); wl1 rows pre-permuted to flat order
            h*64+w*8+c; wl4 zero-padded to 128 output columns
    sb    : (17, 128) packed scale/bias rows (folded BN): conv1..5 at rows
            2i/2i+1, lin1 at 10/11, lin2 at 12/13, lin3 at 14/15, lin4 bias 16
    o_ref : (B, 128)  logits in columns [:10], zeros elsewhere
    """
    bt = o_ref.shape[0]

    def conv_bn_lrelu(x, a_ref, hgt, srow):
        # (M, W*Cin) -> (M, W*Cout).  Halo rows via sublane roll + per-image
        # boundary mask (roll wraps across image boundaries -> zero them).
        m = x.shape[0]
        rows = jax.lax.broadcasted_iota(jnp.int32, x.shape, 0)
        local = rows & (hgt - 1)                      # hgt is a power of two
        x_up = jnp.where(local == 0, 0.0, pltpu.roll(x, 1, 0))        # x[h-1]
        x_dn = jnp.where(local == hgt - 1, 0.0, pltpu.roll(x, m - 1, 0))  # x[h+1]
        y = _mm(x_up, a_ref[0]) + _mm(x, a_ref[1]) + _mm(x_dn, a_ref[2])
        y = y * sb[srow:srow + 1, :] + sb[srow + 1:srow + 2, :]
        return _leaky(y)

    def avgpool(y, p_ref, q_ref):
        return _mm(_mm(p_ref[...], y), q_ref[...])

    y = x_ref[...]                            # (B*32, 96)
    y = conv_bn_lrelu(y, a1, 32, 0)           # (B*32, 128)
    y = conv_bn_lrelu(y, a2, 32, 2)           # (B*32, 128)
    y = conv_bn_lrelu(y, a3, 32, 4)           # (B*32, 128)
    y = avgpool(y, p1, q1)                    # (B*16, 64)
    y = conv_bn_lrelu(y, a4, 16, 6)           # (B*16, 128)
    y = conv_bn_lrelu(y, a5, 16, 8)           # (B*16, 128)
    y = avgpool(y, p2, q2)                    # (B*8, 64), row = local_h*B + b

    # dnn_layer.  Pool-2 rows come out grouped by local_h, so each term is a
    # contiguous (B,64) sublane slice against the matching 64-row block of the
    # (flatten-permuted) first Linear weight.  Tree-sum to shorten the chain.
    parts = [_mm(y[r * bt:(r + 1) * bt, :], wl1[r * 64:(r + 1) * 64, :])
             for r in range(8)]
    h = (((parts[0] + parts[1]) + (parts[2] + parts[3]))
         + ((parts[4] + parts[5]) + (parts[6] + parts[7])))              # (B,128)
    h = _leaky(h * sb[10:11, :] + sb[11:12, :])

    h = _mm(h, wl2[...])                                                 # (B,32)
    h = _leaky(h * sb[12:13, :32] + sb[13:14, :32])
    h = _mm(h, wl3[...])                                                 # (B,16)
    h = _leaky(h * sb[14:15, :16] + sb[15:16, :16])

    o_ref[...] = (_mm(h, wl4[...]) + sb[16:17, :]).astype(o_ref.dtype)   # (B,128)


PARAM_ORDER = ("a1", "a2", "a3", "a4", "a5", "p1", "q1", "p2", "q2",
               "wl1", "wl2", "wl3", "wl4", "sb")


def net_deep_forward(x_nchw, kp):
    """x_nchw: (N, 3, 32, 32) -> logits (N, 10)."""
    n, c, hh, ww = x_nchw.shape
    assert (c, hh, ww) == (3, 32, 32), "net_deep expects 3x32x32 inputs"
    b_tile = kp["p2"].shape[0] // 8                       # images per grid step

    x = jnp.transpose(x_nchw, (0, 2, 3, 1)).astype(jnp.float32)   # (N,32,32,3)
    n_pad = ((n + b_tile - 1) // b_tile) * b_tile
    if n_pad != n:
        x = jnp.pad(x, ((0, n_pad - n), (0, 0), (0, 0), (0, 0)))
    x = x.reshape(n_pad * hh, ww * c)                     # stacked (H, W*Cin)

    weights = tuple(kp[k] for k in PARAM_ORDER)
    in_specs = [pl.BlockSpec((b_tile * hh, ww * c), lambda i: (i, 0))]
    for w in weights:
        in_specs.append(pl.BlockSpec(w.shape, lambda i, _nd=w.ndim: (0,) * _nd))

    out = pl.pallas_call(
        net_deep_kernel,
        out_shape=jax.ShapeDtypeStruct((n_pad, 128), jnp.float32),
        grid=(n_pad // b_tile,),
        in_specs=in_specs,
        out_specs=pl.BlockSpec((b_tile, 128), lambda i: (i, 0)),
        compiler_params=pltpu.CompilerParams(dimension_semantics=("parallel",)),
    )(x, *weights)
    return out[:n, :10]


# ----------------------------------------------------------------------------
# Parameter construction: torch-layout raw params -> kernel layout.
# ----------------------------------------------------------------------------
def _bn_fold(bias_pre, gamma, beta, mean, var):
    s = gamma / jnp.sqrt(var + EPS)
    return s, (bias_pre - mean) * s + beta


def _banded_conv_weights(w_torch, width):
    """Torch Conv2d weight (Cout, Cin, 3, 3) -> (3, width*Cin, width*Cout) slabs.

    Slab kh maps input row h+kh-1 (layout (H, W*Cin)) to output row h (layout
    (H, W*Cout)); the band encodes the 3 kw taps and zero padding along W.
    """
    w = jnp.transpose(w_torch, (2, 3, 1, 0)).astype(jnp.float32)  # (kh,kw,Cin,Cout)
    slabs = []
    for kh in range(3):
        a = jnp.zeros((width * w.shape[2], width * w.shape[3]), jnp.float32)
        for kw in range(3):
            shift = jnp.asarray(np.eye(width, k=1 - kw, dtype=np.float32))
            a = a + jnp.kron(shift, w[kh, kw])
        slabs.append(a)
    return jnp.stack(slabs)


def _pool_p_stacked(b, h_in):
    # Pairwise row pooling over the stacked (b*h_in) rows; output row b*h/2+i
    # averages input rows b*h_in+2i, +1 -- identical to plain 2:1 pooling.
    m = b * h_in
    return jnp.asarray(0.5 * np.repeat(np.eye(m // 2, dtype=np.float32), 2, axis=1))


def _pool_p_permuted(b, h_in):
    # Same pooling, but output row o = local_h*b + batch so the MLP can slice
    # contiguous (b, lanes) blocks per local_h without any relayout.
    h_out = h_in // 2
    p = np.zeros((b * h_out, b * h_in), np.float32)
    for hh in range(h_out):
        for bb in range(b):
            p[hh * b + bb, bb * h_in + 2 * hh] = 0.5
            p[hh * b + bb, bb * h_in + 2 * hh + 1] = 0.5
    return jnp.asarray(p)


def _pool_q(width, c):
    r = np.repeat(np.eye(width // 2, dtype=np.float32), 2, axis=0)    # (w, w/2)
    return jnp.asarray(0.5 * np.kron(r, np.eye(c, dtype=np.float32)))  # (w*c, w/2*c)


def _flatten_perm():
    # kernel flat order: h*64 + w*8 + c;  torch .view(N,-1) order: c*64 + h*8 + w
    perm = np.empty(8 * 8 * 8, np.int32)
    for h in range(8):
        for w in range(8):
            for c in range(8):
                perm[h * 64 + w * 8 + c] = c * 64 + h * 8 + w
    return jnp.asarray(perm)


def _bn_stats(key, c):
    k1, k2, k3, k4 = jax.random.split(key, 4)
    return dict(
        gamma=1.0 + 0.1 * jax.random.normal(k1, (c,), jnp.float32),
        beta=0.1 * jax.random.normal(k2, (c,), jnp.float32),
        mean=0.1 * jax.random.normal(k3, (c,), jnp.float32),
        var=1.0 + 0.1 * jax.random.uniform(k4, (c,), jnp.float32),
    )


def init_raw_params(key):
    """Deterministic random torch-layout parameters for net_deep (eval-mode BN)."""
    conv_io = [(3, 4), (4, 4), (4, 4), (4, 8), (8, 8)]
    lin_io = [(512, 128), (128, 32), (32, 16), (16, 10)]
    keys = jax.random.split(key, len(conv_io) + len(lin_io))
    convs, lins = [], []
    for k, (cin, cout) in zip(keys[:5], conv_io):
        kw_, kb, kbn = jax.random.split(k, 3)
        convs.append(dict(
            w=jax.random.normal(kw_, (cout, cin, 3, 3), jnp.float32)
              / float(np.sqrt(9.0 * cin)),
            b=0.05 * jax.random.normal(kb, (cout,), jnp.float32),
            **_bn_stats(kbn, cout)))
    for i, (k, (din, dout)) in enumerate(zip(keys[5:], lin_io)):
        kw_, kb, kbn = jax.random.split(k, 3)
        lin = dict(
            w=jax.random.normal(kw_, (din, dout), jnp.float32) / float(np.sqrt(din)),
            b=0.05 * jax.random.normal(kb, (dout,), jnp.float32))
        if i < 3:
            lin.update(_bn_stats(kbn, dout))
        lins.append(lin)
    return dict(conv=convs, lin=lins)


def prepare_kernel_params(raw, b_tile=B_TILE):
    widths = [32, 32, 32, 16, 16]
    kp = {}
    sb_rows = []
    for i, (cp, wd) in enumerate(zip(raw["conv"], widths), start=1):
        s, b = _bn_fold(cp["b"], cp["gamma"], cp["beta"], cp["mean"], cp["var"])
        kp[f"a{i}"] = _banded_conv_weights(cp["w"], wd).astype(MXU_DTYPE)
        sb_rows += [jnp.tile(s, wd), jnp.tile(b, wd)]          # each (128,)
    kp["p1"] = _pool_p_stacked(b_tile, 32).astype(MXU_DTYPE)
    kp["q1"] = _pool_q(32, 4).astype(MXU_DTYPE)
    kp["p2"] = _pool_p_permuted(b_tile, 16).astype(MXU_DTYPE)
    kp["q2"] = _pool_q(16, 8).astype(MXU_DTYPE)

    def pad128(v):
        return jnp.pad(v, (0, 128 - v.shape[0]))

    l1, l2, l3, l4 = raw["lin"]
    s, b = _bn_fold(l1["b"], l1["gamma"], l1["beta"], l1["mean"], l1["var"])
    kp["wl1"] = l1["w"][_flatten_perm(), :].astype(MXU_DTYPE)
    sb_rows += [s, b]
    s, b = _bn_fold(l2["b"], l2["gamma"], l2["beta"], l2["mean"], l2["var"])
    kp["wl2"] = l2["w"].astype(MXU_DTYPE)
    sb_rows += [pad128(s), pad128(b)]
    s, b = _bn_fold(l3["b"], l3["gamma"], l3["beta"], l3["mean"], l3["var"])
    kp["wl3"] = l3["w"].astype(MXU_DTYPE)
    sb_rows += [pad128(s), pad128(b)]
    kp["wl4"] = jnp.pad(l4["w"], ((0, 0), (0, 128 - l4["w"].shape[1]))).astype(MXU_DTYPE)
    sb_rows += [pad128(l4["b"])]
    kp["sb"] = jnp.stack(sb_rows).astype(jnp.float32)          # (17, 128)
    return kp


# ----------------------------------------------------------------------------
# Pure-JAX reference (mirrors net_deep.forward, eval-mode BN) for self-check.
# ----------------------------------------------------------------------------
def ref_forward(x_nchw, raw):
    def bn(y, p):
        return (y - p["mean"]) / jnp.sqrt(p["var"] + EPS) * p["gamma"] + p["beta"]

    def conv(x, cp):
        w = jnp.transpose(cp["w"], (2, 3, 1, 0))                      # (3,3,Cin,Cout)
        n, hh, ww, _ = x.shape
        xp = jnp.pad(x, ((0, 0), (1, 1), (1, 1), (0, 0)))
        y = jnp.zeros((n, hh, ww, w.shape[-1]), jnp.float32)
        for kh in range(3):
            for kw in range(3):
                y = y + jnp.einsum("nhwc,cd->nhwd",
                                   xp[:, kh:kh + hh, kw:kw + ww, :], w[kh, kw])
        y = bn(y + cp["b"], cp)
        return jnp.where(y > 0, y, LEAKY_SLOPE * y)

    def pool(x):
        n, hh, ww, c = x.shape
        return x.reshape(n, hh // 2, 2, ww // 2, 2, c).mean(axis=(2, 4))

    x = jnp.transpose(x_nchw, (0, 2, 3, 1)).astype(jnp.float32)
    x = conv(x, raw["conv"][0])
    x = conv(x, raw["conv"][1])
    x = conv(x, raw["conv"][2])
    x = pool(x)
    x = conv(x, raw["conv"][3])
    x = conv(x, raw["conv"][4])
    x = pool(x)
    x = jnp.transpose(x, (0, 3, 1, 2)).reshape(x.shape[0], -1)        # torch .view order
    for i, lp in enumerate(raw["lin"]):
        x = x @ lp["w"] + lp["b"]
        if i < 3:
            x = bn(x, lp)
            x = jnp.where(x > 0, x, LEAKY_SLOPE * x)
    return x


if __name__ == "__main__":
    key = jax.random.PRNGKey(0)
    k_x, k_p = jax.random.split(key)
    # Input shape implied by the module: (N, 3, 32, 32) so the conv stack -> (N, 8, 8, 8).
    x = jax.random.normal(k_x, (2, 3, 32, 32), jnp.float32)

    raw = init_raw_params(k_p)
    kp = prepare_kernel_params(raw)

    out = jax.jit(net_deep_forward)(x, kp)
    out = jax.block_until_ready(out)

    assert out.shape == (2, 10), out.shape
    assert bool(jnp.all(jnp.isfinite(out)))

    ref = ref_forward(x, raw)
    assert bool(jnp.allclose(out, ref, rtol=2e-3, atol=2e-3)), \
        float(jnp.max(jnp.abs(out - ref)))

    print("KERNEL_OK")
</pallas_src>

<mosaic_0001>
module attributes {stable_mosaic.version = 11 : i64} {
  func.func @net_deep_kernel(%arg0: i32, %arg1: memref<256x96xf32, #tpu.memory_space<vmem>>, %arg2: memref<3x96x128xf32, #tpu.memory_space<vmem>>, %arg3: memref<3x128x128xf32, #tpu.memory_space<vmem>>, %arg4: memref<3x128x128xf32, #tpu.memory_space<vmem>>, %arg5: memref<3x64x128xf32, #tpu.memory_space<vmem>>, %arg6: memref<3x128x128xf32, #tpu.memory_space<vmem>>, %arg7: memref<128x256xf32, #tpu.memory_space<vmem>>, %arg8: memref<128x64xf32, #tpu.memory_space<vmem>>, %arg9: memref<64x128xf32, #tpu.memory_space<vmem>>, %arg10: memref<128x64xf32, #tpu.memory_space<vmem>>, %arg11: memref<512x128xf32, #tpu.memory_space<vmem>>, %arg12: memref<128x32xf32, #tpu.memory_space<vmem>>, %arg13: memref<32x16xf32, #tpu.memory_space<vmem>>, %arg14: memref<16x128xf32, #tpu.memory_space<vmem>>, %arg15: memref<17x128xf32, #tpu.memory_space<vmem>>, %arg16: memref<8x128xf32, #tpu.memory_space<vmem>>) attributes {dimension_semantics = [#tpu.dimension_semantics<parallel>], iteration_bounds = array<i64: 1>, scalar_prefetch = 0 : i64, scratch_operands = 0 : i64, tpu.core_type = #tpu.core_type<tc>, window_params = [{transform_indices = @transform_0, window_bounds = array<i64: 256, 96>}, {pipeline_mode = #tpu.pipeline_mode<synchronous>, transform_indices = @transform_1, window_bounds = array<i64: 3, 96, 128>}, {pipeline_mode = #tpu.pipeline_mode<synchronous>, transform_indices = @transform_2, window_bounds = array<i64: 3, 128, 128>}, {pipeline_mode = #tpu.pipeline_mode<synchronous>, transform_indices = @transform_3, window_bounds = array<i64: 3, 128, 128>}, {pipeline_mode = #tpu.pipeline_mode<synchronous>, transform_indices = @transform_4, window_bounds = array<i64: 3, 64, 128>}, {pipeline_mode = #tpu.pipeline_mode<synchronous>, transform_indices = @transform_5, window_bounds = array<i64: 3, 128, 128>}, {pipeline_mode = #tpu.pipeline_mode<synchronous>, transform_indices = @transform_6, window_bounds = array<i64: 128, 256>}, {pipeline_mode = #tpu.pipeline_mode<synchronous>, transform_indices = @transform_7, window_bounds = array<i64: 128, 64>}, {pipeline_mode = #tpu.pipeline_mode<synchronous>, transform_indices = @transform_8, window_bounds = array<i64: 64, 128>}, {pipeline_mode = #tpu.pipeline_mode<synchronous>, transform_indices = @transform_9, window_bounds = array<i64: 128, 64>}, {pipeline_mode = #tpu.pipeline_mode<synchronous>, transform_indices = @transform_10, window_bounds = array<i64: 512, 128>}, {pipeline_mode = #tpu.pipeline_mode<synchronous>, transform_indices = @transform_11, window_bounds = array<i64: 128, 32>}, {pipeline_mode = #tpu.pipeline_mode<synchronous>, transform_indices = @transform_12, window_bounds = array<i64: 32, 16>}, {pipeline_mode = #tpu.pipeline_mode<synchronous>, transform_indices = @transform_13, window_bounds = array<i64: 16, 128>}, {pipeline_mode = #tpu.pipeline_mode<synchronous>, transform_indices = @transform_14, window_bounds = array<i64: 17, 128>}, {transform_indices = @transform_15, window_bounds = array<i64: 8, 128>}]} {
    %c0 = arith.constant 0 : index
    %c0_0 = arith.constant 0 : index
    %0 = vector.load %arg1[%c0, %c0_0] : memref<256x96xf32, #tpu.memory_space<vmem>>, vector<256x96xf32>
    %1 = tpu.iota {dimensions = array<i32: 0>} : vector<256x96xi32>
    %c31_i32 = arith.constant 31 : i32
    %2 = vector.broadcast %c31_i32 : i32 to vector<256x96xi32>
    %3 = arith.andi %1, %2 : vector<256x96xi32>
    %c0_i32 = arith.constant 0 : i32
    %4 = vector.broadcast %c0_i32 : i32 to vector<256x96xi32>
    %5 = arith.cmpi eq, %3, %4 : vector<256x96xi32>
    %c1_i32 = arith.constant 1 : i32
    %6 = tpu.dynamic_rotate %0 by %c1_i32 dim 0 : vector<256x96xf32>, i32 -> vector<256x96xf32>
    %cst = arith.constant 0.000000e+00 : f32
    %7 = vector.broadcast %cst : f32 to vector<256x96xf32>
    %8 = arith.select %5, %7, %6 : vector<256x96xi1>, vector<256x96xf32>
    %c31_i32_1 = arith.constant 31 : i32
    %9 = vector.broadcast %c31_i32_1 : i32 to vector<256x96xi32>
    %10 = arith.cmpi eq, %3, %9 : vector<256x96xi32>
    %c255_i32 = arith.constant 255 : i32
    %11 = tpu.dynamic_rotate %0 by %c255_i32 dim 0 : vector<256x96xf32>, i32 -> vector<256x96xf32>
    %cst_2 = arith.constant 0.000000e+00 : f32
    %12 = vector.broadcast %cst_2 : f32 to vector<256x96xf32>
    %13 = arith.select %10, %12, %11 : vector<256x96xi1>, vector<256x96xf32>
    %c0_3 = arith.constant 0 : index
    %c0_4 = arith.constant 0 : index
    %c0_5 = arith.constant 0 : index
    %14 = vector.load %arg2[%c0_3, %c0_4, %c0_5] : memref<3x96x128xf32, #tpu.memory_space<vmem>>, vector<1x96x128xf32>
    %15 = vector.shape_cast %14 : vector<1x96x128xf32> to vector<96x128xf32>
    %cst_6 = arith.constant dense<0.000000e+00> : vector<256x128xf32>
    %16 = tpu.matmul %8, %15, %cst_6 {dimension_numbers = #tpu.dot_dimension_numbers<[1], [0], [0], [1], [0, 0, 1, 1], [], []>} : vector<256x96xf32>, vector<96x128xf32>, vector<256x128xf32> -> vector<256x128xf32>
    %c1 = arith.constant 1 : index
    %c0_7 = arith.constant 0 : index
    %c0_8 = arith.constant 0 : index
    %17 = vector.load %arg2[%c1, %c0_7, %c0_8] : memref<3x96x128xf32, #tpu.memory_space<vmem>>, vector<1x96x128xf32>
    %18 = vector.shape_cast %17 : vector<1x96x128xf32> to vector<96x128xf32>
    %cst_9 = arith.constant dense<0.000000e+00> : vector<256x128xf32>
    %19 = tpu.matmul %0, %18, %cst_9 {dimension_numbers = #tpu.dot_dimension_numbers<[1], [0], [0], [1], [0, 0, 1, 1], [], []>} : vector<256x96xf32>, vector<96x128xf32>, vector<256x128xf32> -> vector<256x128xf32>
    %20 = arith.addf %16, %19 : vector<256x128xf32>
    %c2 = arith.constant 2 : index
    %c0_10 = arith.constant 0 : index
    %c0_11 = arith.constant 0 : index
    %21 = vector.load %arg2[%c2, %c0_10, %c0_11] : memref<3x96x128xf32, #tpu.memory_space<vmem>>, vector<1x96x128xf32>
    %22 = vector.shape_cast %21 : vector<1x96x128xf32> to vector<96x128xf32>
    %cst_12 = arith.constant dense<0.000000e+00> : vector<256x128xf32>
    %23 = tpu.matmul %13, %22, %cst_12 {dimension_numbers = #tpu.dot_dimension_numbers<[1], [0], [0], [1], [0, 0, 1, 1], [], []>} : vector<256x96xf32>, vector<96x128xf32>, vector<256x128xf32> -> vector<256x128xf32>
    %24 = arith.addf %20, %23 : vector<256x128xf32>
    %c0_13 = arith.constant 0 : index
    %c0_14 = arith.constant 0 : index
    %25 = vector.load %arg15[%c0_13, %c0_14] : memref<17x128xf32, #tpu.memory_space<vmem>>, vector<1x128xf32>
    %26 = vector.broadcast %25 : vector<1x128xf32> to vector<256x128xf32>
    %27 = arith.mulf %24, %26 : vector<256x128xf32>
    %c1_15 = arith.constant 1 : index
    %c0_16 = arith.constant 0 : index
    %28 = vector.load %arg15[%c1_15, %c0_16] : memref<17x128xf32, #tpu.memory_space<vmem>>, vector<1x128xf32>
    %29 = vector.broadcast %28 : vector<1x128xf32> to vector<256x128xf32>
    %30 = arith.addf %27, %29 : vector<256x128xf32>
    %cst_17 = arith.constant 0.000000e+00 : f32
    %31 = vector.broadcast %cst_17 : f32 to vector<256x128xf32>
    %32 = arith.cmpf ogt, %30, %31 : vector<256x128xf32>
    %cst_18 = arith.constant 0.00999999977 : f32
    %33 = vector.broadcast %cst_18 : f32 to vector<256x128xf32>
    %34 = arith.mulf %33, %30 : vector<256x128xf32>
    %35 = arith.select %32, %30, %34 : vector<256x128xi1>, vector<256x128xf32>
    %36 = tpu.iota {dimensions = array<i32: 0>} : vector<256x128xi32>
    %c31_i32_19 = arith.constant 31 : i32
    %37 = vector.broadcast %c31_i32_19 : i32 to vector<256x128xi32>
    %38 = arith.andi %36, %37 : vector<256x128xi32>
    %c0_i32_20 = arith.constant 0 : i32
    %39 = vector.broadcast %c0_i32_20 : i32 to vector<256x128xi32>
    %40 = arith.cmpi eq, %38, %39 : vector<256x128xi32>
    %c1_i32_21 = arith.constant 1 : i32
    %41 = tpu.dynamic_rotate %35 by %c1_i32_21 dim 0 : vector<256x128xf32>, i32 -> vector<256x128xf32>
    %cst_22 = arith.constant 0.000000e+00 : f32
    %42 = vector.broadcast %cst_22 : f32 to vector<256x128xf32>
    %43 = arith.select %40, %42, %41 : vector<256x128xi1>, vector<256x128xf32>
    %c31_i32_23 = arith.constant 31 : i32
    %44 = vector.broadcast %c31_i32_23 : i32 to vector<256x128xi32>
    %45 = arith.cmpi eq, %38, %44 : vector<256x128xi32>
    %c255_i32_24 = arith.constant 255 : i32
    %46 = tpu.dynamic_rotate %35 by %c255_i32_24 dim 0 : vector<256x128xf32>, i32 -> vector<256x128xf32>
    %cst_25 = arith.constant 0.000000e+00 : f32
    %47 = vector.broadcast %cst_25 : f32 to vector<256x128xf32>
    %48 = arith.select %45, %47, %46 : vector<256x128xi1>, vector<256x128xf32>
    %c0_26 = arith.constant 0 : index
    %c0_27 = arith.constant 0 : index
    %c0_28 = arith.constant 0 : index
    %49 = vector.load %arg3[%c0_26, %c0_27, %c0_28] : memref<3x128x128xf32, #tpu.memory_space<vmem>>, vector<1x128x128xf32>
    %50 = vector.shape_cast %49 : vector<1x128x128xf32> to vector<128x128xf32>
    %cst_29 = arith.constant dense<0.000000e+00> : vector<256x128xf32>
    %51 = tpu.matmul %43, %50, %cst_29 {dimension_numbers = #tpu.dot_dimension_numbers<[1], [0], [0], [1], [0, 0, 1, 1], [], []>} : vector<256x128xf32>, vector<128x128xf32>, vector<256x128xf32> -> vector<256x128xf32>
    %c1_30 = arith.constant 1 : index
    %c0_31 = arith.constant 0 : index
    %c0_32 = arith.constant 0 : index
    %52 = vector.load %arg3[%c1_30, %c0_31, %c0_32] : memref<3x128x128xf32, #tpu.memory_space<vmem>>, vector<1x128x128xf32>
    %53 = vector.shape_cast %52 : vector<1x128x128xf32> to vector<128x128xf32>
    %cst_33 = arith.constant dense<0.000000e+00> : vector<256x128xf32>
    %54 = tpu.matmul %35, %53, %cst_33 {dimension_numbers = #tpu.dot_dimension_numbers<[1], [0], [0], [1], [0, 0, 1, 1], [], []>} : vector<256x128xf32>, vector<128x128xf32>, vector<256x128xf32> -> vector<256x128xf32>
    %55 = arith.addf %51, %54 : vector<256x128xf32>
    %c2_34 = arith.constant 2 : index
    %c0_35 = arith.constant 0 : index
    %c0_36 = arith.constant 0 : index
    %56 = vector.load %arg3[%c2_34, %c0_35, %c0_36] : memref<3x128x128xf32, #tpu.memory_space<vmem>>, vector<1x128x128xf32>
    %57 = vector.shape_cast %56 : vector<1x128x128xf32> to vector<128x128xf32>
    %cst_37 = arith.constant dense<0.000000e+00> : vector<256x128xf32>
    %58 = tpu.matmul %48, %57, %cst_37 {dimension_numbers = #tpu.dot_dimension_numbers<[1], [0], [0], [1], [0, 0, 1, 1], [], []>} : vector<256x128xf32>, vector<128x128xf32>, vector<256x128xf32> -> vector<256x128xf32>
    %59 = arith.addf %55, %58 : vector<256x128xf32>
    %c2_38 = arith.constant 2 : index
    %c0_39 = arith.constant 0 : index
    %60 = vector.load %arg15[%c2_38, %c0_39] : memref<17x128xf32, #tpu.memory_space<vmem>>, vector<1x128xf32>
    %61 = vector.broadcast %60 : vector<1x128xf32> to vector<256x128xf32>
    %62 = arith.mulf %59, %61 : vector<256x128xf32>
    %c3 = arith.constant 3 : index
    %c0_40 = arith.constant 0 : index
    %63 = vector.load %arg15[%c3, %c0_40] : memref<17x128xf32, #tpu.memory_space<vmem>>, vector<1x128xf32>
    %64 = vector.broadcast %63 : vector<1x128xf32> to vector<256x128xf32>
    %65 = arith.addf %62, %64 : vector<256x128xf32>
    %cst_41 = arith.constant 0.000000e+00 : f32
    %66 = vector.broadcast %cst_41 : f32 to vector<256x128xf32>
    %67 = arith.cmpf ogt, %65, %66 : vector<256x128xf32>
    %cst_42 = arith.constant 0.00999999977 : f32
    %68 = vector.broadcast %cst_42 : f32 to vector<256x128xf32>
    %69 = arith.mulf %68, %65 : vector<256x128xf32>
    %70 = arith.select %67, %65, %69 : vector<256x128xi1>, vector<256x128xf32>
    %71 = tpu.iota {dimensions = array<i32: 0>} : vector<256x128xi32>
    %c31_i32_43 = arith.constant 31 : i32
    %72 = vector.broadcast %c31_i32_43 : i32 to vector<256x128xi32>
    %73 = arith.andi %71, %72 : vector<256x128xi32>
    %c0_i32_44 = arith.constant 0 : i32
    %74 = vector.broadcast %c0_i32_44 : i32 to vector<256x128xi32>
    %75 = arith.cmpi eq, %73, %74 : vector<256x128xi32>
    %c1_i32_45 = arith.constant 1 : i32
    %76 = tpu.dynamic_rotate %70 by %c1_i32_45 dim 0 : vector<256x128xf32>, i32 -> vector<256x128xf32>
    %cst_46 = arith.constant 0.000000e+00 : f32
    %77 = vector.broadcast %cst_46 : f32 to vector<256x128xf32>
    %78 = arith.select %75, %77, %76 : vector<256x128xi1>, vector<256x128xf32>
    %c31_i32_47 = arith.constant 31 : i32
    %79 = vector.broadcast %c31_i32_47 : i32 to vector<256x128xi32>
    %80 = arith.cmpi eq, %73, %79 : vector<256x128xi32>
    %c255_i32_48 = arith.constant 255 : i32
    %81 = tpu.dynamic_rotate %70 by %c255_i32_48 dim 0 : vector<256x128xf32>, i32 -> vector<256x128xf32>
    %cst_49 = arith.constant 0.000000e+00 : f32
    %82 = vector.broadcast %cst_49 : f32 to vector<256x128xf32>
    %83 = arith.select %80, %82, %81 : vector<256x128xi1>, vector<256x128xf32>
    %c0_50 = arith.constant 0 : index
    %c0_51 = arith.constant 0 : index
    %c0_52 = arith.constant 0 : index
    %84 = vector.load %arg4[%c0_50, %c0_51, %c0_52] : memref<3x128x128xf32, #tpu.memory_space<vmem>>, vector<1x128x128xf32>
    %85 = vector.shape_cast %84 : vector<1x128x128xf32> to vector<128x128xf32>
    %cst_53 = arith.constant dense<0.000000e+00> : vector<256x128xf32>
    %86 = tpu.matmul %78, %85, %cst_53 {dimension_numbers = #tpu.dot_dimension_numbers<[1], [0], [0], [1], [0, 0, 1, 1], [], []>} : vector<256x128xf32>, vector<128x128xf32>, vector<256x128xf32> -> vector<256x128xf32>
    %c1_54 = arith.constant 1 : index
    %c0_55 = arith.constant 0 : index
    %c0_56 = arith.constant 0 : index
    %87 = vector.load %arg4[%c1_54, %c0_55, %c0_56] : memref<3x128x128xf32, #tpu.memory_space<vmem>>, vector<1x128x128xf32>
    %88 = vector.shape_cast %87 : vector<1x128x128xf32> to vector<128x128xf32>
    %cst_57 = arith.constant dense<0.000000e+00> : vector<256x128xf32>
    %89 = tpu.matmul %70, %88, %cst_57 {dimension_numbers = #tpu.dot_dimension_numbers<[1], [0], [0], [1], [0, 0, 1, 1], [], []>} : vector<256x128xf32>, vector<128x128xf32>, vector<256x128xf32> -> vector<256x128xf32>
    %90 = arith.addf %86, %89 : vector<256x128xf32>
    %c2_58 = arith.constant 2 : index
    %c0_59 = arith.constant 0 : index
    %c0_60 = arith.constant 0 : index
    %91 = vector.load %arg4[%c2_58, %c0_59, %c0_60] : memref<3x128x128xf32, #tpu.memory_space<vmem>>, vector<1x128x128xf32>
    %92 = vector.shape_cast %91 : vector<1x128x128xf32> to vector<128x128xf32>
    %cst_61 = arith.constant dense<0.000000e+00> : vector<256x128xf32>
    %93 = tpu.matmul %83, %92, %cst_61 {dimension_numbers = #tpu.dot_dimension_numbers<[1], [0], [0], [1], [0, 0, 1, 1], [], []>} : vector<256x128xf32>, vector<128x128xf32>, vector<256x128xf32> -> vector<256x128xf32>
    %94 = arith.addf %90, %93 : vector<256x128xf32>
    %c4 = arith.constant 4 : index
    %c0_62 = arith.constant 0 : index
    %95 = vector.load %arg15[%c4, %c0_62] : memref<17x128xf32, #tpu.memory_space<vmem>>, vector<1x128xf32>
    %96 = vector.broadcast %95 : vector<1x128xf32> to vector<256x128xf32>
    %97 = arith.mulf %94, %96 : vector<256x128xf32>
    %c5 = arith.constant 5 : index
    %c0_63 = arith.constant 0 : index
    %98 = vector.load %arg15[%c5, %c0_63] : memref<17x128xf32, #tpu.memory_space<vmem>>, vector<1x128xf32>
    %99 = vector.broadcast %98 : vector<1x128xf32> to vector<256x128xf32>
    %100 = arith.addf %97, %99 : vector<256x128xf32>
    %cst_64 = arith.constant 0.000000e+00 : f32
    %101 = vector.broadcast %cst_64 : f32 to vector<256x128xf32>
    %102 = arith.cmpf ogt, %100, %101 : vector<256x128xf32>
    %cst_65 = arith.constant 0.00999999977 : f32
    %103 = vector.broadcast %cst_65 : f32 to vector<256x128xf32>
    %104 = arith.mulf %103, %100 : vector<256x128xf32>
    %105 = arith.select %102, %100, %104 : vector<256x128xi1>, vector<256x128xf32>
    %c0_66 = arith.constant 0 : index
    %c0_67 = arith.constant 0 : index
    %106 = vector.load %arg7[%c0_66, %c0_67] : memref<128x256xf32, #tpu.memory_space<vmem>>, vector<128x256xf32>
    %cst_68 = arith.constant dense<0.000000e+00> : vector<128x128xf32>
    %107 = tpu.matmul %106, %105, %cst_68 {dimension_numbers = #tpu.dot_dimension_numbers<[1], [0], [0], [1], [0, 0, 1, 1], [], []>} : vector<128x256xf32>, vector<256x128xf32>, vector<128x128xf32> -> vector<128x128xf32>
    %c0_69 = arith.constant 0 : index
    %c0_70 = arith.constant 0 : index
    %108 = vector.load %arg8[%c0_69, %c0_70] : memref<128x64xf32, #tpu.memory_space<vmem>>, vector<128x64xf32>
    %cst_71 = arith.constant dense<0.000000e+00> : vector<128x64xf32>
    %109 = tpu.matmul %107, %108, %cst_71 {dimension_numbers = #tpu.dot_dimension_numbers<[1], [0], [0], [1], [0, 0, 1, 1], [], []>} : vector<128x128xf32>, vector<128x64xf32>, vector<128x64xf32> -> vector<128x64xf32>
    %110 = tpu.iota {dimensions = array<i32: 0>} : vector<128x64xi32>
    %c15_i32 = arith.constant 15 : i32
    %111 = vector.broadcast %c15_i32 : i32 to vector<128x64xi32>
    %112 = arith.andi %110, %111 : vector<128x64xi32>
    %c0_i32_72 = arith.constant 0 : i32
    %113 = vector.broadcast %c0_i32_72 : i32 to vector<128x64xi32>
    %114 = arith.cmpi eq, %112, %113 : vector<128x64xi32>
    %c1_i32_73 = arith.constant 1 : i32
    %115 = tpu.dynamic_rotate %109 by %c1_i32_73 dim 0 : vector<128x64xf32>, i32 -> vector<128x64xf32>
    %cst_74 = arith.constant 0.000000e+00 : f32
    %116 = vector.broadcast %cst_74 : f32 to vector<128x64xf32>
    %117 = arith.select %114, %116, %115 : vector<128x64xi1>, vector<128x64xf32>
    %c15_i32_75 = arith.constant 15 : i32
    %118 = vector.broadcast %c15_i32_75 : i32 to vector<128x64xi32>
    %119 = arith.cmpi eq, %112, %118 : vector<128x64xi32>
    %c127_i32 = arith.constant 127 : i32
    %120 = tpu.dynamic_rotate %109 by %c127_i32 dim 0 : vector<128x64xf32>, i32 -> vector<128x64xf32>
    %cst_76 = arith.constant 0.000000e+00 : f32
    %121 = vector.broadcast %cst_76 : f32 to vector<128x64xf32>
    %122 = arith.select %119, %121, %120 : vector<128x64xi1>, vector<128x64xf32>
    %c0_77 = arith.constant 0 : index
    %c0_78 = arith.constant 0 : index
    %c0_79 = arith.constant 0 : index
    %123 = vector.load %arg5[%c0_77, %c0_78, %c0_79] : memref<3x64x128xf32, #tpu.memory_space<vmem>>, vector<1x64x128xf32>
    %124 = vector.shape_cast %123 : vector<1x64x128xf32> to vector<64x128xf32>
    %cst_80 = arith.constant dense<0.000000e+00> : vector<128x128xf32>
    %125 = tpu.matmul %117, %124, %cst_80 {dimension_numbers = #tpu.dot_dimension_numbers<[1], [0], [0], [1], [0, 0, 1, 1], [], []>} : vector<128x64xf32>, vector<64x128xf32>, vector<128x128xf32> -> vector<128x128xf32>
    %c1_81 = arith.constant 1 : index
    %c0_82 = arith.constant 0 : index
    %c0_83 = arith.constant 0 : index
    %126 = vector.load %arg5[%c1_81, %c0_82, %c0_83] : memref<3x64x128xf32, #tpu.memory_space<vmem>>, vector<1x64x128xf32>
    %127 = vector.shape_cast %126 : vector<1x64x128xf32> to vector<64x128xf32>
    %cst_84 = arith.constant dense<0.000000e+00> : vector<128x128xf32>
    %128 = tpu.matmul %109, %127, %cst_84 {dimension_numbers = #tpu.dot_dimension_numbers<[1], [0], [0], [1], [0, 0, 1, 1], [], []>} : vector<128x64xf32>, vector<64x128xf32>, vector<128x128xf32> -> vector<128x128xf32>
    %129 = arith.addf %125, %128 : vector<128x128xf32>
    %c2_85 = arith.constant 2 : index
    %c0_86 = arith.constant 0 : index
    %c0_87 = arith.constant 0 : index
    %130 = vector.load %arg5[%c2_85, %c0_86, %c0_87] : memref<3x64x128xf32, #tpu.memory_space<vmem>>, vector<1x64x128xf32>
    %131 = vector.shape_cast %130 : vector<1x64x128xf32> to vector<64x128xf32>
    %cst_88 = arith.constant dense<0.000000e+00> : vector<128x128xf32>
    %132 = tpu.matmul %122, %131, %cst_88 {dimension_numbers = #tpu.dot_dimension_numbers<[1], [0], [0], [1], [0, 0, 1, 1], [], []>} : vector<128x64xf32>, vector<64x128xf32>, vector<128x128xf32> -> vector<128x128xf32>
    %133 = arith.addf %129, %132 : vector<128x128xf32>
    %c6 = arith.constant 6 : index
    %c0_89 = arith.constant 0 : index
    %134 = vector.load %arg15[%c6, %c0_89] : memref<17x128xf32, #tpu.memory_space<vmem>>, vector<1x128xf32>
    %135 = vector.broadcast %134 : vector<1x128xf32> to vector<128x128xf32>
    %136 = arith.mulf %133, %135 : vector<128x128xf32>
    %c7 = arith.constant 7 : index
    %c0_90 = arith.constant 0 : index
    %137 = vector.load %arg15[%c7, %c0_90] : memref<17x128xf32, #tpu.memory_space<vmem>>, vector<1x128xf32>
    %138 = vector.broadcast %137 : vector<1x128xf32> to vector<128x128xf32>
    %139 = arith.addf %136, %138 : vector<128x128xf32>
    %cst_91 = arith.constant 0.000000e+00 : f32
    %140 = vector.broadcast %cst_91 : f32 to vector<128x128xf32>
    %141 = arith.cmpf ogt, %139, %140 : vector<128x128xf32>
    %cst_92 = arith.constant 0.00999999977 : f32
    %142 = vector.broadcast %cst_92 : f32 to vector<128x128xf32>
    %143 = arith.mulf %142, %139 : vector<128x128xf32>
    %144 = arith.select %141, %139, %143 : vector<128x128xi1>, vector<128x128xf32>
    %145 = tpu.iota {dimensions = array<i32: 0>} : vector<128x128xi32>
    %c15_i32_93 = arith.constant 15 : i32
    %146 = vector.broadcast %c15_i32_93 : i32 to vector<128x128xi32>
    %147 = arith.andi %145, %146 : vector<128x128xi32>
    %c0_i32_94 = arith.constant 0 : i32
    %148 = vector.broadcast %c0_i32_94 : i32 to vector<128x128xi32>
    %149 = arith.cmpi eq, %147, %148 : vector<128x128xi32>
    %c1_i32_95 = arith.constant 1 : i32
    %150 = tpu.dynamic_rotate %144 by %c1_i32_95 dim 0 : vector<128x128xf32>, i32 -> vector<128x128xf32>
    %cst_96 = arith.constant 0.000000e+00 : f32
    %151 = vector.broadcast %cst_96 : f32 to vector<128x128xf32>
    %152 = arith.select %149, %151, %150 : vector<128x128xi1>, vector<128x128xf32>
    %c15_i32_97 = arith.constant 15 : i32
    %153 = vector.broadcast %c15_i32_97 : i32 to vector<128x128xi32>
    %154 = arith.cmpi eq, %147, %153 : vector<128x128xi32>
    %c127_i32_98 = arith.constant 127 : i32
    %155 = tpu.dynamic_rotate %144 by %c127_i32_98 dim 0 : vector<128x128xf32>, i32 -> vector<128x128xf32>
    %cst_99 = arith.constant 0.000000e+00 : f32
    %156 = vector.broadcast %cst_99 : f32 to vector<128x128xf32>
    %157 = arith.select %154, %156, %155 : vector<128x128xi1>, vector<128x128xf32>
    %c0_100 = arith.constant 0 : index
    %c0_101 = arith.constant 0 : index
    %c0_102 = arith.constant 0 : index
    %158 = vector.load %arg6[%c0_100, %c0_101, %c0_102] : memref<3x128x128xf32, #tpu.memory_space<vmem>>, vector<1x128x128xf32>
    %159 = vector.shape_cast %158 : vector<1x128x128xf32> to vector<128x128xf32>
    %cst_103 = arith.constant dense<0.000000e+00> : vector<128x128xf32>
    %160 = tpu.matmul %152, %159, %cst_103 {dimension_numbers = #tpu.dot_dimension_numbers<[1], [0], [0], [1], [0, 0, 1, 1], [], []>} : vector<128x128xf32>, vector<128x128xf32>, vector<128x128xf32> -> vector<128x128xf32>
    %c1_104 = arith.constant 1 : index
    %c0_105 = arith.constant 0 : index
    %c0_106 = arith.constant 0 : index
    %161 = vector.load %arg6[%c1_104, %c0_105, %c0_106] : memref<3x128x128xf32, #tpu.memory_space<vmem>>, vector<1x128x128xf32>
    %162 = vector.shape_cast %161 : vector<1x128x128xf32> to vector<128x128xf32>
    %cst_107 = arith.constant dense<0.000000e+00> : vector<128x128xf32>
    %163 = tpu.matmul %144, %162, %cst_107 {dimension_numbers = #tpu.dot_dimension_numbers<[1], [0], [0], [1], [0, 0, 1, 1], [], []>} : vector<128x128xf32>, vector<128x128xf32>, vector<128x128xf32> -> vector<128x128xf32>
    %164 = arith.addf %160, %163 : vector<128x128xf32>
    %c2_108 = arith.constant 2 : index
    %c0_109 = arith.constant 0 : index
    %c0_110 = arith.constant 0 : index
    %165 = vector.load %arg6[%c2_108, %c0_109, %c0_110] : memref<3x128x128xf32, #tpu.memory_space<vmem>>, vector<1x128x128xf32>
    %166 = vector.shape_cast %165 : vector<1x128x128xf32> to vector<128x128xf32>
    %cst_111 = arith.constant dense<0.000000e+00> : vector<128x128xf32>
    %167 = tpu.matmul %157, %166, %cst_111 {dimension_numbers = #tpu.dot_dimension_numbers<[1], [0], [0], [1], [0, 0, 1, 1], [], []>} : vector<128x128xf32>, vector<128x128xf32>, vector<128x128xf32> -> vector<128x128xf32>
    %168 = arith.addf %164, %167 : vector<128x128xf32>
    %c8 = arith.constant 8 : index
    %c0_112 = arith.constant 0 : index
    %169 = vector.load %arg15[%c8, %c0_112] : memref<17x128xf32, #tpu.memory_space<vmem>>, vector<1x128xf32>
    %170 = vector.broadcast %169 : vector<1x128xf32> to vector<128x128xf32>
    %171 = arith.mulf %168, %170 : vector<128x128xf32>
    %c9 = arith.constant 9 : index
    %c0_113 = arith.constant 0 : index
    %172 = vector.load %arg15[%c9, %c0_113] : memref<17x128xf32, #tpu.memory_space<vmem>>, vector<1x128xf32>
    %173 = vector.broadcast %172 : vector<1x128xf32> to vector<128x128xf32>
    %174 = arith.addf %171, %173 : vector<128x128xf32>
    %cst_114 = arith.constant 0.000000e+00 : f32
    %175 = vector.broadcast %cst_114 : f32 to vector<128x128xf32>
    %176 = arith.cmpf ogt, %174, %175 : vector<128x128xf32>
    %cst_115 = arith.constant 0.00999999977 : f32
    %177 = vector.broadcast %cst_115 : f32 to vector<128x128xf32>
    %178 = arith.mulf %177, %174 : vector<128x128xf32>
    %179 = arith.select %176, %174, %178 : vector<128x128xi1>, vector<128x128xf32>
    %c0_116 = arith.constant 0 : index
    %c0_117 = arith.constant 0 : index
    %180 = vector.load %arg9[%c0_116, %c0_117] : memref<64x128xf32, #tpu.memory_space<vmem>>, vector<64x128xf32>
    %cst_118 = arith.constant dense<0.000000e+00> : vector<64x128xf32>
    %181 = tpu.matmul %180, %179, %cst_118 {dimension_numbers = #tpu.dot_dimension_numbers<[1], [0], [0], [1], [0, 0, 1, 1], [], []>} : vector<64x128xf32>, vector<128x128xf32>, vector<64x128xf32> -> vector<64x128xf32>
    %c0_119 = arith.constant 0 : index
    %c0_120 = arith.constant 0 : index
    %182 = vector.load %arg10[%c0_119, %c0_120] : memref<128x64xf32, #tpu.memory_space<vmem>>, vector<128x64xf32>
    %cst_121 = arith.constant dense<0.000000e+00> : vector<64x64xf32>
    %183 = tpu.matmul %181, %182, %cst_121 {dimension_numbers = #tpu.dot_dimension_numbers<[1], [0], [0], [1], [0, 0, 1, 1], [], []>} : vector<64x128xf32>, vector<128x64xf32>, vector<64x64xf32> -> vector<64x64xf32>
    %184 = vector.extract_strided_slice %183 {offsets = [0, 0], sizes = [8, 64], strides = [1, 1]} : vector<64x64xf32> to vector<8x64xf32>
    %c0_122 = arith.constant 0 : index
    %c0_123 = arith.constant 0 : index
    %185 = vector.load %arg11[%c0_122, %c0_123] : memref<512x128xf32, #tpu.memory_space<vmem>>, vector<64x128xf32>
    %cst_124 = arith.constant dense<0.000000e+00> : vector<8x128xf32>
    %186 = tpu.matmul %184, %185, %cst_124 {dimension_numbers = #tpu.dot_dimension_numbers<[1], [0], [0], [1], [0, 0, 1, 1], [], []>} : vector<8x64xf32>, vector<64x128xf32>, vector<8x128xf32> -> vector<8x128xf32>
    %187 = vector.extract_strided_slice %183 {offsets = [8, 0], sizes = [8, 64], strides = [1, 1]} : vector<64x64xf32> to vector<8x64xf32>
    %c64 = arith.constant 64 : index
    %c0_125 = arith.constant 0 : index
    %188 = vector.load %arg11[%c64, %c0_125] : memref<512x128xf32, #tpu.memory_space<vmem>>, vector<64x128xf32>
    %cst_126 = arith.constant dense<0.000000e+00> : vector<8x128xf32>
    %189 = tpu.matmul %187, %188, %cst_126 {dimension_numbers = #tpu.dot_dimension_numbers<[1], [0], [0], [1], [0, 0, 1, 1], [], []>} : vector<8x64xf32>, vector<64x128xf32>, vector<8x128xf32> -> vector<8x128xf32>
    %190 = vector.extract_strided_slice %183 {offsets = [16, 0], sizes = [8, 64], strides = [1, 1]} : vector<64x64xf32> to vector<8x64xf32>
    %c128 = arith.constant 128 : index
    %c0_127 = arith.constant 0 : index
    %191 = vector.load %arg11[%c128, %c0_127] : memref<512x128xf32, #tpu.memory_space<vmem>>, vector<64x128xf32>
    %cst_128 = arith.constant dense<0.000000e+00> : vector<8x128xf32>
    %192 = tpu.matmul %190, %191, %cst_128 {dimension_numbers = #tpu.dot_dimension_numbers<[1], [0], [0], [1], [0, 0, 1, 1], [], []>} : vector<8x64xf32>, vector<64x128xf32>, vector<8x128xf32> -> vector<8x128xf32>
    %193 = vector.extract_strided_slice %183 {offsets = [24, 0], sizes = [8, 64], strides = [1, 1]} : vector<64x64xf32> to vector<8x64xf32>
    %c192 = arith.constant 192 : index
    %c0_129 = arith.constant 0 : index
    %194 = vector.load %arg11[%c192, %c0_129] : memref<512x128xf32, #tpu.memory_space<vmem>>, vector<64x128xf32>
    %cst_130 = arith.constant dense<0.000000e+00> : vector<8x128xf32>
    %195 = tpu.matmul %193, %194, %cst_130 {dimension_numbers = #tpu.dot_dimension_numbers<[1], [0], [0], [1], [0, 0, 1, 1], [], []>} : vector<8x64xf32>, vector<64x128xf32>, vector<8x128xf32> -> vector<8x128xf32>
    %196 = vector.extract_strided_slice %183 {offsets = [32, 0], sizes = [8, 64], strides = [1, 1]} : vector<64x64xf32> to vector<8x64xf32>
    %c256 = arith.constant 256 : index
    %c0_131 = arith.constant 0 : index
    %197 = vector.load %arg11[%c256, %c0_131] : memref<512x128xf32, #tpu.memory_space<vmem>>, vector<64x128xf32>
    %cst_132 = arith.constant dense<0.000000e+00> : vector<8x128xf32>
    %198 = tpu.matmul %196, %197, %cst_132 {dimension_numbers = #tpu.dot_dimension_numbers<[1], [0], [0], [1], [0, 0, 1, 1], [], []>} : vector<8x64xf32>, vector<64x128xf32>, vector<8x128xf32> -> vector<8x128xf32>
    %199 = vector.extract_strided_slice %183 {offsets = [40, 0], sizes = [8, 64], strides = [1, 1]} : vector<64x64xf32> to vector<8x64xf32>
    %c320 = arith.constant 320 : index
    %c0_133 = arith.constant 0 : index
    %200 = vector.load %arg11[%c320, %c0_133] : memref<512x128xf32, #tpu.memory_space<vmem>>, vector<64x128xf32>
    %cst_134 = arith.constant dense<0.000000e+00> : vector<8x128xf32>
    %201 = tpu.matmul %199, %200, %cst_134 {dimension_numbers = #tpu.dot_dimension_numbers<[1], [0], [0], [1], [0, 0, 1, 1], [], []>} : vector<8x64xf32>, vector<64x128xf32>, vector<8x128xf32> -> vector<8x128xf32>
    %202 = vector.extract_strided_slice %183 {offsets = [48, 0], sizes = [8, 64], strides = [1, 1]} : vector<64x64xf32> to vector<8x64xf32>
    %c384 = arith.constant 384 : index
    %c0_135 = arith.constant 0 : index
    %203 = vector.load %arg11[%c384, %c0_135] : memref<512x128xf32, #tpu.memory_space<vmem>>, vector<64x128xf32>
    %cst_136 = arith.constant dense<0.000000e+00> : vector<8x128xf32>
    %204 = tpu.matmul %202, %203, %cst_136 {dimension_numbers = #tpu.dot_dimension_numbers<[1], [0], [0], [1], [0, 0, 1, 1], [], []>} : vector<8x64xf32>, vector<64x128xf32>, vector<8x128xf32> -> vector<8x128xf32>
    %205 = vector.extract_strided_slice %183 {offsets = [56, 0], sizes = [8, 64], strides = [1, 1]} : vector<64x64xf32> to vector<8x64xf32>
    %c448 = arith.constant 448 : index
    %c0_137 = arith.constant 0 : index
    %206 = vector.load %arg11[%c448, %c0_137] : memref<512x128xf32, #tpu.memory_space<vmem>>, vector<64x128xf32>
    %cst_138 = arith.constant dense<0.000000e+00> : vector<8x128xf32>
    %207 = tpu.matmul %205, %206, %cst_138 {dimension_numbers = #tpu.dot_dimension_numbers<[1], [0], [0], [1], [0, 0, 1, 1], [], []>} : vector<8x64xf32>, vector<64x128xf32>, vector<8x128xf32> -> vector<8x128xf32>
    %208 = arith.addf %186, %189 : vector<8x128xf32>
    %209 = arith.addf %192, %195 : vector<8x128xf32>
    %210 = arith.addf %208, %209 : vector<8x128xf32>
    %211 = arith.addf %198, %201 : vector<8x128xf32>
    %212 = arith.addf %204, %207 : vector<8x128xf32>
    %213 = arith.addf %211, %212 : vector<8x128xf32>
    %214 = arith.addf %210, %213 : vector<8x128xf32>
    %c10 = arith.constant 10 : index
    %c0_139 = arith.constant 0 : index
    %215 = vector.load %arg15[%c10, %c0_139] : memref<17x128xf32, #tpu.memory_space<vmem>>, vector<1x128xf32>
    %216 = vector.broadcast %215 : vector<1x128xf32> to vector<8x128xf32>
    %217 = arith.mulf %214, %216 : vector<8x128xf32>
    %c11 = arith.constant 11 : index
    %c0_140 = arith.constant 0 : index
    %218 = vector.load %arg15[%c11, %c0_140] : memref<17x128xf32, #tpu.memory_space<vmem>>, vector<1x128xf32>
    %219 = vector.broadcast %218 : vector<1x128xf32> to vector<8x128xf32>
    %220 = arith.addf %217, %219 : vector<8x128xf32>
    %cst_141 = arith.constant 0.000000e+00 : f32
    %221 = vector.broadcast %cst_141 : f32 to vector<8x128xf32>
    %222 = arith.cmpf ogt, %220, %221 : vector<8x128xf32>
    %cst_142 = arith.constant 0.00999999977 : f32
    %223 = vector.broadcast %cst_142 : f32 to vector<8x128xf32>
    %224 = arith.mulf %223, %220 : vector<8x128xf32>
    %225 = arith.select %222, %220, %224 : vector<8x128xi1>, vector<8x128xf32>
    %c0_143 = arith.constant 0 : index
    %c0_144 = arith.constant 0 : index
    %226 = vector.load %arg12[%c0_143, %c0_144] : memref<128x32xf32, #tpu.memory_space<vmem>>, vector<128x32xf32>
    %cst_145 = arith.constant dense<0.000000e+00> : vector<8x32xf32>
    %227 = tpu.matmul %225, %226, %cst_145 {dimension_numbers = #tpu.dot_dimension_numbers<[1], [0], [0], [1], [0, 0, 1, 1], [], []>} : vector<8x128xf32>, vector<128x32xf32>, vector<8x32xf32> -> vector<8x32xf32>
    %c12 = arith.constant 12 : index
    %c0_146 = arith.constant 0 : index
    %228 = vector.load %arg15[%c12, %c0_146] : memref<17x128xf32, #tpu.memory_space<vmem>>, vector<1x32xf32>
    %229 = vector.broadcast %228 : vector<1x32xf32> to vector<8x32xf32>
    %230 = arith.mulf %227, %229 : vector<8x32xf32>
    %c13 = arith.constant 13 : index
    %c0_147 = arith.constant 0 : index
    %231 = vector.load %arg15[%c13, %c0_147] : memref<17x128xf32, #tpu.memory_space<vmem>>, vector<1x32xf32>
    %232 = vector.broadcast %231 : vector<1x32xf32> to vector<8x32xf32>
    %233 = arith.addf %230, %232 : vector<8x32xf32>
    %cst_148 = arith.constant 0.000000e+00 : f32
    %234 = vector.broadcast %cst_148 : f32 to vector<8x32xf32>
    %235 = arith.cmpf ogt, %233, %234 : vector<8x32xf32>
    %cst_149 = arith.constant 0.00999999977 : f32
    %236 = vector.broadcast %cst_149 : f32 to vector<8x32xf32>
    %237 = arith.mulf %236, %233 : vector<8x32xf32>
    %238 = arith.select %235, %233, %237 : vector<8x32xi1>, vector<8x32xf32>
    %c0_150 = arith.constant 0 : index
    %c0_151 = arith.constant 0 : index
    %239 = vector.load %arg13[%c0_150, %c0_151] : memref<32x16xf32, #tpu.memory_space<vmem>>, vector<32x16xf32>
    %cst_152 = arith.constant dense<0.000000e+00> : vector<8x16xf32>
    %240 = tpu.matmul %238, %239, %cst_152 {dimension_numbers = #tpu.dot_dimension_numbers<[1], [0], [0], [1], [0, 0, 1, 1], [], []>} : vector<8x32xf32>, vector<32x16xf32>, vector<8x16xf32> -> vector<8x16xf32>
    %c14 = arith.constant 14 : index
    %c0_153 = arith.constant 0 : index
    %241 = vector.load %arg15[%c14, %c0_153] : memref<17x128xf32, #tpu.memory_space<vmem>>, vector<1x16xf32>
    %242 = vector.broadcast %241 : vector<1x16xf32> to vector<8x16xf32>
    %243 = arith.mulf %240, %242 : vector<8x16xf32>
    %c15 = arith.constant 15 : index
    %c0_154 = arith.constant 0 : index
    %244 = vector.load %arg15[%c15, %c0_154] : memref<17x128xf32, #tpu.memory_space<vmem>>, vector<1x16xf32>
    %245 = vector.broadcast %244 : vector<1x16xf32> to vector<8x16xf32>
    %246 = arith.addf %243, %245 : vector<8x16xf32>
    %cst_155 = arith.constant 0.000000e+00 : f32
    %247 = vector.broadcast %cst_155 : f32 to vector<8x16xf32>
    %248 = arith.cmpf ogt, %246, %247 : vector<8x16xf32>
    %cst_156 = arith.constant 0.00999999977 : f32
    %249 = vector.broadcast %cst_156 : f32 to vector<8x16xf32>
    %250 = arith.mulf %249, %246 : vector<8x16xf32>
    %251 = arith.select %248, %246, %250 : vector<8x16xi1>, vector<8x16xf32>
    %c0_157 = arith.constant 0 : index
    %c0_158 = arith.constant 0 : index
    %252 = vector.load %arg14[%c0_157, %c0_158] : memref<16x128xf32, #tpu.memory_space<vmem>>, vector<16x128xf32>
    %cst_159 = arith.constant dense<0.000000e+00> : vector<8x128xf32>
    %253 = tpu.matmul %251, %252, %cst_159 {dimension_numbers = #tpu.dot_dimension_numbers<[1], [0], [0], [1], [0, 0, 1, 1], [], []>} : vector<8x16xf32>, vector<16x128xf32>, vector<8x128xf32> -> vector<8x128xf32>
    %c16 = arith.constant 16 : index
    %c0_160 = arith.constant 0 : index
    %254 = vector.load %arg15[%c16, %c0_160] : memref<17x128xf32, #tpu.memory_space<vmem>>, vector<1x128xf32>
    %255 = vector.broadcast %254 : vector<1x128xf32> to vector<8x128xf32>
    %256 = arith.addf %253, %255 : vector<8x128xf32>
    %c0_161 = arith.constant 0 : index
    %c0_162 = arith.constant 0 : index
    %257 = vector.load %arg16[%c0_161, %c0_162] : memref<8x128xf32, #tpu.memory_space<vmem>>, vector<8x128xf32>
    tpu.vector_store %arg16[%c0_161, %c0_162], %256 {strides = array<i32>} : memref<8x128xf32, #tpu.memory_space<vmem>>, vector<8x128xf32>,
    return
  }
  func.func @transform_0(%arg0: i32) -> (i32, i32) {
    %c0_i32 = arith.constant 0 : i32
    %c0_i32_0 = arith.constant 0 : i32
    return %arg0, %c0_i32 : i32, i32
  }
  func.func @transform_1(%arg0: i32) -> (i32, i32, i32) {
    %c0_i32 = arith.constant 0 : i32
    %c0_i32_0 = arith.constant 0 : i32
    %c0_i32_1 = arith.constant 0 : i32
    %c0_i32_2 = arith.constant 0 : i32
    return %c0_i32, %c0_i32_0, %c0_i32_1 : i32, i32, i32
  }
  func.func @transform_2(%arg0: i32) -> (i32, i32, i32) {
    %c0_i32 = arith.constant 0 : i32
    %c0_i32_0 = arith.constant 0 : i32
    %c0_i32_1 = arith.constant 0 : i32
    %c0_i32_2 = arith.constant 0 : i32
    return %c0_i32, %c0_i32_0, %c0_i32_1 : i32, i32, i32
  }
  func.func @transform_3(%arg0: i32) -> (i32, i32, i32) {
    %c0_i32 = arith.constant 0 : i32
    %c0_i32_0 = arith.constant 0 : i32
    %c0_i32_1 = arith.constant 0 : i32
    %c0_i32_2 = arith.constant 0 : i32
    return %c0_i32, %c0_i32_0, %c0_i32_1 : i32, i32, i32
  }
  func.func @transform_4(%arg0: i32) -> (i32, i32, i32) {
    %c0_i32 = arith.constant 0 : i32
    %c0_i32_0 = arith.constant 0 : i32
    %c0_i32_1 = arith.constant 0 : i32
    %c0_i32_2 = arith.constant 0 : i32
    return %c0_i32, %c0_i32_0, %c0_i32_1 : i32, i32, i32
  }
  func.func @transform_5(%arg0: i32) -> (i32, i32, i32) {
    %c0_i32 = arith.constant 0 : i32
    %c0_i32_0 = arith.constant 0 : i32
    %c0_i32_1 = arith.constant 0 : i32
    %c0_i32_2 = arith.constant 0 : i32
    return %c0_i32, %c0_i32_0, %c0_i32_1 : i32, i32, i32
  }
  func.func @transform_6(%arg0: i32) -> (i32, i32) {
    %c0_i32 = arith.constant 0 : i32
    %c0_i32_0 = arith.constant 0 : i32
    %c0_i32_1 = arith.constant 0 : i32
    return %c0_i32, %c0_i32_0 : i32, i32
  }
  func.func @transform_7(%arg0: i32) -> (i32, i32) {
    %c0_i32 = arith.constant 0 : i32
    %c0_i32_0 = arith.constant 0 : i32
    %c0_i32_1 = arith.constant 0 : i32
    return %c0_i32, %c0_i32_0 : i32, i32
  }
  func.func @transform_8(%arg0: i32) -> (i32, i32) {
    %c0_i32 = arith.constant 0 : i32
    %c0_i32_0 = arith.constant 0 : i32
    %c0_i32_1 = arith.constant 0 : i32
    return %c0_i32, %c0_i32_0 : i32, i32
  }
  func.func @transform_9(%arg0: i32) -> (i32, i32) {
    %c0_i32 = arith.constant 0 : i32
    %c0_i32_0 = arith.constant 0 : i32
    %c0_i32_1 = arith.constant 0 : i32
    return %c0_i32, %c0_i32_0 : i32, i32
  }
  func.func @transform_10(%arg0: i32) -> (i32, i32) {
    %c0_i32 = arith.constant 0 : i32
    %c0_i32_0 = arith.constant 0 : i32
    %c0_i32_1 = arith.constant 0 : i32
    return %c0_i32, %c0_i32_0 : i32, i32
  }
  func.func @transform_11(%arg0: i32) -> (i32, i32) {
    %c0_i32 = arith.constant 0 : i32
    %c0_i32_0 = arith.constant 0 : i32
    %c0_i32_1 = arith.constant 0 : i32
    return %c0_i32, %c0_i32_0 : i32, i32
  }
  func.func @transform_12(%arg0: i32) -> (i32, i32) {
    %c0_i32 = arith.constant 0 : i32
    %c0_i32_0 = arith.constant 0 : i32
    %c0_i32_1 = arith.constant 0 : i32
    return %c0_i32, %c0_i32_0 : i32, i32
  }
  func.func @transform_13(%arg0: i32) -> (i32, i32) {
    %c0_i32 = arith.constant 0 : i32
    %c0_i32_0 = arith.constant 0 : i32
    %c0_i32_1 = arith.constant 0 : i32
    return %c0_i32, %c0_i32_0 : i32, i32
  }
  func.func @transform_14(%arg0: i32) -> (i32, i32) {
    %c0_i32 = arith.constant 0 : i32
    %c0_i32_0 = arith.constant 0 : i32
    %c0_i32_1 = arith.constant 0 : i32
    return %c0_i32, %c0_i32_0 : i32, i32
  }
  func.func @transform_15(%arg0: i32) -> (i32, i32) {
    %c0_i32 = arith.constant 0 : i32
    %c0_i32_0 = arith.constant 0 : i32
    return %arg0, %c0_i32 : i32, i32
  }
}

</mosaic_0001>

<bundles_post_ra>
// kernel: net_deep_forward.1
= control target key start
LH: loop header
LB: loop body
LE: loop exit
PB: predicated region body
PF: predicated region fallthrough
CT: control target
= control target key end

     0   :  { %vm430_vm0 = vcmask 785408   ;;  %v82_v18 = vlaneseq  ;;  %s15012_s1 = inlined_call_operand.vmem [shape: f32[3,96,128], index: 1, kind: input, shape index: {}]   ;;  %s15013_s0 = inlined_call_operand.vmem [shape: f32[256,96], index: 0, kind: input, shape index: {}]   ;;  %s15014_s2 = inlined_call_operand.vmem [shape: f32[3,128,128], index: 2, kind: input, shape index: {}]   ;;  %s15015_s14 = inlined_call_operand.vmem [shape: f32[17,128], index: 14, kind: input, shape index: {}]   ;;  %s15016_s3 = inlined_call_operand.vmem [shape: f32[3,128,128], index: 3, kind: input, shape index: {}]   ;;  %s15017_s6 = inlined_call_operand.vmem [shape: f32[128,256], index: 6, kind: input, shape index: {}]   ;;  %s15018_s7 = inlined_call_operand.vmem [shape: f32[128,64], index: 7, kind: input, shape index: {}]   ;;  %s15019_s4 = inlined_call_operand.vmem [shape: f32[3,64,128], index: 4, kind: input, shape index: {}]   ;;  %s15020_s5 = inlined_call_operand.vmem [shape: f32[3,128,128], index: 5, kind: input, shape index: {}]   ;;  %s15021_s8 = inlined_call_operand.vmem [shape: f32[64,128], index: 8, kind: input, shape index: {}]   ;;  %s15022_s9 = inlined_call_operand.vmem [shape: f32[128,64], index: 9, kind: input, shape index: {}]   ;;  %s15023_s10 = inlined_call_operand.vmem [shape: f32[512,128], index: 10, kind: input, shape index: {}]   ;;  %s15024_s11 = inlined_call_operand.vmem [shape: f32[128,32], index: 11, kind: input, shape index: {}]   ;;  %s15025_s12 = inlined_call_operand.vmem [shape: f32[32,16], index: 12, kind: input, shape index: {}]   ;;  %s15026_s13 = inlined_call_operand.vmem [shape: f32[16,128], index: 13, kind: input, shape index: {}]   ;;  %s15027_s15 = inlined_call_operand.vmem [shape: f32[8,128], index: 15, kind: output, shape index: {}]  }
   0x1   :  { %v6908_v0 = vld [vmem:[%s15012_s1 + $0x60] sm:$0xff]  ;;  %v6909_v1 = vld [vmem:[%s15012_s1 + $0x68] sm:$0xff]  ;;  %v6910_v2 = vld [vmem:[%s15012_s1 + $0x70] sm:$0xff] }
   0x2   :  { %v9489_v3 = vpack.c.bf16 %v6909_v1, %v6908_v0  ;;  %v6911_v4 = vld [vmem:[%s15012_s1 + $0x78] sm:$0xff]  ;;  %v6912_v6 = vld [vmem:[%s15012_s1 + $0x80] sm:$0xff]  ;;  %v6913_v7 = vld [vmem:[%s15012_s1 + $0x88] sm:$0xff]  ;;  %v10575_v22 = vshrl.u32 %v82_v18, 7 }
   0x3   :  { %v9493_v5 = vpack.c.bf16 %v6911_v4, %v6910_v2  ;;  %v10547_v8 = vld [vmem:[%s15013_s0] sm:$0xff]  ;;  %v9497_v9 = vpack.c.bf16 %v6913_v7, %v6912_v6  ;;  %v6914_v10 = vld [vmem:[%s15012_s1 + $0x90] sm:$0xff]  ;;  %v6915_v11 = vld [vmem:[%s15012_s1 + $0x98] sm:$0xff] }
   0x4   :  { %9490 = vmatprep.subr.bf16.mxu0 %v9489_v3  ;;  %8180 = vmatprep.mubr.msk.f32.mxu0 %vm430_vm0, %v10547_v8  ;;  %v9501_v12 = vpack.c.bf16 %v6915_v11, %v6914_v10  ;;  %v6916_v13 = vld [vmem:[%s15012_s1 + $0xa0] sm:$0xff]  ;;  %v6917_v14 = vld [vmem:[%s15012_s1 + $0xa8] sm:$0xff]  ;;  %v6918_v16 = vld [vmem:[%s15012_s1 + $0xb0] sm:$0xff]  ;;  %v15029_v23 = vrot.slane %v10547_v8, 7  ;;  %vm15036_vm1 = vcmp.lt.s32.totalorder %v10575_v22, 1  ;;  %v15030_v45 = vrot.slane %v10547_v8, 1 }
   0x5   :  { %9492 = vmatpush3.bf16.msra.mxu0 %v9489_v3  ;;  %v9505_v15 = vpack.c.bf16 %v6917_v14, %v6916_v13  ;;  %v6919_v17 = vld [vmem:[%s15012_s1 + $0xb8] sm:$0xff]  ;;  %v405_v20 = vld [vmem:[%s15012_s1] sm:$0xff]  ;;  %v406_v21 = vld [vmem:[%s15012_s1 + $0x8] sm:$0xff]  ;;  %vm15035_vm2 = vcmp.lt.s32.totalorder %v10575_v22, 7 }
   0x6   :  { %9494 = vmatprep.subr.bf16.mxu0 %v9493_v5  ;;  %v9509_v19 = vpack.c.bf16 %v6919_v17, %v6918_v16  ;;  %v9513_v24 = vpack.c.bf16 %v406_v21, %v405_v20  ;;  %v407_v25 = vld [vmem:[%s15012_s1 + $0x10] sm:$0xff]  ;;  %v408_v26 = vld [vmem:[%s15012_s1 + $0x18] sm:$0xff]  ;;  %v10594_v29 = vld [vmem:[%s15013_s0 + $0x8] sm:$0xff] }
   0x7   :  { %v10587_v27 = vld [vmem:[%s15013_s0 + $0xf8] sm:$0xff]  ;;  %v10599_v30 = vld [vmem:[%s15013_s0 + $0x10] sm:$0xff]  ;;  %v9517_v31 = vpack.c.bf16 %v408_v26, %v407_v25  ;;  %v409_v33 = vld [vmem:[%s15012_s1 + $0x20] sm:$0xff]  ;;  %v309_v46 = vrot.slane %v10594_v29, 1 }
   0x8   :  { %v210_v28 = vrot.slane %v10587_v27, 7  ;;  %v410_v34 = vld [vmem:[%s15012_s1 + $0x28] sm:$0xff]  ;;  %v10620_v35 = vld [vmem:[%s15013_s0 + $0x18] sm:$0xff]  ;;  %v10625_v36 = vld [vmem:[%s15013_s0 + $0x20] sm:$0xff]  ;;  %v310_v47 = vrot.slane %v10599_v30, 1 }
   0x9   :  { %9496 = vmatpush3.bf16.msra.mxu0 %v9493_v5  ;;  %v9521_v37 = vpack.c.bf16 %v410_v34, %v409_v33  ;;  %v411_v38 = vld [vmem:[%s15012_s1 + $0x30] sm:$0xff]  ;;  %v412_v39 = vld [vmem:[%s15012_s1 + $0x38] sm:$0xff]  ;;  %v10640_v40 = vld [vmem:[%s15013_s0 + $0x28] sm:$0xff]  ;;  %v311_v50 = vrot.slane %v10620_v35, 1  ;;  %v312_v51 = vrot.slane %v10625_v36, 1  ;;  %v10716_v3 = vsel %vm15035_vm2, %v15030_v45, %v309_v46 }
   0xa   :  { %9498 = vmatprep.subr.bf16.mxu0 %v9497_v9  ;;  %v10605_v32 = vsel %vm15036_vm1, %v210_v28, %v15029_v23  ;;  %v10645_v41 = vld [vmem:[%s15013_s0 + $0xf0] sm:$0xff]  ;;  %v9525_v43 = vpack.c.bf16 %v412_v39, %v411_v38  ;;  %v413_v48 = vld [vmem:[%s15012_s1 + $0x40] sm:$0xff]  ;;  %v414_v49 = vld [vmem:[%s15012_s1 + $0x48] sm:$0xff]  ;;  %v313_v52 = vrot.slane %v10640_v40, 1  ;;  %v10720_v4 = vsel %vm15035_vm2, %v309_v46, %v310_v47 }
   0xb   :  { %v10650_v42 = vld [vmem:[%s15013_s0 + $0x30] sm:$0xff]  ;;  %v15028_v44 = vrot.slane %v10645_v41, 7  ;;  %v10670_v53 = vld [vmem:[%s15013_s0 + $0x38] sm:$0xff]  ;;  %v10680_v56 = vld [vmem:[%s15013_s0 + $0x40] sm:$0xff]  ;;  %v9529_v61 = vpack.c.bf16 %v414_v49, %v413_v48  ;;  %v10732_v7 = vsel %vm15035_vm2, %v310_v47, %v311_v50 }
   0xc   :  { %v314_v54 = vrot.slane %v10650_v42, 1  ;;  %v315_v55 = vrot.slane %v10670_v53, 1  ;;  %v10685_v57 = vld [vmem:[%s15013_s0 + $0x48] sm:$0xff]  ;;  %v316_v58 = vrot.slane %v10680_v56, 1  ;;  %v10692_v60 = vld [vmem:[%s15013_s0 + $0x50] sm:$0xff]  ;;  %v10704_v0 = vld [vmem:[%s15013_s0 + $0x58] sm:$0xff]  ;;  %v10740_v10 = vsel %vm15035_vm2, %v312_v51, %v313_v52 }
   0xd   :  { %9500 = vmatpush3.bf16.msra.mxu0 %v9497_v9  ;;  %v317_v59 = vrot.slane %v10685_v57, 1  ;;  %v10698_v62 = vsel %vm15036_vm1, %v15028_v44, %v210_v28  ;;  %v318_v63 = vrot.slane %v10692_v60, 1  ;;  %v415_v1 = vld [vmem:[%s15012_s1 + $0x50] sm:$0xff]  ;;  %v416_v2 = vld [vmem:[%s15012_s1 + $0x58] sm:$0xff]  ;;  %v319_v5 = vrot.slane %v10704_v0, 1  ;;  %v10728_v6 = vld [vmem:[%s15013_s0 + $0x60] sm:$0xff] }
   0xe   :  { %9502 = vmatprep.subr.bf16.mxu0 %v9501_v12  ;;  %v10736_v9 = vsel %vm15035_vm2, %v311_v50, %v312_v51  ;;  %v320_v11 = vrot.slane %v10728_v6, 1  ;;  %v10751_v13 = vsel %vm15035_vm2, %v314_v54, %v315_v55  ;;  %v9533_v14 = vpack.c.bf16 %v416_v2, %v415_v1  ;;  %v10764_v17 = vld [vmem:[%s15013_s0 + $0x68] sm:$0xff]  ;;  %v6984_v18 = vld [vmem:[%s15012_s1 + $0xc0] sm:$0xff]  ;;  %v10800_v33 = vld [vmem:[%s15013_s0 + $0x78] sm:$0xff] }
   0xf   :  { %v10759_v16 = vsel %vm15035_vm2, %v316_v58, %v317_v59  ;;  %v10774_v20 = vsel %vm15035_vm2, %v317_v59, %v318_v63  ;;  %v321_v21 = vrot.slane %v10764_v17, 1  ;;  %v10786_v25 = vsel %vm15035_vm2, %v318_v63, %v319_v5  ;;  %v10825_v46 = vld [vmem:[%s15013_s0 + $0x88] sm:$0xff]  ;;  %v10833_v48 = vld [vmem:[%s15013_s0 + $0x90] sm:$0xff]  ;;  %v10945_v23 = vld [vmem:[%s15013_s0 + $0xd8] sm:$0xff] }
  0x10   :  { %v10793_v28 = vsel %vm15035_vm2, %v319_v5, %v320_v11  ;;  %v323_v34 = vrot.slane %v10800_v33, 1  ;;  %v325_v47 = vrot.slane %v10825_v46, 1  ;;  %v326_v50 = vrot.slane %v10833_v48, 1  ;;  %v10873_v63 = vld [vmem:[%s15013_s0 + $0xa8] sm:$0xff]  ;;  %v10881_v2 = vld [vmem:[%s15013_s0 + $0xb0] sm:$0xff]  ;;  %v10953_v45 = vld [vmem:[%s15013_s0 + $0xe0] sm:$0xff] }
  0x11   :  { %9504 = vmatpush3.bf16.msra.mxu0 %v9501_v12  ;;  %v10747_v12 = vsel %vm15035_vm2, %v313_v52, %v314_v54  ;;  %v10812_v38 = vsel %vm15035_vm2, %v320_v11, %v321_v21  ;;  %v10849_v52 = vld [vmem:[%s15013_s0 + $0x98] sm:$0xff]  ;;  %v329_v1 = vrot.slane %v10873_v63, 1  ;;  %v330_v11 = vrot.slane %v10881_v2, 1 }
  0x12   :  { %9506 = vmatprep.subr.bf16.mxu0 %v9505_v15  ;;  %v327_v54 = vrot.slane %v10849_v52, 1 }
  0x14   :  { %v10885_v5 = vsel %vm15035_vm2, %v326_v50, %v327_v54 }
  0x15   :  { %9508 = vmatpush3.bf16.msra.mxu0 %v9505_v15  ;;  %v10755_v15 = vsel %vm15035_vm2, %v315_v55, %v316_v58  ;;  %v10857_v55 = vld [vmem:[%s15013_s0 + $0xa0] sm:$0xff]  ;;  %15130 = vst [vmem:[#allocation4_spill] sm:$0xff] %v10885_v5 }
  0x16   :  { %9510 = vmatprep.subr.bf16.mxu0 %v9509_v19  ;;  %v328_v59 = vrot.slane %v10857_v55, 1 }
  0x19   :  { %9512 = vmatpush3.bf16.msra.mxu0 %v9509_v19  ;;  %v6985_v19 = vld [vmem:[%s15012_s1 + $0xc8] sm:$0xff] }
  0x1a   :  { %9514 = vmatprep.subr.bf16.mxu0 %v9513_v24 }
  0x1c   :  { %8181 = vmatmul.mubr.msk.f32.vlgmr.msra.gmra.mrb[0].mxu0 %vm430_vm0, %v10594_v29 }
  0x1d   :  { %8183 = vmatprep.mubr.msk.f32.mxu0 %vm430_vm0, %v10599_v30  ;;  %9516 = vmatpush3.bf16.msra.mxu0 %v9513_v24  ;;  %v10782_v24 = vld [vmem:[%s15013_s0 + $0x70] sm:$0xff] }
  0x1e   :  { %9518 = vmatprep.subr.bf16.mxu0 %v9517_v31  ;;  %v322_v26 = vrot.slane %v10782_v24, 1 }
  0x20   :  { %8184 = vmatmul.mubr.msk.f32.gmra.mrb[2].mxu0 %vm430_vm0, %v10620_v35  ;;  %v10837_v49 = vsel %vm15035_vm2, %v322_v26, %v323_v34 }
  0x21   :  { %8186 = vmatprep.mubr.msk.f32.mxu0 %vm430_vm0, %v10625_v36  ;;  %9520 = vmatpush3.bf16.msra.mxu0 %v9517_v31  ;;  %v10795_v31 = vpack.c.bf16 %v6985_v19, %v6984_v18  ;;  %v10897_v18 = vld [vmem:[%s15013_s0 + $0xb8] sm:$0xff] }
  0x22   :  { %9522 = vmatprep.subr.bf16.mxu0 %v9521_v37  ;;  %v331_v19 = vrot.slane %v10897_v18, 1 }
  0x24   :  { %8187 = vmatmul.mubr.msk.f32.gmra.mrb[4].mxu0 %vm430_vm0, %v10640_v40 }
  0x25   :  { %8189 = vmatprep.mubr.msk.f32.mxu0 %vm430_vm0, %v10650_v42  ;;  %9524 = vmatpush3.bf16.msra.mxu0 %v9521_v37  ;;  %v10808_v37 = vld [vmem:[%s15013_s0 + $0x80] sm:$0xff] }
  0x26   :  { %9526 = vmatprep.subr.bf16.mxu0 %v9525_v43  ;;  %v324_v39 = vrot.slane %v10808_v37, 1 }
  0x28   :  { %8190 = vmatmul.mubr.msk.f32.gmra.mrb[6].mxu0 %vm430_vm0, %v10670_v53  ;;  %v10844_v51 = vsel %vm15035_vm2, %v323_v34, %v324_v39  ;;  %v10861_v58 = vsel %vm15035_vm2, %v324_v39, %v325_v47  ;;  %v10916_v39 = vsel %vm15035_vm2, %v329_v1, %v330_v11 }
  0x29   :  { %8192 = vmatprep.mubr.msk.f32.mxu0 %vm430_vm0, %v10680_v56  ;;  %9528 = vmatpush3.bf16.msra.mxu0 %v9525_v43  ;;  %v10819_v43 = vsel %vm15035_vm2, %v321_v21, %v322_v26  ;;  %15128 = vst [vmem:[#allocation2_spill] sm:$0xff] %v10861_v58  ;;  %v10905_v21 = vld [vmem:[%s15013_s0 + $0xc0] sm:$0xff]  ;;  %v10909_v26 = vsel %vm15035_vm2, %v328_v59, %v329_v1  ;;  %15133 = vst [vmem:[#allocation7_spill] sm:$0xff] %v10916_v39  ;;  %v10969_v39 = vld [vmem:[%s15013_s0 + $0xe8] sm:$0xff] }
  0x2a   :  { %9530 = vmatprep.subr.bf16.mxu0 %v9529_v61  ;;  %15132 = vst [vmem:[#allocation6_spill] sm:$0xff] %v10909_v26  ;;  %v332_v34 = vrot.slane %v10905_v21, 1  ;;  %v115_v26 = vand.u32 31, %v10575_v22 }
  0x2c   :  { %8193 = vmatmul.mubr.msk.f32.gmra.mrb[8].mxu0 %vm430_vm0, %v10685_v57  ;;  %v10940_v44 = vsel %vm15035_vm2, %v331_v19, %v332_v34  ;;  %vm10999_vm3 = vcmp.eq.s32.totalorder %v115_v26, 0  ;;  %v15147_v26 = vrot.slane %v10547_v8, 1 }
  0x2d   :  { %8195 = vmatprep.mubr.msk.f32.mxu0 %vm430_vm0, %v10692_v60  ;;  %9532 = vmatpush3.bf16.msra.mxu0 %v9529_v61  ;;  %v10868_v61 = vsel %vm15035_vm2, %v325_v47, %v326_v50  ;;  %v10921_v47 = vld [vmem:[%s15013_s0 + $0xc8] sm:$0xff]  ;;  %15135 = vst [vmem:[#allocation9_spill] sm:$0xff] %v10940_v44  ;;  %v244_v5 = vsel %vm10999_vm3, 0.0, %v10605_v32  ;;  %v15149_v32 = vrot.slane %v10547_v8, 7  ;;  %v7032_v8 = vld [vmem:[%s15014_s2 + $0x90] sm:$0xff] }
  0x2e   :  { %9534 = vmatprep.subr.bf16.mxu0 %v9533_v14  ;;  %15129 = vst [vmem:[#allocation3_spill] sm:$0xff] %v10868_v61  ;;  %v333_v50 = vrot.slane %v10921_v47, 1  ;;  %v6987_v61 = vld [vmem:[%s15012_s1 + $0xd8] sm:$0xff] }
  0x30   :  { %8196 = vmatmul.mubr.msk.f32.gmra.mrb[10].mxu0 %vm430_vm0, %v10704_v0 }
  0x31   :  { %8198 = vmatprep.mubr.msk.f32.mxu0 %vm430_vm0, %v10728_v6  ;;  %9536 = vmatpush3.bf16.msra.mxu0 %v9533_v14  ;;  %v10892_v14 = vsel %vm15035_vm2, %v327_v54, %v328_v59  ;;  %v10929_v54 = vld [vmem:[%s15013_s0 + $0xd0] sm:$0xff]  ;;  %v10933_v59 = vsel %vm15035_vm2, %v330_v11, %v331_v19  ;;  %v335_v11 = vrot.slane %v10945_v23, 1  ;;  %v336_v19 = vrot.slane %v10953_v45, 1 }
  0x32   :  { %9538 = vmatprep.subr.bf16.mxu0 %v10795_v31  ;;  %15131 = vst [vmem:[#allocation5_spill] sm:$0xff] %v10892_v14  ;;  %15134 = vst [vmem:[#allocation8_spill] sm:$0xff] %v10933_v59  ;;  %v334_v1 = vrot.slane %v10929_v54, 1  ;;  %v10957_v59 = vsel %vm15035_vm2, %v332_v34, %v333_v50  ;;  %v337_v34 = vrot.slane %v10969_v39, 1  ;;  %v339_v14 = vrot.slane %v10587_v27, 1 }
  0x33   :  { %15136 = vst [vmem:[#allocation10_spill] sm:$0xff] %v10957_v59 }
  0x34   :  { %8199 = vmatmul.mubr.msk.f32.gmra.mrb[12].mxu0 %vm430_vm0, %v10764_v17  ;;  %v10964_v44 = vsel %vm15035_vm2, %v333_v50, %v334_v1  ;;  %v10976_v59 = vsel %vm15035_vm2, %v334_v1, %v335_v11  ;;  %v338_v50 = vrot.slane %v10645_v41, 1  ;;  %v10991_v1 = vsel %vm15035_vm2, %v336_v19, %v337_v34 }
  0x35   :  { %8201 = vmatprep.mubr.msk.f32.mxu0 %vm430_vm0, %v10782_v24  ;;  %15137 = vst [vmem:[#allocation11_spill] sm:$0xff] %v10964_v44  ;;  %15138 = vst [vmem:[#allocation12_spill] sm:$0xff] %v10976_v59  ;;  %v10983_v44 = vsel %vm15035_vm2, %v335_v11, %v336_v19  ;;  %v15142_v11 = vmov 0 }
  0x36   :  { %15139 = vst [vmem:[#allocation13_spill] sm:$0xff] %v10983_v44  ;;  %15140 = vst [vmem:[#allocation14_spill] sm:$0xff] %v10991_v1  ;;  %v10997_v59 = vsel %vm15035_vm2, %v337_v34, %v338_v50  ;;  %v15143_v11 = vsel %vm10999_vm3, 4294967295, %v15142_v11  ;;  %v11004_v44 = vadd.s32 32, %v10575_v22  ;;  %v11010_v19 = vsel %vm15035_vm2, %v338_v50, %v339_v14 }
  0x37   :  { %15141 = vst [vmem:[#allocation15_spill] sm:$0xff] %v10997_v59  ;;  %15144 = vst [vmem:[#allocation16_spill] sm:$0xff] %v15143_v11  ;;  %v180_v1 = vrot.slane %v10594_v29, 7  ;;  %v11019_v34 = vsel %vm15035_vm2, %v339_v14, %v15147_v26  ;;  %v181_v59 = vrot.slane %v10599_v30, 7  ;;  %v183_v50 = vrot.slane %v10625_v36, 7  ;;  %v6986_v29 = vld [vmem:[%s15012_s1 + $0xd0] sm:$0xff] }
  0x38   :  { %8202 = vmatmul.mubr.msk.f32.gmra.mrb[14].mxu0 %vm430_vm0, %v10800_v33  ;;  %15145 = vst [vmem:[#allocation17_spill] sm:$0xff] %v11004_v44  ;;  %15146 = vst [vmem:[#allocation18_spill] sm:$0xff] %v11010_v19  ;;  %v119_v19 = vand.u32 31, %v11004_v44  ;;  %v182_v30 = vrot.slane %v10620_v35, 7  ;;  %v7030_v14 = vld [vmem:[%s15014_s2 + $0x80] sm:$0xff]  ;;  %v7031_v26 = vld [vmem:[%s15014_s2 + $0x88] sm:$0xff]  ;;  %v9541_v44 = vpack.c.bf16 %v6987_v61, %v6986_v29 }
  0x39   :  { %8204 = vmatprep.mubr.msk.f32.mxu0 %vm430_vm0, %v10808_v37  ;;  %15148 = vst [vmem:[#allocation19_spill] sm:$0xff] %v11019_v34  ;;  %v242_v36 = vsel %vm15036_vm1, %v15149_v32, %v180_v1  ;;  %v11049_v35 = vpack.c.bf16 %v7031_v26, %v7030_v14  ;;  %v6988_v61 = vld [vmem:[%s15012_s1 + $0xe0] sm:$0xff]  ;;  %v6989_v29 = vld [vmem:[%s15012_s1 + $0xe8] sm:$0xff]  ;;  %v185_v34 = vrot.slane %v10650_v42, 7  ;;  %v6990_v42 = vld [vmem:[%s15012_s1 + $0xf0] sm:$0xff] }
  0x3a   :  { %vm11057_vm4 = vcmp.eq.s32.totalorder %v119_v19, 0  ;;  %v239_v11 = vsel %vm15036_vm1, %v182_v30, %v183_v50  ;;  %v184_v19 = vrot.slane %v10640_v40, 7  ;;  %v240_v14 = vsel %vm15036_vm1, %v181_v59, %v182_v30  ;;  %v7034_v40 = vld [vmem:[%s15014_s2 + $0xa0] sm:$0xff] }
  0x3b   :  { %10154 = vmatprep.subr.bf16.mxu1 %v11049_v35  ;;  %v248_v58 = vsel %vm11057_vm4, 0.0, %v239_v11  ;;  %v6991_v11 = vld [vmem:[%s15012_s1 + $0xf8] sm:$0xff]  ;;  %v186_v30 = vrot.slane %v10670_v53, 7 }
  0x3c   :  { %8205 = vmatmul.mubr.msk.f32.gmra.mrb[16].mxu0 %vm430_vm0, %v10825_v46  ;;  %10162 = vmatpush3.bf16.msra.mxu1 %v11049_v35  ;;  %v7037_v53 = vld [vmem:[%s15014_s2 + $0xb8] sm:$0xff] }
  0x3d   :  { %8207 = vmatprep.mubr.msk.f32.mxu0 %vm430_vm0, %v10833_v48 }
  0x40   :  { %8208 = vmatmul.mubr.msk.f32.gmra.mrb[18].mxu0 %vm430_vm0, %v10849_v52 }
  0x41   :  { %8210 = vmatprep.mubr.msk.f32.mxu0 %vm430_vm0, %v10857_v55 }
  0x44   :  { %8211 = vmatmul.mubr.msk.f32.gmra.mrb[20].mxu0 %vm430_vm0, %v10873_v63 }
  0x45   :  { %8213 = vmatprep.mubr.msk.f32.mxu0 %vm430_vm0, %v10881_v2 }
  0x48   :  { %8214 = vmatmul.mubr.msk.f32.gmra.mrb[22].mxu0 %vm430_vm0, %v10897_v18 }
  0x49   :  { %8216 = vmatprep.mubr.msk.f32.mxu0 %vm430_vm0, %v10905_v21 }
  0x4c   :  { %8217 = vmatmul.mubr.msk.f32.gmra.mrb[24].mxu0 %vm430_vm0, %v10921_v47 }
  0x4d   :  { %8219 = vmatprep.mubr.msk.f32.mxu0 %vm430_vm0, %v10929_v54 }
  0x50   :  { %8220 = vmatmul.mubr.msk.f32.gmra.mrb[26].mxu0 %vm430_vm0, %v10945_v23 }
  0x51   :  { %8222 = vmatprep.mubr.msk.f32.mxu0 %vm430_vm0, %v10953_v45 }
  0x54   :  { %8223 = vmatmul.mubr.msk.f32.gmra.mrb[28].mxu0 %vm430_vm0, %v10969_v39 }
  0x55   :  { %8225 = vmatprep.mubr.msk.f32.mxu0 %vm430_vm0, %v10645_v41 }
  0x58   :  { %8226 = vmatmul.mubr.msk.f32.gmra.mrb[30].mxu0 %vm430_vm0, %v10587_v27  ;;  %v241_v27 = vsel %vm15036_vm1, %v180_v1, %v181_v59  ;;  %v11064_v1 = vadd.s32 64, %v10575_v22 }
  0x59   :  { %8252 = vmatprep.mubr.msk.f32.mxu0 %vm430_vm0, %v244_v5  ;;  %v7033_v5 = vld [vmem:[%s15014_s2 + $0x98] sm:$0xff] }
  0x5a   :  { %15152 = vst [vmem:[#allocation20_spill] sm:$0xff] %v11064_v1  ;;  %v11079_v26 = vpack.c.bf16 %v7033_v5, %v7032_v8  ;;  %v123_v59 = vand.u32 31, %v11064_v1  ;;  %v237_v5 = vsel %vm15036_vm1, %v184_v19, %v185_v34 }
  0x5c   :  { %8253 = vmatmul.mubr.msk.f32.vlgmr.msra.gmra.mrb[0].mxu0 %vm430_vm0, %v242_v36  ;;  %v9545_v36 = vpack.c.bf16 %v6989_v29, %v6988_v61  ;;  %10155 = vmatprep.subr.bf16.mxu1 %v11079_v26  ;;  %v9549_v61 = vpack.c.bf16 %v6991_v11, %v6990_v42  ;;  %v7036_v29 = vld [vmem:[%s15014_s2 + $0xb0] sm:$0xff]  ;;  %vm11116_vm5 = vcmp.eq.s32.totalorder %v123_v59, 0  ;;  %v189_v42 = vrot.slane %v10692_v60, 7 }
  0x5d   :  { %8255 = vmatprep.mubr.msk.f32.mxu0 %vm430_vm0, %v241_v27  ;;  %9540 = vmatpush3.bf16.msra.mxu0 %v10795_v31  ;;  %v7035_v27 = vld [vmem:[%s15014_s2 + $0xa8] sm:$0xff]  ;;  %v187_v31 = vrot.slane %v10680_v56, 7  ;;  %v238_v56 = vsel %vm15036_vm1, %v183_v50, %v184_v19  ;;  %v11123_v50 = vadd.s32 96, %v10575_v22  ;;  %v6992_v19 = vld [vmem:[%s15012_s1 + $0x100] sm:$0xff]  ;;  %v11137_v59 = vpack.c.bf16 %v7037_v53, %v7036_v29  ;;  %v6994_v60 = vld [vmem:[%s15012_s1 + $0x110] sm:$0xff] }
  0x5e   :  { %9542 = vmatprep.subr.bf16.mxu0 %v9541_v44  ;;  %v11105_v8 = vpack.c.bf16 %v7035_v27, %v7034_v40  ;;  %10163 = vmatpush3.bf16.msra.mxu1 %v11079_v26  ;;  %v188_v40 = vrot.slane %v10685_v57, 7  ;;  %v236_v27 = vsel %vm15036_vm1, %v185_v34, %v186_v30  ;;  %v7039_v57 = vld [vmem:[%s15014_s2 + $0xc8] sm:$0xff]  ;;  %v191_v34 = vrot.slane %v10728_v6, 7 }
  0x5f   :  { %15155 = vst [vmem:[#allocation21_spill] sm:$0xff] %v11123_v50 }
  0x60   :  { %8256 = vmatmul.mubr.msk.f32.gmra.mrb[2].mxu0 %vm430_vm0, %v240_v14  ;;  %v6993_v14 = vld [vmem:[%s15012_s1 + $0x108] sm:$0xff]  ;;  %10156 = vmatprep.subr.bf16.mxu1 %v11105_v8  ;;  %v234_v6 = vsel %vm15036_vm1, %v187_v31, %v188_v40  ;;  %v233_v53 = vsel %vm15036_vm1, %v188_v40, %v189_v42  ;;  %v192_v40 = vrot.slane %v10764_v17, 7  ;;  %v194_v17 = vrot.slane %v10800_v33, 7 }
  0x61   :  { %8258 = vmatprep.mubr.msk.f32.mxu0 %vm430_vm0, %v248_v58  ;;  %9544 = vmatpush3.bf16.msra.mxu0 %v9541_v44  ;;  %v235_v44 = vsel %vm15036_vm1, %v186_v30, %v187_v31  ;;  %v9553_v1 = vpack.c.bf16 %v6993_v14, %v6992_v19  ;;  %v6995_v30 = vld [vmem:[%s15012_s1 + $0x118] sm:$0xff]  ;;  %v7040_v19 = vld [vmem:[%s15014_s2 + $0xd0] sm:$0xff]  ;;  %v15156_v31 = vmov 0  ;;  %v99_v14 = vadd.s32 128, %v10575_v22 }
  0x62   :  { %9546 = vmatprep.subr.bf16.mxu0 %v9545_v36  ;;  %v252_v11 = vsel %vm11116_vm5, 0.0, %v235_v44  ;;  %10164 = vmatpush3.bf16.msra.mxu1 %v11105_v8  ;;  %v9557_v44 = vpack.c.bf16 %v6995_v30, %v6994_v60 }
  0x63   :  { %10157 = vmatprep.subr.bf16.mxu1 %v11137_v59  ;;  %v131_v60 = vand.u32 31, %v99_v14 }
  0x64   :  { %8259 = vmatmul.mubr.msk.f32.gmra.mrb[4].mxu0 %vm430_vm0, %v238_v56  ;;  %v7038_v56 = vld [vmem:[%s15014_s2 + $0xc0] sm:$0xff] }
  0x65   :  { %8261 = vmatprep.mubr.msk.f32.mxu0 %vm430_vm0, %v237_v5  ;;  %9548 = vmatpush3.bf16.msra.mxu0 %v9545_v36  ;;  %v127_v36 = vand.u32 31, %v11123_v50  ;;  %v190_v5 = vrot.slane %v10704_v0, 7  ;;  %v11163_v29 = vpack.c.bf16 %v7039_v57, %v7038_v56  ;;  %v7041_v0 = vld [vmem:[%s15014_s2 + $0xd8] sm:$0xff]  ;;  %v193_v56 = vrot.slane %v10782_v24, 7 }
  0x66   :  { %9550 = vmatprep.subr.bf16.mxu0 %v9549_v61  ;;  %10165 = vmatpush3.bf16.msra.mxu1 %v11137_v59  ;;  %v230_v24 = vsel %vm15036_vm1, %v191_v34, %v192_v40  ;;  %vm11204_vm7 = vcmp.eq.s32.totalorder %v131_v60, 0 }
  0x67   :  { %vm11174_vm6 = vcmp.eq.s32.totalorder %v127_v36, 0  ;;  %10158 = vmatprep.subr.bf16.mxu1 %v11163_v29  ;;  %v195_v36 = vrot.slane %v10808_v37, 7  ;;  %v15159_v37 = vmov 0  ;;  %v228_v30 = vsel %vm15036_vm1, %v193_v56, %v194_v17 }
  0x68   :  { %8262 = vmatmul.mubr.msk.f32.gmra.mrb[6].mxu0 %vm430_vm0, %v236_v27  ;;  %v15157_v31 = vsel %vm11174_vm6, 4294967295, %v15156_v31  ;;  %v232_v27 = vsel %vm15036_vm1, %v189_v42, %v190_v5  ;;  %v15160_v37 = vsel %vm11204_vm7, 4294967295, %v15159_v37  ;;  %v103_v42 = vadd.s32 160, %v10575_v22 }
  0x69   :  { %8264 = vmatprep.mubr.msk.f32.mxu0 %vm430_vm0, %v252_v11  ;;  %9552 = vmatpush3.bf16.msra.mxu0 %v9549_v61  ;;  %15158 = vst [vmem:[#allocation22_spill] sm:$0xff] %v15157_v31  ;;  %v231_v61 = vsel %vm15036_vm1, %v190_v5, %v191_v34  ;;  %v11187_v11 = vpack.c.bf16 %v7041_v0, %v7040_v19  ;;  %15161 = vst [vmem:[#allocation23_spill] sm:$0xff] %v15160_v37  ;;  %v196_v34 = vrot.slane %v10825_v46, 7 }
  0x6a   :  { %9554 = vmatprep.subr.bf16.mxu0 %v9553_v1  ;;  %v256_v57 = vsel %vm11174_vm6, 0.0, %v231_v61  ;;  %10166 = vmatpush3.bf16.msra.mxu1 %v11163_v29  ;;  %v227_v33 = vsel %vm15036_vm1, %v194_v17, %v195_v36  ;;  %v197_v5 = vrot.slane %v10833_v48, 7  ;;  %v198_v19 = vrot.slane %v10849_v52, 7 }
  0x6b   :  { %10159 = vmatprep.subr.bf16.mxu1 %v11187_v11  ;;  %v226_v46 = vsel %vm15036_vm1, %v195_v36, %v196_v34  ;;  %v15162_v48 = vmov 0  ;;  %v107_v61 = vadd.s32 192, %v10575_v22  ;;  %v200_v52 = vrot.slane %v10873_v63, 7 }
  0x6c   :  { %8265 = vmatmul.mubr.msk.f32.gmra.mrb[8].mxu0 %vm430_vm0, %v234_v6  ;;  %v260_v6 = vsel %vm11204_vm7, 0.0, %v227_v33  ;;  %v225_v0 = vsel %vm15036_vm1, %v196_v34, %v197_v5  ;;  %v224_v14 = vsel %vm15036_vm1, %v197_v5, %v198_v19  ;;  %v202_v36 = vrot.slane %v10897_v18, 7 }
  0x6d   :  { %8267 = vmatprep.mubr.msk.f32.mxu0 %vm430_vm0, %v233_v53  ;;  %9556 = vmatpush3.bf16.msra.mxu0 %v9553_v1  ;;  %v229_v1 = vsel %vm15036_vm1, %v192_v40, %v193_v56  ;;  %v199_v53 = vrot.slane %v10857_v55, 7  ;;  %v201_v40 = vrot.slane %v10881_v2, 7  ;;  %v203_v56 = vrot.slane %v10905_v21, 7 }
  0x6e   :  { %9558 = vmatprep.subr.bf16.mxu0 %v9557_v44  ;;  %10167 = vmatpush3.bf16.msra.mxu1 %v11187_v11  ;;  %v15165_v2 = vmov 0  ;;  %v111_v17 = vadd.s32 224, %v10575_v22  ;;  %v204_v18 = vrot.slane %v10921_v47, 7 }
  0x6f   :  { %v223_v55 = vsel %vm15036_vm1, %v198_v19, %v199_v53  ;;  %v222_v63 = vsel %vm15036_vm1, %v199_v53, %v200_v52  ;;  %v221_v60 = vsel %vm15036_vm1, %v200_v52, %v201_v40  ;;  %v219_v21 = vsel %vm15036_vm1, %v202_v36, %v203_v56 }
  0x70   :  { %8268 = vmatmul.mubr.msk.f32.gmra.mrb[10].mxu0 %vm430_vm0, %v232_v27  ;;  %v143_v34 = vand.u32 31, %v111_v17  ;;  %v218_v47 = vsel %vm15036_vm1, %v203_v56, %v204_v18  ;;  %v15171_v19 = vrot.slane %v10645_v41, 7  ;;  %v15173_v41 = vmov 0  ;;  %v15207_v17 = vld [vmem:[#allocation12_spill] sm:$0xff] }
  0x71   :  { %8270 = vmatprep.mubr.msk.f32.mxu0 %vm430_vm0, %v256_v57  ;;  %9560 = vmatpush3.bf16.msra.mxu0 %v9557_v44  ;;  %v135_v44 = vand.u32 31, %v103_v42  ;;  %v139_v57 = vand.u32 31, %v107_v61  ;;  %v207_v42 = vrot.slane %v10953_v45, 7  ;;  %v15196_v61 = vmov 0 }
  0x72   :  { %9562 = vmatprep.subr.bf16.mxu0 %v11049_v35  ;;  %vm11273_vm10 = vcmp.eq.s32.totalorder %v143_v34, 0  ;;  %v110_v52 = vadd.s32 216, %v10575_v22  ;;  %v15213_v34 = vld [vmem:[#allocation15_spill] sm:$0xff] }
  0x73   :  { %vm11227_vm8 = vcmp.eq.s32.totalorder %v135_v44, 0  ;;  %vm11250_vm9 = vcmp.eq.s32.totalorder %v139_v57, 0 }
  0x74   :  { %8271 = vmatmul.mubr.msk.f32.gmra.mrb[12].mxu0 %vm430_vm0, %v230_v24  ;;  %v15163_v48 = vsel %vm11227_vm8, 4294967295, %v15162_v48  ;;  %v264_v27 = vsel %vm11227_vm8, 0.0, %v223_v55  ;;  %v15166_v2 = vsel %vm11250_vm9, 4294967295, %v15165_v2  ;;  %v220_v24 = vsel %vm15036_vm1, %v201_v40, %v202_v36  ;;  %v15200_v40 = vld [vmem:[#allocation8_spill] sm:$0xff]  ;;  %v15202_v36 = vld [vmem:[#allocation10_spill] sm:$0xff] }
  0x75   :  { %8273 = vmatprep.mubr.msk.f32.mxu0 %vm430_vm0, %v229_v1  ;;  %15164 = vst [vmem:[#allocation24_spill] sm:$0xff] %v15163_v48  ;;  %15167 = vst [vmem:[#allocation25_spill] sm:$0xff] %v15166_v2  ;;  %v205_v1 = vrot.slane %v10929_v54, 7  ;;  %v268_v33 = vsel %vm11250_vm9, 0.0, %v219_v21  ;;  %v15168_v54 = vmov 0  ;;  %v11309_v55 = vadd.s32 56, %v10575_v22 }
  0x76   :  { %v15169_v54 = vsel %vm11273_vm10, 4294967295, %v15168_v54  ;;  %v142_v57 = vand.u32 31, %v110_v52  ;;  %v15206_v21 = vld [vmem:[#allocation11_spill] sm:$0xff] }
  0x77   :  { %v217_v5 = vsel %vm15036_vm1, %v204_v18, %v205_v1  ;;  %15170 = vst [vmem:[#allocation26_spill] sm:$0xff] %v15169_v54  ;;  %15176 = vst [vmem:[#allocation29_spill] sm:$0xff] %v11309_v55  ;;  %v15208_v18 = vld [vmem:[#allocation13_spill] sm:$0xff] }
  0x78   :  { %8274 = vmatmul.mubr.msk.f32.gmra.mrb[14].mxu0 %vm430_vm0, %v228_v30  ;;  %v206_v30 = vrot.slane %v10945_v23, 7 }
  0x79   :  { %8276 = vmatprep.mubr.msk.f32.mxu0 %vm430_vm0, %v260_v6  ;;  %v208_v6 = vrot.slane %v10969_v39, 7 }
  0x7a   :  { %v215_v45 = vsel %vm15036_vm1, %v206_v30, %v207_v42  ;;  %v216_v23 = vsel %vm15036_vm1, %v205_v1, %v206_v30  ;;  %v15214_v30 = vld [vmem:[#allocation18_spill] sm:$0xff] }
  0x7b   :  { %v272_v53 = vsel %vm11273_vm10, 0.0, %v215_v45  ;;  %v214_v44 = vsel %vm15036_vm1, %v207_v42, %v208_v6  ;;  %v213_v39 = vsel %vm15036_vm1, %v208_v6, %v15171_v19  ;;  %vm11414_vm1 = vcmp.eq.s32.totalorder %v142_v57, 31  ;;  %v7042_v45 = vld [vmem:[%s15014_s2 + $0xe0] sm:$0xff]  ;;  %v7043_v6 = vld [vmem:[%s15014_s2 + $0xe8] sm:$0xff] }
  0x7c   :  { %8277 = vmatmul.mubr.msk.f32.gmra.mrb[16].mxu0 %vm430_vm0, %v226_v46  ;;  %v11295_v46 = vadd.s32 24, %v10575_v22  ;;  %v15210_v42 = vmov 0  ;;  %v1813_v57 = vld [vmem:[%s15014_s2 + $0x60] sm:$0xff] }
  0x7d   :  { %8279 = vmatprep.mubr.msk.f32.mxu0 %vm430_vm0, %v225_v0 }
  0x7e   :  { %15172 = vst [vmem:[#allocation27_spill] sm:$0xff] %v11295_v46  ;;  %v118_v0 = vand.u32 31, %v11295_v46 }
  0x80   :  { %8280 = vmatmul.mubr.msk.f32.gmra.mrb[18].mxu0 %vm430_vm0, %v224_v14  ;;  %vm11304_vm11 = vcmp.eq.s32.totalorder %v118_v0, 31  ;;  %v15199_v14 = vld [vmem:[#allocation7_spill] sm:$0xff] }
  0x81   :  { %8282 = vmatprep.mubr.msk.f32.mxu0 %vm430_vm0, %v264_v27  ;;  %v15174_v41 = vsel %vm11304_vm11, 4294967295, %v15173_v41  ;;  %v15201_v27 = vld [vmem:[#allocation9_spill] sm:$0xff]  ;;  %v1802_v0 = vld [vmem:[%s15014_s2 + $0x8] sm:$0xff] }
  0x82   :  { %15175 = vst [vmem:[#allocation28_spill] sm:$0xff] %v15174_v41 }
  0x84   :  { %8283 = vmatmul.mubr.msk.f32.gmra.mrb[20].mxu0 %vm430_vm0, %v222_v63  ;;  %v15203_v63 = vmov 0 }
  0x85   :  { %8285 = vmatprep.mubr.msk.f32.mxu0 %vm430_vm0, %v221_v60  ;;  %v15204_v63 = vsel %vm11414_vm1, 4294967295, %v15203_v63  ;;  %v114_v60 = vadd.s32 248, %v10575_v22 }
  0x87   :  { %v146_v1 = vand.u32 31, %v114_v60 }
  0x88   :  { %8286 = vmatmul.mubr.msk.f32.gmra.mrb[22].mxu0 %vm430_vm0, %v220_v24  ;;  %v400_v24 = vsel %vm11414_vm1, 0.0, %v15208_v18  ;;  %vm15216_vm1 = vcmp.lt.s32.totalorder %v10575_v22, 1 }
  0x89   :  { %8288 = vmatprep.mubr.msk.f32.mxu0 %vm430_vm0, %v268_v33  ;;  %v15209_v33 = vld [vmem:[#allocation14_spill] sm:$0xff] }
  0x8c   :  { %8289 = vmatmul.mubr.msk.f32.gmra.mrb[24].mxu0 %vm430_vm0, %v218_v47  ;;  %v15215_v47 = vld [vmem:[#allocation19_spill] sm:$0xff] }
  0x8d   :  { %8291 = vmatprep.mubr.msk.f32.mxu0 %vm430_vm0, %v217_v5 }
  0x90   :  { %8292 = vmatmul.mubr.msk.f32.gmra.mrb[26].mxu0 %vm430_vm0, %v216_v23  ;;  %v9585_v23 = vpack.c.bf16 %v7043_v6, %v7042_v45 }
  0x91   :  { %8294 = vmatprep.mubr.msk.f32.mxu0 %vm430_vm0, %v272_v53  ;;  %v7044_v53 = vld [vmem:[%s15014_s2 + $0xf0] sm:$0xff] }
  0x92   :  { %10160 = vmatprep.subr.bf16.mxu1 %v9585_v23 }
  0x93   :  { %10168 = vmatpush3.bf16.msra.mxu1 %v9585_v23 }
  0x94   :  { %8295 = vmatmul.mubr.msk.f32.gmra.mrb[28].mxu0 %vm430_vm0, %v214_v44  ;;  %v7045_v44 = vld [vmem:[%s15014_s2 + $0xf8] sm:$0xff] }
  0x95   :  { %8297 = vmatprep.mubr.msk.f32.mxu0 %vm430_vm0, %v213_v39  ;;  %v9589_v19 = vpack.c.bf16 %v7045_v44, %v7044_v53  ;;  %v1801_v39 = vld [vmem:[%s15014_s2] sm:$0xff]  ;;  %v1815_v44 = vld [vmem:[%s15014_s2 + $0x70] sm:$0xff] }
  0x97   :  { %10161 = vmatprep.subr.bf16.mxu1 %v9589_v19 }
  0x98   :  { %8298 = vmatmul.mubr.msk.f32.gmra.mrb[30].mxu0 %vm430_vm0, %v10698_v62  ;;  %v376_v62 = vsel %vm11304_vm11, 0.0, %v10736_v9  ;;  %10169 = vmatpush3.bf16.msra.mxu1 %v9589_v19 }
  0x99   :  { %8324 = vmatprep.mubr.msk.f32.mxu0 %vm430_vm0, %v10716_v3  ;;  %v122_v3 = vand.u32 31, %v11309_v55 }
  0x9b   :  { %vm11325_vm12 = vcmp.eq.s32.totalorder %v122_v3, 31  ;;  %v11465_v3 = vld [vmem:[%s15015_s14] ss:$0 sm:$0xff] }
  0x9c   :  { %8325 = vmatmul.mubr.msk.f32.vlgmr.msra.gmra.mrb[0].mxu0 %vm430_vm0, %v10720_v4  ;;  %v15177_v4 = vmov 0  ;;  %v380_v9 = vsel %vm11325_vm12, 0.0, %v10755_v15 }
  0x9d   :  { %8327 = vmatprep.mubr.msk.f32.mxu0 %vm430_vm0, %v10732_v7  ;;  %9564 = vmatpush3.bf16.msra.mxu0 %v11049_v35  ;;  %v15178_v4 = vsel %vm11325_vm12, 4294967295, %v15177_v4  ;;  %v11330_v7 = vadd.s32 88, %v10575_v22 }
  0x9e   :  { %9566 = vmatprep.subr.bf16.mxu0 %v11079_v26  ;;  %15179 = vst [vmem:[#allocation30_spill] sm:$0xff] %v15178_v4 }
  0x9f   :  { %15180 = vst [vmem:[#allocation31_spill] sm:$0xff] %v11330_v7 }
  0xa0   :  { %8328 = vmatmul.mubr.msk.f32.gmra.mrb[2].mxu0 %vm430_vm0, %v376_v62  ;;  %v11459_v62 = vpack.c.bf16 %v1802_v0, %v1801_v39 }
  0xa1   :  { %8330 = vmatprep.mubr.msk.f32.mxu0 %vm430_vm0, %v10740_v10  ;;  %9568 = vmatpush3.bf16.msra.mxu0 %v11079_v26  ;;  %v126_v10 = vand.u32 31, %v11330_v7  ;;  %v15189_v26 = vmov 0 }
  0xa2   :  { %9570 = vmatprep.subr.bf16.mxu0 %v11105_v8  ;;  %9594 = vmatprep.subr.bf16.mxu1 %v11459_v62 }
  0xa3   :  { %vm11347_vm13 = vcmp.eq.s32.totalorder %v126_v10, 31  ;;  %v11470_v10 = vld [vmem:[%s15015_s14 + $0x1] ss:$0 sm:$0xff] }
  0xa4   :  { %8331 = vmatmul.mubr.msk.f32.gmra.mrb[4].mxu0 %vm430_vm0, %v10747_v12  ;;  %v15181_v12 = vmov 0  ;;  %v384_v15 = vsel %vm11347_vm13, 0.0, %v10793_v28 }
  0xa5   :  { %8333 = vmatprep.mubr.msk.f32.mxu0 %vm430_vm0, %v10751_v13  ;;  %9572 = vmatpush3.bf16.msra.mxu0 %v11105_v8  ;;  %v15182_v12 = vsel %vm11347_vm13, 4294967295, %v15181_v12  ;;  %v11352_v13 = vadd.s32 120, %v10575_v22  ;;  %v106_v8 = vadd.s32 184, %v10575_v22 }
  0xa6   :  { %9574 = vmatprep.subr.bf16.mxu0 %v11137_v59  ;;  %15183 = vst [vmem:[#allocation32_spill] sm:$0xff] %v15182_v12 }
  0xa7   :  { %15184 = vst [vmem:[#allocation33_spill] sm:$0xff] %v11352_v13 }
  0xa8   :  { %8334 = vmatmul.mubr.msk.f32.gmra.mrb[6].mxu0 %vm430_vm0, %v380_v9 }
  0xa9   :  { %8336 = vmatprep.mubr.msk.f32.mxu0 %vm430_vm0, %v10759_v16  ;;  %9576 = vmatpush3.bf16.msra.mxu0 %v11137_v59  ;;  %v130_v16 = vand.u32 31, %v11352_v13  ;;  %v15194_v59 = vld [vmem:[#allocation5_spill] sm:$0xff] }
  0xaa   :  { %9578 = vmatprep.subr.bf16.mxu0 %v11163_v29 }
  0xab   :  { %vm11369_vm14 = vcmp.eq.s32.totalorder %v130_v16, 31 }
  0xac   :  { %8337 = vmatmul.mubr.msk.f32.gmra.mrb[8].mxu0 %vm430_vm0, %v10774_v20  ;;  %v15185_v20 = vmov 0  ;;  %v388_v28 = vsel %vm11369_vm14, 0.0, %v10844_v51 }
  0xad   :  { %8339 = vmatprep.mubr.msk.f32.mxu0 %vm430_vm0, %v10786_v25  ;;  %9580 = vmatpush3.bf16.msra.mxu0 %v11163_v29  ;;  %v15186_v20 = vsel %vm11369_vm14, 4294967295, %v15185_v20  ;;  %v102_v25 = vadd.s32 152, %v10575_v22  ;;  %v138_v29 = vand.u32 31, %v106_v8  ;;  %vm15221_vm14 = vcmp.lt.s32.totalorder %v10575_v22, 7 }
  0xae   :  { %9582 = vmatprep.subr.bf16.mxu0 %v11187_v11  ;;  %15187 = vst [vmem:[#allocation34_spill] sm:$0xff] %v15186_v20 }
  0xaf   :  { %v134_v35 = vand.u32 31, %v102_v25  ;;  %vm11399_vm2 = vcmp.eq.s32.totalorder %v138_v29, 31  ;;  %v1810_v29 = vld [vmem:[%s15014_s2 + $0x48] sm:$0xff] }
  0xb0   :  { %8340 = vmatmul.mubr.msk.f32.gmra.mrb[10].mxu0 %vm430_vm0, %v384_v15  ;;  %v15197_v61 = vsel %vm11399_vm2, 4294967295, %v15196_v61  ;;  %v396_v56 = vsel %vm11399_vm2, 0.0, %v15201_v27  ;;  %vm11429_vm2 = vcmp.eq.s32.totalorder %v146_v1, 31  ;;  %v1803_v15 = vld [vmem:[%s15014_s2 + $0x10] sm:$0xff] }
  0xb1   :  { %8342 = vmatprep.mubr.msk.f32.mxu0 %vm430_vm0, %v10812_v38  ;;  %9584 = vmatpush3.bf16.msra.mxu0 %v11187_v11  ;;  %v15188_v38 = vld [vmem:[#allocation2_spill] sm:$0xff]  ;;  %vm11384_vm15 = vcmp.eq.s32.totalorder %v134_v35, 31  ;;  %v15211_v42 = vsel %vm11429_vm2, 4294967295, %v15210_v42  ;;  %v404_v5 = vsel %vm11429_vm2, 0.0, %v15215_v47 }
  0xb2   :  { %v15190_v26 = vsel %vm11384_vm15, 4294967295, %v15189_v26  ;;  %v392_v51 = vsel %vm11384_vm15, 0.0, %v15194_v59  ;;  %v15195_v11 = vld [vmem:[#allocation6_spill] sm:$0xff]  ;;  %15212 = vst [vmem:[#allocation5_spill] sm:$0xff] %v15211_v42  ;;  %9586 = vmatprep.subr.bf16.mxu0 %v9585_v23  ;;  %vm15217_vm15 = vcmp.lt.s32.totalorder %v10575_v22, 7 }
  0xb3   :  { %15191 = vst [vmem:[#allocation2_spill] sm:$0xff] %v15190_v26  ;;  %v1805_v35 = vld [vmem:[%s15014_s2 + $0x20] sm:$0xff] }
  0xb4   :  { %8343 = vmatmul.mubr.msk.f32.gmra.mrb[12].mxu0 %vm430_vm0, %v10819_v43  ;;  %v15192_v43 = vld [vmem:[#allocation3_spill] sm:$0xff] }
  0xb5   :  { %8345 = vmatprep.mubr.msk.f32.mxu0 %vm430_vm0, %v10837_v49  ;;  %v15193_v49 = vld [vmem:[#allocation4_spill] sm:$0xff]  ;;  %15198 = vst [vmem:[#allocation3_spill] sm:$0xff] %v15197_v61  ;;  %9588 = vmatpush3.bf16.msra.mxu0 %v9585_v23 }
  0xb6   :  { %15205 = vst [vmem:[#allocation4_spill] sm:$0xff] %v15204_v63  ;;  %9590 = vmatprep.subr.bf16.mxu0 %v9589_v19 }
  0xb8   :  { %8346 = vmatmul.mubr.msk.f32.gmra.mrb[14].mxu0 %vm430_vm0, %v388_v28  ;;  %v1804_v28 = vld [vmem:[%s15014_s2 + $0x18] sm:$0xff] }
  0xb9   :  { %8348 = vmatprep.mubr.msk.f32.mxu0 %vm430_vm0, %v15188_v38  ;;  %9592 = vmatpush3.bf16.msra.mxu0 %v9589_v19  ;;  %v1806_v38 = vld [vmem:[%s15014_s2 + $0x28] sm:$0xff]  ;;  %v1816_v19 = vld [vmem:[%s15014_s2 + $0x78] sm:$0xff] }
  0xba   :  { %v11505_v27 = vpack.c.bf16 %v1806_v38, %v1805_v35 }
  0xbc   :  { %8349 = vmatmul.mubr.msk.f32.gmra.mrb[16].mxu0 %vm430_vm0, %v15192_v43  ;;  %v1807_v43 = vld [vmem:[%s15014_s2 + $0x30] sm:$0xff] }
  0xbd   :  { %8351 = vmatprep.mubr.msk.f32.mxu0 %vm430_vm0, %v15193_v49  ;;  %v1808_v49 = vld [vmem:[%s15014_s2 + $0x38] sm:$0xff] }
  0xbe   :  { %v11517_v18 = vpack.c.bf16 %v1808_v49, %v1807_v43  ;;  %v11548_v49 = vpack.c.bf16 %v1816_v19, %v1815_v44 }
  0xc0   :  { %8352 = vmatmul.mubr.msk.f32.gmra.mrb[18].mxu0 %vm430_vm0, %v392_v51  ;;  %v1809_v51 = vld [vmem:[%s15014_s2 + $0x40] sm:$0xff] }
  0xc1   :  { %8354 = vmatprep.mubr.msk.f32.mxu0 %vm430_vm0, %v15195_v11  ;;  %v1811_v11 = vld [vmem:[%s15014_s2 + $0x50] sm:$0xff] }
  0xc4   :  { %8355 = vmatmul.mubr.msk.f32.gmra.mrb[20].mxu0 %vm430_vm0, %v15199_v14 }
  0xc5   :  { %8357 = vmatprep.mubr.msk.f32.mxu0 %vm430_vm0, %v15200_v40  ;;  %v11503_v40 = vpack.c.bf16 %v1804_v28, %v1803_v15  ;;  %v7063_v28 = vld [vmem:[%s15014_s2 + $0x108] sm:$0xff] }
  0xc8   :  { %8358 = vmatmul.mubr.msk.f32.gmra.mrb[22].mxu0 %vm430_vm0, %v396_v56  ;;  %v1812_v56 = vld [vmem:[%s15014_s2 + $0x58] sm:$0xff] }
  0xc9   :  { %8360 = vmatprep.mubr.msk.f32.mxu0 %vm430_vm0, %v15202_v36  ;;  %v1814_v36 = vld [vmem:[%s15014_s2 + $0x68] sm:$0xff]  ;;  %v11523_v47 = vpack.c.bf16 %v1812_v56, %v1811_v11 }
  0xcc   :  { %8361 = vmatmul.mubr.msk.f32.gmra.mrb[24].mxu0 %vm430_vm0, %v15206_v21 }
  0xcd   :  { %8363 = vmatprep.mubr.msk.f32.mxu0 %vm430_vm0, %v15207_v17 }
  0xd0   :  { %8364 = vmatmul.mubr.msk.f32.gmra.mrb[26].mxu0 %vm430_vm0, %v400_v24 }
  0xd1   :  { %8366 = vmatprep.mubr.msk.f32.mxu0 %vm430_vm0, %v15209_v33  ;;  %v11520_v33 = vpack.c.bf16 %v1810_v29, %v1809_v51 }
  0xd4   :  { %8367 = vmatmul.mubr.msk.f32.gmra.mrb[28].mxu0 %vm430_vm0, %v15213_v34 }
  0xd5   :  { %8369 = vmatprep.mubr.msk.f32.mxu0 %vm430_vm0, %v15214_v30 }
  0xd8   :  { %8370 = vmatmul.mubr.msk.f32.gmra.mrb[30].mxu0 %vm430_vm0, %v404_v5  ;;  %v11525_v5 = vpack.c.bf16 %v1814_v36, %v1813_v57 }
 0x16f   :  { %v8326_v9 = vpop.f32.mrb[0].mxu0 }
 0x170   :  { %v1445_v16 = vmul.f32 %v8326_v9, %v11465_v3  ;;  %v1248_v25 = vpop.f32.mrb[1].mxu0 }
 0x171   :  { %v1444_v8 = vmul.f32 %v11465_v3, %v1248_v25  ;;  %v7062_v25 = vld [vmem:[%s15014_s2 + $0x100] sm:$0xff] }
 0x172   :  { %v1482_v59 = vadd.f32 %v11470_v10, %v1445_v16  ;;  %v11565_v56 = vpack.c.bf16 %v7063_v28, %v7062_v25 }
 0x173   :  { %v1481_v52 = vadd.f32 %v11470_v10, %v1444_v8  ;;  %v8329_v14 = vpop.f32.mrb[2].mxu0 }
 0x174   :  { %vm1514_vm0 = vcmp.gt.f32.partialorder %v1482_v59, 0.0  ;;  %v1546_v60 = vmul.f32 0.01, %v1482_v59  ;;  %v1447_v21 = vmul.f32 %v8329_v14, %v11465_v3  ;;  %v1258_v17 = vpop.f32.mrb[3].mxu0 }
 0x175   :  { %v1446_v24 = vmul.f32 %v11465_v3, %v1258_v17  ;;  %vm1513_vm2 = vcmp.gt.f32.partialorder %v1481_v52, 0.0  ;;  %v1545_v1 = vmul.f32 0.01, %v1481_v52 }
 0x176   :  { %v1484_v34 = vadd.f32 %v11470_v10, %v1447_v21  ;;  %v1578_v30 = vsel %vm1514_vm0, %v1482_v59, %v1546_v60 }
 0x177   :  { %v1483_v45 = vadd.f32 %v11470_v10, %v1446_v24  ;;  %v8332_v6 = vpop.f32.mrb[4].mxu0  ;;  %v11528_v23 = vsel %vm1513_vm2, %v1481_v52, %v1545_v1  ;;  %v1610_v53 = vrot.slane %v1578_v30, 7  ;;  %v1706_v39 = vrot.slane %v1578_v30, 1 }
 0x178   :  { %v1449_v0 = vmul.f32 %v8332_v6, %v11465_v3  ;;  %v1268_v9 = vpop.f32.mrb[5].mxu0  ;;  %v15048_v15 = vrot.slane %v11528_v23, 7  ;;  %v15047_v16 = vrot.slane %v11528_v23, 1  ;;  %8404 = vmatprep.mubr.f32.mxu0 %v11528_v23  ;;  %vm1516_vm2 = vcmp.gt.f32.partialorder %v1484_v34, 0.0 }
 0x179   :  { %v1448_v35 = vmul.f32 %v11465_v3, %v1268_v9  ;;  %8405 = vmatmul.mubr.f32.vlgmr.msra.gmra.mrb[32].mxu0 %v1578_v30  ;;  %vm1515_vm0 = vcmp.gt.f32.partialorder %v1483_v45, 0.0  ;;  %v1547_v38 = vmul.f32 0.01, %v1483_v45  ;;  %v1548_v8 = vmul.f32 0.01, %v1484_v34 }
 0x17a   :  { %v1486_v43 = vadd.f32 %v11470_v10, %v1449_v0  ;;  %v11554_v59 = vsel %vm15216_vm1, %v15048_v15, %v1610_v53  ;;  %v11560_v51 = vsel %vm15217_vm15, %v15047_v16, %v1706_v39 }
 0x17b   :  { %15218 = vst [vmem:[#allocation6_spill] sm:$0xff] %v11560_v51  ;;  %v1485_v29 = vadd.f32 %v11470_v10, %v1448_v35  ;;  %v8335_v11 = vpop.f32.mrb[6].mxu0  ;;  %v1579_v52 = vsel %vm1515_vm0, %v1483_v45, %v1547_v38  ;;  %v11563_v14 = vsel %vm1516_vm2, %v1484_v34, %v1548_v8  ;;  %v7064_v34 = vld [vmem:[%s15014_s2 + $0x110] sm:$0xff]  ;;  %v7065_v45 = vld [vmem:[%s15014_s2 + $0x118] sm:$0xff]  ;;  %vm15219_vm2 = vcmp.lt.s32.totalorder %v10575_v22, 1 }
 0x17c   :  { %v1451_v57 = vmul.f32 %v8335_v11, %v11465_v3  ;;  %v1278_v36 = vpop.f32.mrb[7].mxu0  ;;  %v1611_v60 = vrot.slane %v1579_v52, 7  ;;  %v1707_v21 = vrot.slane %v1579_v52, 1  ;;  %8407 = vmatprep.mubr.f32.mxu0 %v1579_v52  ;;  %v1612_v17 = vrot.slane %v11563_v14, 7  ;;  %vm15220_vm0 = vmmov %vm15219_vm2 }
 0x17d   :  { %v1450_v24 = vmul.f32 %v11465_v3, %v1278_v36  ;;  %v15049_v1 = vrot.slane %v11563_v14, 1  ;;  %8408 = vmatmul.mubr.f32.gmra.mrb[34].mxu0 %v11563_v14  ;;  %vm1517_vm1 = vcmp.gt.f32.partialorder %v1485_v29, 0.0  ;;  %v1549_v30 = vmul.f32 0.01, %v1485_v29 }
 0x17e   :  { %v1488_v6 = vadd.f32 %v11470_v10, %v1451_v57  ;;  %vm1518_vm15 = vcmp.gt.f32.partialorder %v1486_v43, 0.0  ;;  %v1550_v44 = vmul.f32 0.01, %v1486_v43  ;;  %v11581_v19 = vsel %vm15219_vm2, %v1610_v53, %v1611_v60  ;;  %vm15224_vm2 = vmmov %vm15220_vm0 }
 0x17f   :  { %v1487_v0 = vadd.f32 %v11470_v10, %v1450_v24  ;;  %v8338_v9 = vpop.f32.mrb[8].mxu0  ;;  %v11584_v25 = vsel %vm1517_vm1, %v1485_v29, %v1549_v30  ;;  %v11588_v28 = vsel %vm15220_vm0, %v1611_v60, %v1612_v17  ;;  %v11592_v35 = vsel %vm15221_vm14, %v1706_v39, %v1707_v21 }
 0x180   :  { %15222 = vst [vmem:[#allocation7_spill] sm:$0xff] %v11592_v35  ;;  %v1453_v38 = vmul.f32 %v8338_v9, %v11465_v3  ;;  %v1288_v8 = vpop.f32.mrb[9].mxu0  ;;  %v1613_v11 = vrot.slane %v11584_v25, 7  ;;  %8410 = vmatprep.mubr.f32.mxu0 %v11584_v25  ;;  %v11597_v53 = vsel %vm1518_vm15, %v1486_v43, %v1550_v44  ;;  %v11599_v52 = vpack.c.bf16 %v7065_v45, %v7064_v34  ;;  %vm15223_vm15 = vmmov %vm15220_vm0 }
 0x181   :  { %v1452_v29 = vmul.f32 %v11465_v3, %v1288_v8  ;;  %v1614_v36 = vrot.slane %v11597_v53, 7  ;;  %8411 = vmatmul.mubr.f32.gmra.mrb[36].mxu0 %v11597_v53  ;;  %vm1519_vm14 = vcmp.gt.f32.partialorder %v1487_v0, 0.0  ;;  %v1551_v60 = vmul.f32 0.01, %v1487_v0 }
 0x182   :  { %v1490_v39 = vadd.f32 %v11470_v10, %v1453_v38  ;;  %vm1520_vm1 = vcmp.gt.f32.partialorder %v1488_v6, 0.0  ;;  %v1552_v24 = vmul.f32 0.01, %v1488_v6  ;;  %v11609_v34 = vsel %vm15223_vm15, %v1612_v17, %v1613_v11 }
 0x183   :  { %v1489_v30 = vadd.f32 %v11470_v10, %v1452_v29  ;;  %v8341_v43 = vpop.f32.mrb[10].mxu0  ;;  %v11613_v45 = vsel %vm15224_vm2, %v1613_v11, %v1614_v36  ;;  %vm15225_vm0 = vcmp.lt.s32.totalorder %v10575_v22, 7  ;;  %v11623_v29 = vsel %vm1519_vm14, %v1487_v0, %v1551_v60 }
 0x184   :  { %v11619_v44 = vsel %vm15225_vm0, %v1707_v21, %v15049_v1  ;;  %v1455_v38 = vmul.f32 %v8341_v43, %v11465_v3  ;;  %v1298_v8 = vpop.f32.mrb[11].mxu0  ;;  %v11625_v16 = vsel %vm1520_vm1, %v1488_v6, %v1552_v24  ;;  %v1615_v11 = vrot.slane %v11623_v29, 7  ;;  %8413 = vmatprep.mubr.f32.mxu0 %v11623_v29 }
 0x185   :  { %15226 = vst [vmem:[#allocation8_spill] sm:$0xff] %v11619_v44  ;;  %v1454_v17 = vmul.f32 %v11465_v3, %v1298_v8  ;;  %v1616_v15 = vrot.slane %v11625_v16, 7  ;;  %vm1522_vm15 = vcmp.gt.f32.partialorder %v1490_v39, 0.0  ;;  %8414 = vmatmul.mubr.f32.gmra.mrb[38].mxu0 %v11625_v16  ;;  %vm1521_vm2 = vcmp.gt.f32.partialorder %v1489_v30, 0.0 }
 0x186   :  { %v1492_v21 = vadd.f32 %v11470_v10, %v1455_v38  ;;  %v1553_v0 = vmul.f32 0.01, %v1489_v30  ;;  %v1554_v24 = vmul.f32 0.01, %v1490_v39  ;;  %vm15227_vm14 = vcmp.lt.s32.totalorder %v10575_v22, 1 }
 0x187   :  { %v1491_v6 = vadd.f32 %v11470_v10, %v1454_v17  ;;  %v8344_v60 = vpop.f32.mrb[12].mxu0  ;;  %v11637_v43 = vsel %vm15227_vm14, %v1614_v36, %v1615_v11  ;;  %vm15228_vm1 = vmmov %vm15227_vm14 }
 0x188   :  { %v11641_v8 = vsel %vm15228_vm1, %v1615_v11, %v1616_v15  ;;  %v1457_v38 = vmul.f32 %v8344_v60, %v11465_v3  ;;  %v1308_v1 = vpop.f32.mrb[13].mxu0  ;;  %v11644_v9 = vsel %vm1521_vm2, %v1489_v30, %v1553_v0  ;;  %vm1524_vm0 = vcmp.gt.f32.partialorder %v1492_v21, 0.0  ;;  %vm15229_vm14 = vmmov %vm15228_vm1 }
 0x189   :  { %v1556_v57 = vmul.f32 0.01, %v1492_v21  ;;  %v1456_v17 = vmul.f32 %v11465_v3, %v1308_v1  ;;  %v1617_v7 = vrot.slane %v11644_v9, 7  ;;  %8416 = vmatprep.mubr.f32.mxu0 %v11644_v9  ;;  %v11651_v36 = vsel %vm1522_vm15, %v1490_v39, %v1554_v24 }
 0x18a   :  { %v1494_v11 = vadd.f32 %v11470_v10, %v1457_v38  ;;  %v1618_v30 = vrot.slane %v11651_v36, 7  ;;  %8417 = vmatmul.mubr.f32.gmra.mrb[40].mxu0 %v11651_v36  ;;  %vm1523_vm2 = vcmp.gt.f32.partialorder %v1491_v6, 0.0  ;;  %v1555_v1 = vmul.f32 0.01, %v1491_v6 }
 0x18b   :  { %v1493_v0 = vadd.f32 %v11470_v10, %v1456_v17  ;;  %v8347_v13 = vpop.f32.mrb[14].mxu0  ;;  %v11658_v55 = vsel %vm1524_vm0, %v1492_v21, %v1556_v57  ;;  %v11662_v46 = vsel %vm15229_vm14, %v1616_v15, %v1617_v7  ;;  %vm15230_vm0 = vmmov %vm15229_vm14 }
 0x18c   :  { %v1459_v24 = vmul.f32 %v8347_v13, %v11465_v3  ;;  %v1318_v38 = vpop.f32.mrb[15].mxu0  ;;  %v1620_v60 = vrot.slane %v11658_v55, 7  ;;  %vm1526_vm15 = vcmp.gt.f32.partialorder %v1494_v11, 0.0  ;;  %v11668_v42 = vsel %vm1523_vm2, %v1491_v6, %v1555_v1 }
 0x18d   :  { %v1458_v50 = vmul.f32 %v11465_v3, %v1318_v38  ;;  %vm1525_vm1 = vcmp.gt.f32.partialorder %v1493_v0, 0.0  ;;  %v1557_v17 = vmul.f32 0.01, %v1493_v0  ;;  %v1619_v21 = vrot.slane %v11668_v42, 7  ;;  %8419 = vmatprep.mubr.f32.mxu0 %v11668_v42 }
 0x18e   :  { %v1496_v57 = vadd.f32 %v11470_v10, %v1459_v24  ;;  %v1558_v39 = vmul.f32 0.01, %v1494_v11  ;;  %8420 = vmatmul.mubr.f32.gmra.mrb[42].mxu0 %v11658_v55  ;;  %v11680_v6 = vsel %vm15230_vm0, %v1617_v7, %v1618_v30  ;;  %v15231_v1 = vrot.slane %v11584_v25, 1 }
 0x18f   :  { %v1495_v13 = vadd.f32 %v11470_v10, %v1458_v50  ;;  %v8350_v63 = vpop.f32.mrb[16].mxu0  ;;  %v11676_v61 = vsel %vm1525_vm1, %v1493_v0, %v1557_v17  ;;  %v15232_v24 = vrot.slane %v11563_v14, 1  ;;  %vm15233_vm2 = vcmp.lt.s32.totalorder %v10575_v22, 7 }
 0x190   :  { %v1461_v50 = vmul.f32 %v8350_v63, %v11465_v3  ;;  %v1328_v26 = vpop.f32.mrb[17].mxu0  ;;  %v1621_v0 = vrot.slane %v11676_v61, 7  ;;  %8422 = vmatprep.mubr.f32.mxu0 %v11676_v61  ;;  %v11695_v7 = vsel %vm1526_vm15, %v1494_v11, %v1558_v39  ;;  %vm1528_vm1 = vcmp.gt.f32.partialorder %v1496_v57, 0.0  ;;  %vm15235_vm15 = vmmov %vm15230_vm0 }
 0x191   :  { %v11688_v38 = vsel %vm15233_vm2, %v15232_v24, %v15231_v1  ;;  %v1460_v17 = vmul.f32 %v11465_v3, %v1328_v26  ;;  %v1622_v20 = vrot.slane %v11695_v7, 7  ;;  %vm1527_vm14 = vcmp.gt.f32.partialorder %v1495_v13, 0.0  ;;  %vm15237_vm2 = vmmov %vm15230_vm0 }
 0x192   :  { %15234 = vst [vmem:[#allocation9_spill] sm:$0xff] %v11688_v38  ;;  %v1498_v1 = vadd.f32 %v11470_v10, %v1461_v50  ;;  %v1559_v24 = vmul.f32 0.01, %v1495_v13  ;;  %v1560_v63 = vmul.f32 0.01, %v1496_v57  ;;  %8423 = vmatmul.mubr.f32.gmra.mrb[44].mxu0 %v11695_v7  ;;  %v11705_v11 = vsel %vm15235_vm15, %v1618_v30, %v1619_v21 }
 0x193   :  { %v1497_v15 = vadd.f32 %v11470_v10, %v1460_v17  ;;  %v8353_v12 = vpop.f32.mrb[18].mxu0  ;;  %v11709_v26 = vsel %vm15230_vm0, %v1619_v21, %v1620_v60  ;;  %v11713_v39 = vsel %vm15237_vm2, %v1620_v60, %v1621_v0 }
 0x194   :  { %15236 = vst [vmem:[#allocation10_spill] sm:$0xff] %v11709_v26  ;;  %15238 = vst [vmem:[#allocation11_spill] sm:$0xff] %v11713_v39  ;;  %v1463_v14 = vmul.f32 %v8353_v12, %v11465_v3  ;;  %v1338_v17 = vpop.f32.mrb[19].mxu0  ;;  %v11717_v4 = vsel %vm1527_vm14, %v1495_v13, %v1559_v24  ;;  %v11719_v38 = vsel %vm1528_vm1, %v1496_v57, %v1560_v63  ;;  %vm1530_vm15 = vcmp.gt.f32.partialorder %v1498_v1, 0.0 }
 0x195   :  { %v1462_v30 = vmul.f32 %v11465_v3, %v1338_v17  ;;  %v1623_v41 = vrot.slane %v11717_v4, 7  ;;  %8425 = vmatprep.mubr.f32.mxu0 %v11717_v4  ;;  %v1624_v50 = vrot.slane %v11719_v38, 7  ;;  %vm1529_vm0 = vcmp.gt.f32.partialorder %v1497_v15, 0.0  ;;  %vm15239_vm14 = vmmov %vm15237_vm2 }
 0x196   :  { %v1500_v60 = vadd.f32 %v11470_v10, %v1463_v14  ;;  %v1561_v12 = vmul.f32 0.01, %v1497_v15  ;;  %8426 = vmatmul.mubr.f32.gmra.mrb[46].mxu0 %v11719_v38  ;;  %v1562_v24 = vmul.f32 0.01, %v1498_v1  ;;  %v11731_v63 = vsel %vm15239_vm14, %v1621_v0, %v1622_v20  ;;  %vm15241_vm1 = vmmov %vm15237_vm2 }
 0x197   :  { %v1499_v13 = vadd.f32 %v11470_v10, %v1462_v30  ;;  %v8356_v57 = vpop.f32.mrb[20].mxu0  ;;  %15240 = vst [vmem:[#allocation12_spill] sm:$0xff] %v11731_v63  ;;  %v11735_v17 = vsel %vm15241_vm1, %v1622_v20, %v1623_v41 }
 0x198   :  { %15242 = vst [vmem:[#allocation13_spill] sm:$0xff] %v11735_v17  ;;  %v1465_v14 = vmul.f32 %v8356_v57, %v11465_v3  ;;  %v1348_v21 = vpop.f32.mrb[21].mxu0  ;;  %v11738_v44 = vsel %vm1529_vm0, %v1497_v15, %v1561_v12  ;;  %vm1532_vm2 = vcmp.gt.f32.partialorder %v1500_v60, 0.0  ;;  %v1564_v35 = vmul.f32 0.01, %v1500_v60 }
 0x199   :  { %v1464_v51 = vmul.f32 %v11465_v3, %v1348_v21  ;;  %v1625_v54 = vrot.slane %v11738_v44, 7  ;;  %8428 = vmatprep.mubr.f32.mxu1 %v11738_v44  ;;  %v11745_v0 = vsel %vm1530_vm15, %v1498_v1, %v1562_v24  ;;  %vm1531_vm0 = vcmp.gt.f32.partialorder %v1499_v13, 0.0  ;;  %vm15243_vm15 = vmmov %vm15241_vm1 }
 0x19a   :  { %v1502_v20 = vadd.f32 %v11470_v10, %v1465_v14  ;;  %v1626_v15 = vrot.slane %v11745_v0, 7  ;;  %8429 = vmatmul.mubr.f32.vlgmr.msra.gmra.mrb[0].mxu1 %v11745_v0  ;;  %v1563_v30 = vmul.f32 0.01, %v1499_v13  ;;  %v11754_v2 = vsel %vm1532_vm2, %v1500_v60, %v1564_v35  ;;  %vm15245_vm2 = vmmov %vm15243_vm15 }
 0x19b   :  { %v1501_v12 = vadd.f32 %v11470_v10, %v1464_v51  ;;  %9596 = vmatpush3.bf16.msra.mxu1 %v11459_v62  ;;  %v8359_v21 = vpop.f32.mrb[22].mxu0  ;;  %v11758_v1 = vsel %vm15243_vm15, %v1623_v41, %v1624_v50  ;;  %v1628_v48 = vrot.slane %v11754_v2, 7 }
 0x19c   :  { %15244 = vst [vmem:[#allocation14_spill] sm:$0xff] %v11758_v1  ;;  %v1467_v14 = vmul.f32 %v8359_v21, %v11465_v3  ;;  %v1358_v57 = vpop.f32.mrb[23].mxu0  ;;  %9598 = vmatprep.subr.bf16.mxu1 %v11503_v40  ;;  %vm1534_vm14 = vcmp.gt.f32.partialorder %v1502_v20, 0.0  ;;  %v11765_v51 = vsel %vm1531_vm0, %v1499_v13, %v1563_v30  ;;  %v1566_v24 = vmul.f32 0.01, %v1502_v20  ;;  %vm15247_vm0 = vmmov %vm15245_vm2 }
 0x19d   :  { %v1466_v62 = vmul.f32 %v11465_v3, %v1358_v57  ;;  %vm1533_vm1 = vcmp.gt.f32.partialorder %v1501_v12, 0.0  ;;  %v1565_v35 = vmul.f32 0.01, %v1501_v12  ;;  %v1627_v41 = vrot.slane %v11765_v51, 7  ;;  %8431 = vmatprep.mubr.f32.mxu1 %v11765_v51 }
 0x19e   :  { %v1504_v60 = vadd.f32 %v11470_v10, %v1467_v14  ;;  %8432 = vmatmul.mubr.f32.gmra.mrb[2].mxu1 %v11754_v2  ;;  %v11777_v13 = vsel %vm15245_vm2, %v1624_v50, %v1625_v54  ;;  %v11781_v30 = vsel %vm15247_vm0, %v1625_v54, %v1626_v15  ;;  %vm15251_vm2 = vmmov %vm15247_vm0 }
 0x19f   :  { %v1503_v1 = vadd.f32 %v11470_v10, %v1466_v62  ;;  %v8362_v37 = vpop.f32.mrb[24].mxu0  ;;  %v11773_v17 = vsel %vm1533_vm1, %v1501_v12, %v1565_v35  ;;  %15246 = vst [vmem:[#allocation15_spill] sm:$0xff] %v11777_v13  ;;  %15248 = vst [vmem:[#allocation18_spill] sm:$0xff] %v11781_v30  ;;  %9600 = vmatpush3.bf16.msra.mxu1 %v11503_v40  ;;  %v11789_v12 = vsel %vm1534_vm14, %v1502_v20, %v1566_v24 }
 0x1a0   :  { %v1469_v14 = vmul.f32 %v8362_v37, %v11465_v3  ;;  %v1368_v62 = vpop.f32.mrb[25].mxu0  ;;  %v1629_v21 = vrot.slane %v11773_v17, 7  ;;  %8434 = vmatprep.mubr.f32.mxu1 %v11773_v17  ;;  %v1630_v54 = vrot.slane %v11789_v12, 7  ;;  %9602 = vmatprep.subr.bf16.mxu1 %v11505_v27  ;;  %vm1536_vm1 = vcmp.gt.f32.partialorder %v1504_v60, 0.0  ;;  %vm15249_vm14 = vmmov %vm15247_vm0 }
 0x1a1   :  { %v1468_v50 = vmul.f32 %v11465_v3, %v1368_v62  ;;  %vm1535_vm15 = vcmp.gt.f32.partialorder %v1503_v1, 0.0  ;;  %v1567_v37 = vmul.f32 0.01, %v1503_v1  ;;  %v1568_v57 = vmul.f32 0.01, %v1504_v60 }
 0x1a2   :  { %v1506_v40 = vadd.f32 %v11470_v10, %v1469_v14  ;;  %8435 = vmatmul.mubr.f32.gmra.mrb[4].mxu1 %v11789_v12  ;;  %v11800_v24 = vsel %vm15249_vm14, %v1626_v15, %v1627_v41  ;;  %v11804_v62 = vsel %vm15251_vm2, %v1627_v41, %v1628_v48  ;;  %v11808_v35 = vsel %vm15247_vm0, %v1628_v48, %v1629_v21 }
 0x1a3   :  { %v1505_v30 = vadd.f32 %v11470_v10, %v1468_v50  ;;  %v8365_v20 = vpop.f32.mrb[26].mxu0  ;;  %15250 = vst [vmem:[#allocation19_spill] sm:$0xff] %v11800_v24  ;;  %15252 = vst [vmem:[#allocation35_spill] sm:$0xff] %v11804_v62  ;;  %9604 = vmatpush3.bf16.msra.mxu1 %v11505_v27  ;;  %v11813_v63 = vsel %vm1535_vm15, %v1503_v1, %v1567_v37  ;;  %v11815_v39 = vsel %vm1536_vm1, %v1504_v60, %v1568_v57 }
 0x1a4   :  { %15253 = vst [vmem:[#allocation36_spill] sm:$0xff] %v11808_v35  ;;  %v1471_v50 = vmul.f32 %v8365_v20, %v11465_v3  ;;  %v1378_v13 = vpop.f32.mrb[27].mxu0  ;;  %v1631_v41 = vrot.slane %v11813_v63, 7  ;;  %8437 = vmatprep.mubr.f32.mxu1 %v11813_v63  ;;  %9606 = vmatprep.subr.bf16.mxu1 %v11517_v18  ;;  %vm1538_vm14 = vcmp.gt.f32.partialorder %v1506_v40, 0.0  ;;  %v1632_v27 = vrot.slane %v11815_v39, 7  ;;  %vm15254_vm15 = vmmov %vm15247_vm0 }
 0x1a5   :  { %v1470_v15 = vmul.f32 %v11465_v3, %v1378_v13  ;;  %vm1537_vm2 = vcmp.gt.f32.partialorder %v1505_v30, 0.0  ;;  %v1569_v1 = vmul.f32 0.01, %v1505_v30  ;;  %v1570_v57 = vmul.f32 0.01, %v1506_v40  ;;  %vm15256_vm1 = vmmov %vm15247_vm0 }
 0x1a6   :  { %v1508_v48 = vadd.f32 %v11470_v10, %v1471_v50  ;;  %8438 = vmatmul.mubr.f32.gmra.mrb[6].mxu1 %v11815_v39  ;;  %v11828_v37 = vsel %vm15254_vm15, %v1629_v21, %v1630_v54  ;;  %v11832_v20 = vsel %vm15256_vm1, %v1630_v54, %v1631_v41 }
 0x1a7   :  { %v1507_v60 = vadd.f32 %v11470_v10, %v1470_v15  ;;  %v8368_v13 = vpop.f32.mrb[28].mxu0  ;;  %15255 = vst [vmem:[#allocation37_spill] sm:$0xff] %v11828_v37  ;;  %15257 = vst [vmem:[#allocation38_spill] sm:$0xff] %v11832_v20  ;;  %9608 = vmatpush3.bf16.msra.mxu1 %v11517_v18  ;;  %v11836_v14 = vsel %vm1537_vm2, %v1505_v30, %v1569_v1  ;;  %v11843_v54 = vsel %vm1538_vm14, %v1506_v40, %v1570_v57 }
 0x1a8   :  { %v1473_v50 = vmul.f32 %v8368_v13, %v11465_v3  ;;  %v1388_v62 = vpop.f32.mrb[29].mxu0  ;;  %vm1540_vm0 = vcmp.gt.f32.partialorder %v1508_v48, 0.0  ;;  %v1572_v15 = vmul.f32 0.01, %v1508_v48  ;;  %v1633_v21 = vrot.slane %v11836_v14, 7  ;;  %8440 = vmatprep.mubr.f32.mxu1 %v11836_v14  ;;  %9610 = vmatprep.subr.bf16.mxu1 %v11520_v33  ;;  %vm15258_vm14 = vmmov %vm15256_vm1 }
 0x1a9   :  { %v1472_v24 = vmul.f32 %v11465_v3, %v1388_v62  ;;  %v1634_v1 = vrot.slane %v11843_v54, 7  ;;  %vm1539_vm2 = vcmp.gt.f32.partialorder %v1507_v60, 0.0  ;;  %v1571_v35 = vmul.f32 0.01, %v1507_v60 }
 0x1aa   :  { %v1510_v18 = vadd.f32 %v11470_v10, %v1473_v50  ;;  %8441 = vmatmul.mubr.f32.gmra.mrb[8].mxu1 %v11843_v54  ;;  %v11852_v20 = vsel %vm1540_vm0, %v1508_v48, %v1572_v15  ;;  %v11856_v40 = vsel %vm15258_vm14, %v1631_v41, %v1632_v27  ;;  %vm15259_vm0 = vmmov %vm15258_vm14 }
 0x1ab   :  { %v1509_v13 = vadd.f32 %v11470_v10, %v1472_v24  ;;  %v8371_v62 = vpop.f32.mrb[30].mxu0  ;;  %9612 = vmatpush3.bf16.msra.mxu1 %v11520_v33  ;;  %v1636_v24 = vrot.slane %v11852_v20, 7  ;;  %v11863_v26 = vsel %vm1539_vm2, %v1507_v60, %v1571_v35  ;;  %v11876_v35 = vsel %vm15259_vm0, %v1632_v27, %v1633_v21  ;;  %vm15260_vm2 = vmmov %vm15259_vm0 }
 0x1ac   :  { %v1475_v50 = vmul.f32 %v8371_v62, %v11465_v3  ;;  %v1398_v30 = vpop.f32.mrb[31].mxu0  ;;  %vm1542_vm15 = vcmp.gt.f32.partialorder %v1510_v18, 0.0  ;;  %9614 = vmatprep.subr.bf16.mxu1 %v11523_v47  ;;  %v1635_v15 = vrot.slane %v11863_v26, 7  ;;  %8443 = vmatprep.mubr.f32.mxu1 %v11863_v26  ;;  %v1574_v62 = vmul.f32 0.01, %v1510_v18  ;;  %vm15263_vm13 = vmmov %vm15259_vm0 }
 0x1ad   :  { %v1474_v37 = vmul.f32 %v11465_v3, %v1398_v30  ;;  %vm1541_vm1 = vcmp.gt.f32.partialorder %v1509_v13, 0.0  ;;  %v1573_v48 = vmul.f32 0.01, %v1509_v13  ;;  %v11880_v60 = vsel %vm15260_vm2, %v1633_v21, %v1634_v1  ;;  %vm15261_vm2 = vmmov %vm15259_vm0 }
 0x1ae   :  { %v1512_v41 = vadd.f32 %v11470_v10, %v1475_v50  ;;  %8444 = vmatmul.mubr.f32.gmra.mrb[10].mxu1 %v11852_v20  ;;  %v1731_v30 = vrot.slane %v11863_v26, 1  ;;  %v11891_v26 = vsel %vm15259_vm0, %v1634_v1, %v1635_v15  ;;  %v15267_v33 = vrot.slane %v11584_v25, 1 }
 0x1af   :  { %v1511_v57 = vadd.f32 %v11470_v10, %v1474_v37  ;;  %v11872_v3 = vsel %vm1541_vm1, %v1509_v13, %v1573_v48  ;;  %9616 = vmatpush3.bf16.msra.mxu1 %v11523_v47  ;;  %v1606_v37 = vsel %vm1542_vm15, %v1510_v18, %v1574_v62  ;;  %v11895_v47 = vsel %vm15261_vm2, %v1635_v15, %v1636_v24  ;;  %vm15264_vm15 = vmmov %vm15259_vm0 }
 0x1b0   :  { %v1637_v50 = vrot.slane %v11872_v3, 7  ;;  %v1733_v10 = vrot.slane %v11872_v3, 1  ;;  %8446 = vmatprep.mubr.f32.mxu1 %v11872_v3  ;;  %v1638_v13 = vrot.slane %v1606_v37, 7  ;;  %9618 = vmatprep.subr.bf16.mxu1 %v11525_v5  ;;  %vm1544_vm1 = vcmp.gt.f32.partialorder %v1512_v41, 0.0  ;;  %15262 = vst [vmem:[#allocation39_spill] sm:$0xff] %v11895_v47  ;;  %vm15092_vm2 = vmneg %vm10999_vm3 }
 0x1b1   :  { %vm1543_vm14 = vcmp.gt.f32.partialorder %v1511_v57, 0.0  ;;  %v1575_v27 = vmul.f32 0.01, %v1511_v57  ;;  %v1576_v21 = vmul.f32 0.01, %v1512_v41  ;;  %v15266_v3 = vrot.slane %v11597_v53, 1 }
 0x1b2   :  { %v11899_v48 = vsel %vm15263_vm13, %v1636_v24, %v1637_v50  ;;  %8447 = vmatmul.mubr.f32.gmra.mrb[12].mxu1 %v1606_v37  ;;  %v11903_v62 = vsel %vm15264_vm15, %v1637_v50, %v1638_v13  ;;  %vm15268_vm0 = vcmp.lt.s32.totalorder %v10575_v22, 7  ;;  %v15269_v15 = vrot.slane %v11623_v29, 1 }
 0x1b3   :  { %v1607_v18 = vsel %vm1543_vm14, %v1511_v57, %v1575_v27  ;;  %15265 = vst [vmem:[#allocation40_spill] sm:$0xff] %v11903_v62  ;;  %v11911_v1 = vsel %vm15268_vm0, %v15267_v33, %v15266_v3  ;;  %v15270_v47 = vmov %v15266_v3  ;;  %vm15271_vm13 = vmmov %vm15268_vm0  ;;  %v1734_v57 = vrot.slane %v1606_v37, 1  ;;  %9620 = vmatpush3.bf16.msra.mxu1 %v11525_v5 }
 0x1b4   :  { %v11919_v24 = vsel %vm15271_vm13, %v15270_v47, %v15269_v15  ;;  %v1639_v50 = vrot.slane %v1607_v18, 7  ;;  %8449 = vmatprep.mubr.f32.mxu1 %v1607_v18  ;;  %v1608_v27 = vsel %vm1544_vm1, %v1512_v41, %v1576_v21  ;;  %v15272_v25 = vrot.slane %v11625_v16, 1  ;;  %vm15274_vm14 = vmmov %vm15268_vm0  ;;  %9622 = vmatprep.subr.bf16.mxu1 %v11548_v49 }
 0x1b5   :  { %v15273_v62 = vmov %v15269_v15  ;;  %v1735_v3 = vrot.slane %v1607_v18, 1  ;;  %v1640_v53 = vrot.slane %v1608_v27, 7  ;;  %v15276_v5 = vrot.slane %v11644_v9, 1  ;;  %vm15278_vm1 = vmmov %vm15268_vm0 }
 0x1b6   :  { %v11928_v33 = vsel %vm15274_vm14, %v15273_v62, %v15272_v25  ;;  %v15277_v37 = vmov %v15272_v25  ;;  %v15279_v29 = vrot.slane %v11651_v36, 1  ;;  %vm15281_vm15 = vmmov %vm15268_vm0  ;;  %vm15282_vm0 = vcmp.lt.s32.totalorder %v10575_v22, 1  ;;  %8450 = vmatmul.mubr.f32.gmra.mrb[14].mxu1 %v1608_v27 }
 0x1b7   :  { %v11939_v41 = vsel %vm15278_vm1, %v15277_v37, %v15276_v5  ;;  %v15280_v21 = vmov %v15276_v5  ;;  %v11951_v62 = vsel %vm15282_vm0, %v1638_v13, %v1639_v50  ;;  %v15283_v15 = vrot.slane %v11668_v42, 1  ;;  %vm15285_vm13 = vmmov %vm15278_vm1  ;;  %9624 = vmatpush3.bf16.msra.mxu1 %v11548_v49 }
 0x1b8   :  { %v11947_v18 = vsel %vm15281_vm15, %v15280_v21, %v15279_v29  ;;  %v15284_v16 = vmov %v15279_v29  ;;  %v15286_v5 = vrot.slane %v11658_v55, 1  ;;  %vm15288_vm14 = vmmov %vm15278_vm1  ;;  %v15289_v29 = vrot.slane %v11676_v61, 1  ;;  %9626 = vmatprep.subr.bf16.mxu1 %v11565_v56 }
 0x1b9   :  { %v11959_v25 = vsel %vm15285_vm13, %v15284_v16, %v15283_v15  ;;  %v15287_v9 = vmov %v15283_v15  ;;  %v15291_v36 = vrot.slane %v11528_v23, 7  ;;  %vm15292_vm15 = vmmov %vm15282_vm0  ;;  %v11983_v42 = vsel %vm15282_vm0, %v1639_v50, %v1640_v53 }
 0x1ba   :  { %v11967_v37 = vsel %vm15288_vm14, %v15287_v9, %v15286_v5  ;;  %v15290_v13 = vmov %v15286_v5  ;;  %v15293_v16 = vrot.slane %v11695_v7, 1  ;;  %v15294_v5 = vmov %v15289_v29  ;;  %vm15295_vm13 = vmmov %vm15278_vm1 }
 0x1bb   :  { %v11975_v21 = vsel %vm15278_vm1, %v15290_v13, %v15289_v29  ;;  %v1672_v15 = vsel %vm15292_vm15, %v1640_v53, %v15291_v36  ;;  %v15296_v9 = vrot.slane %v11717_v4, 1  ;;  %vm15298_vm14 = vmmov %vm15278_vm1  ;;  %v1736_v36 = vrot.slane %v1608_v27, 1 }
 0x1bc   :  { %v11991_v55 = vsel %vm15295_vm13, %v15294_v5, %v15293_v16  ;;  %v15297_v29 = vmov %v15293_v16  ;;  %8484 = vmatprep.mubr.msk.f32.mxu1 %vm15092_vm2, %v1672_v15  ;;  %v15299_v61 = vrot.slane %v11719_v38, 1  ;;  %v15301_v7 = vrot.slane %v11738_v44, 1  ;;  %vm15303_vm15 = vmmov %vm15278_vm1 }
 0x1bd   :  { %v11999_v13 = vsel %vm15298_vm14, %v15297_v29, %v15296_v9  ;;  %v15300_v50 = vmov %v15296_v9  ;;  %v15304_v49 = vrot.slane %v11745_v0, 1  ;;  %vm15306_vm0 = vmmov %vm15278_vm1  ;;  %v15307_v4 = vrot.slane %v11765_v51, 1  ;;  %v7066_v51 = vld [vmem:[%s15014_s2 + $0x120] sm:$0xff]  ;;  %8485 = vmatmul.mubr.f32.vlgmr.msra.gmra.mrb[16].mxu1 %v11554_v59 }
 0x1be   :  { %v12011_v53 = vsel %vm15278_vm1, %v15300_v50, %v15299_v61  ;;  %v15302_v16 = vmov %v15299_v61  ;;  %v15305_v15 = vmov %v15301_v7  ;;  %vm15309_vm13 = vmmov %vm15306_vm0  ;;  %v15310_v29 = vrot.slane %v11754_v2, 1  ;;  %v7067_v2 = vld [vmem:[%s15014_s2 + $0x128] sm:$0xff]  ;;  %8487 = vmatprep.mubr.f32.mxu1 %v11581_v19  ;;  %9628 = vmatpush3.bf16.msra.mxu1 %v11565_v56  ;;  %v7068_v19 = vld [vmem:[%s15014_s2 + $0x130] sm:$0xff] }
 0x1bf   :  { %v12019_v27 = vsel %vm15303_vm15, %v15302_v16, %v15301_v7  ;;  %v12027_v5 = vsel %vm15306_vm0, %v15305_v15, %v15304_v49  ;;  %v15308_v9 = vmov %v15304_v49  ;;  %v15311_v61 = vmov %v15307_v4  ;;  %vm15312_vm14 = vmmov %vm15306_vm0  ;;  %9630 = vmatprep.subr.bf16.mxu1 %v11599_v52 }
 0x1c0   :  { %v12036_v38 = vsel %vm15309_vm13, %v15308_v9, %v15307_v4  ;;  %v12044_v44 = vsel %vm15312_vm14, %v15311_v61, %v15310_v29  ;;  %v15313_v50 = vrot.slane %v11773_v17, 1  ;;  %v15314_v7 = vmov %v15310_v29  ;;  %vm15315_vm1 = vmmov %vm15306_vm0 }
 0x1c1   :  { %v15316_v0 = vrot.slane %v11789_v12, 1  ;;  %vm15318_vm15 = vmmov %vm15306_vm0  ;;  %v15319_v4 = vrot.slane %v11813_v63, 1  ;;  %v15321_v17 = vrot.slane %v11815_v39, 1  ;;  %v15327_v12 = vrot.slane %v11843_v54, 1  ;;  %8488 = vmatmul.mubr.f32.gmra.mrb[18].mxu1 %v11588_v28 }
 0x1c2   :  { %v12052_v16 = vsel %vm15315_vm1, %v15314_v7, %v15313_v50  ;;  %v15317_v49 = vmov %v15313_v50  ;;  %vm15323_vm13 = vmmov %vm15306_vm0  ;;  %v15324_v7 = vrot.slane %v11836_v14, 1  ;;  %v15332_v39 = vrot.slane %v11852_v20, 1  ;;  %9632 = vmatpush3.bf16.msra.mxu1 %v11599_v52  ;;  %v7072_v52 = vld [vmem:[%s15014_s2 + $0x150] sm:$0xff] }
 0x1c3   :  { %v12060_v15 = vsel %vm15318_vm15, %v15317_v49, %v15316_v0  ;;  %v15320_v9 = vmov %v15316_v0  ;;  %v15322_v61 = vmov %v15319_v4  ;;  %v15325_v0 = vmov %v15321_v17  ;;  %vm15326_vm14 = vmmov %vm15306_vm0 }
 0x1c4   :  { %v12074_v29 = vsel %vm15306_vm0, %v15320_v9, %v15319_v4  ;;  %v12082_v50 = vsel %vm15323_vm13, %v15322_v61, %v15321_v17  ;;  %v12090_v49 = vsel %vm15326_vm14, %v15325_v0, %v15324_v7  ;;  %v15328_v4 = vmov %v15324_v7  ;;  %vm15329_vm1 = vmmov %vm15306_vm0 }
 0x1c5   :  { %v12098_v9 = vsel %vm15329_vm1, %v15328_v4, %v15327_v12  ;;  %v15330_v63 = vmov %v15327_v12  ;;  %vm15331_vm15 = vmmov %vm15306_vm0  ;;  %v12111_v61 = vsel %vm15306_vm0, %v1731_v30, %v15332_v39  ;;  %v15333_v14 = vmov %v15332_v39  ;;  %v15340_v12 = vld [vmem:[#allocation11_spill] sm:$0xff]  ;;  %v15342_v4 = vld [vmem:[#allocation13_spill] sm:$0xff] }
 0x1c6   :  { %v12105_v17 = vsel %vm15331_vm15, %v15330_v63, %v1731_v30  ;;  %vm15334_vm13 = vmmov %vm15306_vm0  ;;  %v15338_v20 = vrot.slane %v11528_v23, 1  ;;  %v9633_v56 = vpack.c.bf16 %v7067_v2, %v7066_v51  ;;  %v7077_v51 = vld [vmem:[%s15014_s2 + $0x178] sm:$0xff]  ;;  %v15339_v2 = vld [vmem:[#allocation10_spill] sm:$0xff] }
 0x1c7   :  { %v12117_v7 = vsel %vm15334_vm13, %v15333_v14, %v1733_v10  ;;  %vm15335_vm14 = vmmov %vm15306_vm0  ;;  %v15344_v39 = vld [vmem:[#allocation14_spill] sm:$0xff]  ;;  %v15345_v14 = vld [vmem:[#allocation15_spill] sm:$0xff] }
 0x1c8   :  { %v12121_v59 = vsel %vm15335_vm14, %v1733_v10, %v1734_v57  ;;  %vm15336_vm1 = vmmov %vm15306_vm0  ;;  %v12137_v0 = vsel %vm15306_vm0, %v1736_v36, %v15338_v20  ;;  %v7069_v10 = vld [vmem:[%s15014_s2 + $0x138] sm:$0xff]  ;;  %9634 = vmatprep.subr.bf16.mxu1 %v9633_v56  ;;  %v15346_v20 = vld [vmem:[#allocation18_spill] sm:$0xff] }
 0x1c9   :  { %v12127_v54 = vsel %vm15336_vm1, %v1734_v57, %v1735_v3  ;;  %vm15337_vm15 = vmmov %vm15306_vm0  ;;  %v9637_v23 = vpack.c.bf16 %v7069_v10, %v7068_v19  ;;  %v7070_v57 = vld [vmem:[%s15014_s2 + $0x140] sm:$0xff]  ;;  %9636 = vmatpush3.bf16.msra.mxu1 %v9633_v56  ;;  %v15347_v56 = vld [vmem:[#allocation19_spill] sm:$0xff] }
 0x1ca   :  { %v12131_v30 = vsel %vm15337_vm15, %v1735_v3, %v1736_v36  ;;  %vm15090_vm13 = vmneg %vm11057_vm4  ;;  %v7071_v3 = vld [vmem:[%s15014_s2 + $0x148] sm:$0xff] }
 0x1cb   :  { %8490 = vmatprep.mubr.msk.f32.mxu1 %vm15090_vm13, %v11609_v34  ;;  %vm15088_vm14 = vmneg %vm11116_vm5  ;;  %9638 = vmatprep.subr.bf16.mxu1 %v9637_v23  ;;  %v9641_v28 = vpack.c.bf16 %v7071_v3, %v7070_v57  ;;  %v7073_v34 = vld [vmem:[%s15014_s2 + $0x158] sm:$0xff]  ;;  %v7075_v36 = vld [vmem:[%s15014_s2 + $0x168] sm:$0xff] }
 0x1cc   :  { %8491 = vmatmul.mubr.f32.gmra.mrb[20].mxu1 %v11613_v45  ;;  %v9645_v45 = vpack.c.bf16 %v7073_v34, %v7072_v52  ;;  %vm15086_vm1 = vmneg %vm11174_vm6  ;;  %v15349_v10 = vld [vmem:[#allocation35_spill] sm:$0xff]  ;;  %v15351_v57 = vld [vmem:[#allocation37_spill] sm:$0xff] }
 0x1cd   :  { %8493 = vmatprep.mubr.f32.mxu1 %v11637_v43  ;;  %9640 = vmatpush3.bf16.msra.mxu1 %v9637_v23  ;;  %v7074_v43 = vld [vmem:[%s15014_s2 + $0x160] sm:$0xff]  ;;  %vm15081_vm15 = vmneg %vm11204_vm7  ;;  %v15350_v23 = vld [vmem:[#allocation36_spill] sm:$0xff] }
 0x1ce   :  { %9642 = vmatprep.subr.bf16.mxu1 %v9641_v28  ;;  %vm15082_vm0 = vmneg %vm11227_vm8  ;;  %v15352_v3 = vld [vmem:[#allocation38_spill] sm:$0xff]  ;;  %v7097_v34 = vld [vmem:[%s15016_s3 + $0x88] sm:$0xff] }
 0x1cf   :  { %v7096_v52 = vld [vmem:[%s15016_s3 + $0x80] sm:$0xff] }
 0x1d0   :  { %8494 = vmatmul.mubr.f32.gmra.mrb[22].mxu1 %v11641_v8  ;;  %v7076_v8 = vld [vmem:[%s15014_s2 + $0x170] sm:$0xff] }
 0x1d1   :  { %8496 = vmatprep.mubr.msk.f32.mxu1 %vm15088_vm14, %v11662_v46  ;;  %9644 = vmatpush3.bf16.msra.mxu1 %v9641_v28  ;;  %v9649_v46 = vpack.c.bf16 %v7075_v36, %v7074_v43  ;;  %v7100_v43 = vld [vmem:[%s15016_s3 + $0xa0] sm:$0xff]  ;;  %v7101_v36 = vld [vmem:[%s15016_s3 + $0xa8] sm:$0xff] }
 0x1d2   :  { %9646 = vmatprep.subr.bf16.mxu1 %v9645_v45 }
 0x1d4   :  { %8497 = vmatmul.mubr.f32.gmra.mrb[24].mxu1 %v11680_v6  ;;  %v9653_v6 = vpack.c.bf16 %v7077_v51, %v7076_v8  ;;  %v9665_v8 = vpack.c.bf16 %v7101_v36, %v7100_v43  ;;  %v7102_v51 = vld [vmem:[%s15016_s3 + $0xb0] sm:$0xff]  ;;  %v2923_v43 = vld [vmem:[%s15016_s3 + $0x18] sm:$0xff]  ;;  %v2924_v36 = vld [vmem:[%s15016_s3 + $0x20] sm:$0xff] }
 0x1d5   :  { %8499 = vmatprep.mubr.f32.mxu1 %v11705_v11  ;;  %9648 = vmatpush3.bf16.msra.mxu1 %v9645_v45  ;;  %v15341_v11 = vld [vmem:[#allocation12_spill] sm:$0xff] }
 0x1d6   :  { %9650 = vmatprep.subr.bf16.mxu1 %v9649_v46 }
 0x1d8   :  { %8500 = vmatmul.mubr.f32.gmra.mrb[26].mxu1 %v15339_v2  ;;  %v7103_v2 = vld [vmem:[%s15016_s3 + $0xb8] sm:$0xff] }
 0x1d9   :  { %8502 = vmatprep.mubr.msk.f32.mxu1 %vm15086_vm1, %v15340_v12  ;;  %9652 = vmatpush3.bf16.msra.mxu1 %v9649_v46  ;;  %v15355_v46 = vld [vmem:[#allocation39_spill] sm:$0xff]  ;;  %v15356_v12 = vld [vmem:[#allocation40_spill] sm:$0xff] }
 0x1da   :  { %9654 = vmatprep.subr.bf16.mxu1 %v9653_v6 }
 0x1dc   :  { %8503 = vmatmul.mubr.f32.gmra.mrb[28].mxu1 %v15341_v11  ;;  %v7105_v11 = vld [vmem:[%s15016_s3 + $0xc8] sm:$0xff] }
 0x1dd   :  { %8505 = vmatprep.mubr.f32.mxu1 %v15342_v4  ;;  %9656 = vmatpush3.bf16.msra.mxu1 %v9653_v6  ;;  %v9669_v6 = vpack.c.bf16 %v7103_v2, %v7102_v51  ;;  %v15357_v4 = vld [vmem:[#allocation6_spill] sm:$0xff]  ;;  %v2925_v51 = vld [vmem:[%s15016_s3 + $0x28] sm:$0xff]  ;;  %v2926_v2 = vld [vmem:[%s15016_s3 + $0x30] sm:$0xff] }
 0x1e0   :  { %8506 = vmatmul.mubr.f32.gmra.mrb[30].mxu1 %v15344_v39 }
 0x1e1   :  { %8508 = vmatprep.mubr.msk.f32.mxu1 %vm15081_vm15, %v15345_v14  ;;  %vm15084_vm15 = vmneg %vm11250_vm9  ;;  %v15358_v14 = vld [vmem:[#allocation7_spill] sm:$0xff] }
 0x1e4   :  { %8509 = vmatmul.mubr.f32.gmra.mrb[0].mxu1 %v15346_v20 }
 0x1e5   :  { %8511 = vmatprep.mubr.f32.mxu1 %v15347_v56  ;;  %v15361_v56 = vld [vmem:[#allocation9_spill] sm:$0xff] }
 0x1e8   :  { %8512 = vmatmul.mubr.f32.gmra.mrb[2].mxu1 %v15349_v10 }
 0x1e9   :  { %8514 = vmatprep.mubr.msk.f32.mxu1 %vm15082_vm0, %v15350_v23  ;;  %vm15083_vm0 = vmneg %vm11273_vm10 }
 0x1ec   :  { %8515 = vmatmul.mubr.f32.gmra.mrb[4].mxu1 %v15351_v57 }
 0x1ed   :  { %8517 = vmatprep.mubr.f32.mxu1 %v15352_v3  ;;  %v2920_v3 = vld [vmem:[%s15016_s3] sm:$0xff] }
 0x1f0   :  { %8518 = vmatmul.mubr.f32.gmra.mrb[6].mxu1 %v11856_v40  ;;  %v7098_v40 = vld [vmem:[%s15016_s3 + $0x90] sm:$0xff] }
 0x1f1   :  { %8520 = vmatprep.mubr.msk.f32.mxu1 %vm15084_vm15, %v11876_v35  ;;  %v9657_v35 = vpack.c.bf16 %v7097_v34, %v7096_v52  ;;  %vm15087_vm15 = vmneg %vm11325_vm12  ;;  %v2921_v52 = vld [vmem:[%s15016_s3 + $0x8] sm:$0xff] }
 0x1f2   :  { %v12387_v34 = vpack.c.bf16 %v2921_v52, %v2920_v3  ;;  %v7128_v3 = vld [vmem:[%s15016_s3 + $0x100] sm:$0xff]  ;;  %v7129_v52 = vld [vmem:[%s15016_s3 + $0x108] sm:$0xff] }
 0x1f3   :  { %9658 = vmatprep.subr.bf16.mxu0 %v9657_v35 }
 0x1f4   :  { %8521 = vmatmul.mubr.f32.gmra.mrb[8].mxu1 %v11880_v60  ;;  %v7099_v60 = vld [vmem:[%s15016_s3 + $0x98] sm:$0xff]  ;;  %9660 = vmatpush3.bf16.msra.mxu0 %v9657_v35 }
 0x1f5   :  { %8523 = vmatprep.mubr.f32.mxu1 %v11891_v26  ;;  %v9661_v26 = vpack.c.bf16 %v7099_v60, %v7098_v40  ;;  %v12393_v40 = vld [vmem:[%s15015_s14 + $0x2] ss:$0 sm:$0xff]  ;;  %v12398_v60 = vld [vmem:[%s15015_s14 + $0x3] ss:$0 sm:$0xff] }
 0x1f7   :  { %9662 = vmatprep.subr.bf16.mxu0 %v9661_v26 }
 0x1f8   :  { %8524 = vmatmul.mubr.f32.gmra.mrb[10].mxu1 %v15355_v46  ;;  %9664 = vmatpush3.bf16.msra.mxu0 %v9661_v26  ;;  %v2922_v26 = vld [vmem:[%s15016_s3 + $0x10] sm:$0xff] }
 0x1f9   :  { %8526 = vmatprep.mubr.msk.f32.mxu1 %vm15083_vm0, %v11899_v48  ;;  %9666 = vmatprep.subr.bf16.mxu0 %v9665_v8  ;;  %v7104_v48 = vld [vmem:[%s15016_s3 + $0xc0] sm:$0xff]  ;;  %vm15085_vm0 = vmneg %vm11304_vm11 }
 0x1fa   :  { %v9673_v39 = vpack.c.bf16 %v7105_v11, %v7104_v48  ;;  %v2928_v48 = vld [vmem:[%s15016_s3 + $0x40] sm:$0xff]  ;;  %v2929_v11 = vld [vmem:[%s15016_s3 + $0x48] sm:$0xff] }
 0x1fc   :  { %8527 = vmatmul.mubr.f32.gmra.mrb[12].mxu1 %v15356_v12  ;;  %9668 = vmatpush3.bf16.msra.mxu0 %v9665_v8  ;;  %v2927_v12 = vld [vmem:[%s15016_s3 + $0x38] sm:$0xff] }
 0x1fd   :  { %8529 = vmatprep.mubr.f32.mxu1 %v11951_v62  ;;  %9670 = vmatprep.subr.bf16.mxu0 %v9669_v6  ;;  %v15359_v62 = vld [vmem:[#allocation8_spill] sm:$0xff] }
 0x200   :  { %8530 = vmatmul.mubr.f32.gmra.mrb[14].mxu1 %v11983_v42  ;;  %9672 = vmatpush3.bf16.msra.mxu0 %v9669_v6 }
 0x201   :  { %8564 = vmatprep.mubr.f32.mxu1 %v15357_v4  ;;  %9674 = vmatprep.subr.bf16.mxu0 %v9673_v39  ;;  %v2930_v4 = vld [vmem:[%s15016_s3 + $0x50] sm:$0xff] }
 0x204   :  { %8565 = vmatmul.mubr.f32.vlgmr.msra.gmra.mrb[16].mxu1 %v15358_v14  ;;  %9676 = vmatpush3.bf16.msra.mxu0 %v9673_v39  ;;  %v2931_v14 = vld [vmem:[%s15016_s3 + $0x58] sm:$0xff] }
 0x205   :  { %8567 = vmatprep.mubr.f32.mxu1 %v15359_v62  ;;  %v2932_v62 = vld [vmem:[%s15016_s3 + $0x60] sm:$0xff] }
 0x208   :  { %8568 = vmatmul.mubr.msk.f32.gmra.mrb[18].mxu1 %vm15085_vm0, %v15361_v56  ;;  %v2933_v56 = vld [vmem:[%s15016_s3 + $0x68] sm:$0xff] }
 0x209   :  { %8570 = vmatprep.mubr.f32.mxu1 %v11911_v1  ;;  %v15363_v1 = vld [vmem:[#allocation32_spill] sm:$0xff] }
 0x20a   :  { %vm15364_vm0 = vnez %v15363_v1 }
 0x20b   :  { %vm15089_vm1 = vmneg %vm15364_vm0 }
 0x20c   :  { %8571 = vmatmul.mubr.f32.gmra.mrb[20].mxu1 %v11919_v24  ;;  %v15365_v24 = vld [vmem:[#allocation34_spill] sm:$0xff] }
 0x20d   :  { %8573 = vmatprep.mubr.f32.mxu1 %v11928_v33  ;;  %v15367_v33 = vld [vmem:[#allocation2_spill] sm:$0xff] }
 0x210   :  { %8574 = vmatmul.mubr.msk.f32.gmra.mrb[22].mxu1 %vm15087_vm15, %v11939_v41  ;;  %vm15366_vm15 = vnez %v15365_v24  ;;  %v15369_v41 = vld [vmem:[#allocation3_spill] sm:$0xff] }
 0x211   :  { %8576 = vmatprep.mubr.f32.mxu1 %v11947_v18  ;;  %vm15091_vm14 = vmneg %vm15366_vm15  ;;  %v15371_v18 = vld [vmem:[#allocation4_spill] sm:$0xff] }
 0x214   :  { %8577 = vmatmul.mubr.f32.gmra.mrb[24].mxu1 %v11959_v25  ;;  %v15373_v25 = vld [vmem:[#allocation5_spill] sm:$0xff] }
 0x215   :  { %8579 = vmatprep.mubr.f32.mxu1 %v11967_v37 }
 0x218   :  { %8580 = vmatmul.mubr.msk.f32.gmra.mrb[26].mxu1 %vm15089_vm1, %v11975_v21  ;;  %vm15368_vm1 = vnez %v15367_v33 }
 0x219   :  { %8582 = vmatprep.mubr.f32.mxu1 %v11991_v55  ;;  %vm15093_vm13 = vmneg %vm15368_vm1 }
 0x21c   :  { %8583 = vmatmul.mubr.f32.gmra.mrb[28].mxu1 %v11999_v13 }
 0x21d   :  { %8585 = vmatprep.mubr.f32.mxu1 %v12011_v53 }
 0x220   :  { %8586 = vmatmul.mubr.msk.f32.gmra.mrb[30].mxu1 %vm15091_vm14, %v12019_v27  ;;  %vm15370_vm14 = vnez %v15369_v41 }
 0x221   :  { %8588 = vmatprep.mubr.f32.mxu1 %v12027_v5  ;;  %vm15095_vm2 = vmneg %vm15370_vm14  ;;  %v7106_v5 = vld [vmem:[%s15016_s3 + $0xd0] sm:$0xff] }
 0x224   :  { %8589 = vmatmul.mubr.f32.gmra.mrb[0].mxu1 %v12036_v38  ;;  %v7107_v38 = vld [vmem:[%s15016_s3 + $0xd8] sm:$0xff] }
 0x225   :  { %8591 = vmatprep.mubr.f32.mxu1 %v12044_v44  ;;  %v9677_v44 = vpack.c.bf16 %v7107_v38, %v7106_v5  ;;  %v12438_v5 = vpack.c.bf16 %v2923_v43, %v2922_v26  ;;  %v12440_v38 = vpack.c.bf16 %v2925_v51, %v2924_v36  ;;  %v12461_v43 = vpack.c.bf16 %v2931_v14, %v2930_v4  ;;  %v7130_v36 = vld [vmem:[%s15016_s3 + $0x110] sm:$0xff]  ;;  %v7133_v4 = vld [vmem:[%s15016_s3 + $0x128] sm:$0xff] }
 0x227   :  { %9678 = vmatprep.subr.bf16.mxu0 %v9677_v44 }
 0x228   :  { %8592 = vmatmul.mubr.msk.f32.gmra.mrb[2].mxu1 %vm15093_vm13, %v12052_v16  ;;  %vm15372_vm13 = vnez %v15371_v18  ;;  %v7108_v16 = vld [vmem:[%s15016_s3 + $0xe0] sm:$0xff]  ;;  %9680 = vmatpush3.bf16.msra.mxu0 %v9677_v44  ;;  %v2934_v44 = vld [vmem:[%s15016_s3 + $0x70] sm:$0xff] }
 0x229   :  { %8594 = vmatprep.mubr.f32.mxu1 %v12060_v15  ;;  %vm15098_vm1 = vmneg %vm15372_vm13  ;;  %v7109_v15 = vld [vmem:[%s15016_s3 + $0xe8] sm:$0xff] }
 0x22c   :  { %8595 = vmatmul.mubr.f32.gmra.mrb[4].mxu1 %v12074_v29  ;;  %v9681_v29 = vpack.c.bf16 %v7109_v15, %v7108_v16  ;;  %v2935_v16 = vld [vmem:[%s15016_s3 + $0x78] sm:$0xff] }
 0x22d   :  { %8597 = vmatprep.mubr.f32.mxu1 %v12082_v50 }
 0x22e   :  { %9682 = vmatprep.subr.bf16.mxu0 %v9681_v29 }
 0x22f   :  { %9684 = vmatpush3.bf16.msra.mxu0 %v9681_v29 }
 0x230   :  { %8598 = vmatmul.mubr.msk.f32.gmra.mrb[6].mxu1 %vm15095_vm2, %v12090_v49  ;;  %vm15374_vm2 = vnez %v15373_v25 }
 0x231   :  { %8600 = vmatprep.mubr.f32.mxu1 %v12098_v9  ;;  %vm15097_vm14 = vmneg %vm15374_vm2  ;;  %v7110_v9 = vld [vmem:[%s15016_s3 + $0xf0] sm:$0xff] }
 0x234   :  { %8601 = vmatmul.mubr.f32.gmra.mrb[8].mxu1 %v12105_v17  ;;  %v7111_v17 = vld [vmem:[%s15016_s3 + $0xf8] sm:$0xff] }
 0x235   :  { %8603 = vmatprep.mubr.f32.mxu1 %v12111_v61  ;;  %v9685_v61 = vpack.c.bf16 %v7111_v17, %v7110_v9  ;;  %v12449_v17 = vpack.c.bf16 %v2927_v12, %v2926_v2  ;;  %v12472_v2 = vpack.c.bf16 %v2935_v16, %v2934_v44 }
 0x237   :  { %9686 = vmatprep.subr.bf16.mxu0 %v9685_v61 }
 0x238   :  { %8604 = vmatmul.mubr.msk.f32.gmra.mrb[10].mxu1 %vm15098_vm1, %v12117_v7  ;;  %9688 = vmatpush3.bf16.msra.mxu0 %v9685_v61  ;;  %v12451_v61 = vpack.c.bf16 %v2929_v11, %v2928_v48  ;;  %v12475_v48 = vpack.c.bf16 %v7129_v52, %v7128_v3  ;;  %v7132_v11 = vld [vmem:[%s15016_s3 + $0x120] sm:$0xff] }
 0x239   :  { %8606 = vmatprep.mubr.f32.mxu1 %v12121_v59  ;;  %9690 = vmatprep.subr.bf16.mxu0 %v12387_v34 }
 0x23c   :  { %8607 = vmatmul.mubr.f32.gmra.mrb[12].mxu1 %v12127_v54 }
 0x23d   :  { %8609 = vmatprep.mubr.f32.mxu1 %v12131_v30 }
 0x240   :  { %8610 = vmatmul.mubr.msk.f32.gmra.mrb[14].mxu1 %vm15097_vm14, %v12137_v0 }
 0x24c   :  { %v8406_v37 = vpop.f32.mrb[32].mxu0 }
 0x24d   :  { %v1900_v21 = vpop.f32.mrb[33].mxu0 }
 0x250   :  { %v8409_v55 = vpop.f32.mrb[34].mxu0 }
 0x251   :  { %v12337_v13 = vpop.f32.mrb[35].mxu0 }
 0x254   :  { %v12339_v53 = vpop.f32.mrb[36].mxu0 }
 0x255   :  { %v12341_v27 = vpop.f32.mrb[37].mxu0 }
 0x258   :  { %v12355_v50 = vpop.f32.mrb[38].mxu0 }
 0x259   :  { %v12357_v49 = vpop.f32.mrb[39].mxu0 }
 0x25d   :  { %v12365_v7 = vpop.f32.mrb[40].mxu0 }
 0x25e   :  { %v12367_v59 = vpop.f32.mrb[41].mxu0 }
 0x261   :  { %v12369_v54 = vpop.f32.mrb[42].mxu0 }
 0x262   :  { %v12371_v30 = vpop.f32.mrb[43].mxu0 }
 0x265   :  { %v12373_v0 = vpop.f32.mrb[44].mxu0 }
 0x266   :  { %v12375_v10 = vpop.f32.mrb[45].mxu0 }
 0x269   :  { %v12377_v23 = vpop.f32.mrb[46].mxu0 }
 0x26a   :  { %v12379_v57 = vpop.f32.mrb[47].mxu0 }
 0x2d7   :  { %v8566_v35 = vpop.f32.mrb[16].mxu1 }
 0x2d8   :  { %v10170_v46 = vadd.f32 %v8566_v35, %v8406_v37  ;;  %v2367_v8 = vpop.f32.mrb[17].mxu1 }
 0x2d9   :  { %v10171_v6 = vadd.f32 %v2367_v8, %v1900_v21 }
 0x2da   :  { %v2564_v39 = vmul.f32 %v10170_v46, %v12393_v40  ;;  %v7131_v46 = vld [vmem:[%s15016_s3 + $0x118] sm:$0xff] }
 0x2db   :  { %v2563_v37 = vmul.f32 %v10171_v6, %v12393_v40  ;;  %v8569_v21 = vpop.f32.mrb[18].mxu1 }
 0x2dc   :  { %v2601_v15 = vadd.f32 %v12398_v60, %v2564_v39  ;;  %v10172_v29 = vadd.f32 %v8569_v21, %v8409_v55  ;;  %v2377_v9 = vpop.f32.mrb[19].mxu1  ;;  %v12463_v55 = vpack.c.bf16 %v2933_v56, %v2932_v62 }
 0x2dd   :  { %v2600_v35 = vadd.f32 %v12398_v60, %v2563_v37  ;;  %v10173_v26 = vadd.f32 %v2377_v9, %v12337_v13  ;;  %v12487_v37 = vpack.c.bf16 %v7131_v46, %v7130_v36 }
 0x2de   :  { %v2665_v8 = vmul.f32 0.01, %v2601_v15  ;;  %v2566_v51 = vmul.f32 %v10172_v29, %v12393_v40  ;;  %vm2633_vm14 = vcmp.gt.f32.partialorder %v2601_v15, 0.0 }
 0x2df   :  { %v2565_v13 = vmul.f32 %v10173_v26, %v12393_v40  ;;  %v8572_v12 = vpop.f32.mrb[20].mxu1  ;;  %vm2632_vm1 = vcmp.gt.f32.partialorder %v2600_v35, 0.0  ;;  %v2664_v6 = vmul.f32 0.01, %v2600_v35 }
 0x2e0   :  { %v2603_v39 = vadd.f32 %v12398_v60, %v2566_v51  ;;  %v10174_v14 = vadd.f32 %v8572_v12, %v12339_v53  ;;  %v2387_v62 = vpop.f32.mrb[21].mxu1  ;;  %v12485_v56 = vsel %vm2633_vm14, %v2601_v15, %v2665_v8  ;;  %v12497_v53 = vpack.c.bf16 %v7133_v4, %v7132_v11 }
 0x2e1   :  { %v2602_v21 = vadd.f32 %v12398_v60, %v2565_v13  ;;  %v10175_v44 = vadd.f32 %v2387_v62, %v12341_v27  ;;  %v12491_v16 = vsel %vm2632_vm1, %v2600_v35, %v2664_v6  ;;  %v2729_v29 = vrot.slane %v12485_v56, 7 }
 0x2e2   :  { %v2568_v9 = vmul.f32 %v10174_v14, %v12393_v40  ;;  %v15101_v3 = vrot.slane %v12491_v16, 7  ;;  %8644 = vmatprep.mubr.f32.mxu0 %v12491_v16  ;;  %vm2635_vm2 = vcmp.gt.f32.partialorder %v2603_v39, 0.0  ;;  %v2667_v35 = vmul.f32 0.01, %v2603_v39 }
 0x2e3   :  { %v2567_v15 = vmul.f32 %v10175_v44, %v12393_v40  ;;  %v8575_v52 = vpop.f32.mrb[22].mxu1  ;;  %8645 = vmatmul.mubr.f32.vlgmr.msra.gmra.mrb[48].mxu0 %v12485_v56  ;;  %vm2634_vm14 = vcmp.gt.f32.partialorder %v2602_v21, 0.0  ;;  %v2666_v27 = vmul.f32 0.01, %v2602_v21  ;;  %vm15375_vm1 = vcmp.lt.s32.totalorder %v10575_v22, 1 }
 0x2e4   :  { %v2605_v26 = vadd.f32 %v12398_v60, %v2568_v9  ;;  %v10176_v46 = vadd.f32 %v8575_v52, %v12355_v50  ;;  %v2397_v8 = vpop.f32.mrb[23].mxu1  ;;  %9692 = vmatpush3.bf16.msra.mxu0 %v12387_v34  ;;  %v12509_v51 = vsel %vm15375_vm1, %v15101_v3, %v2729_v29  ;;  %v12516_v11 = vsel %vm2635_vm2, %v2603_v39, %v2667_v35 }
 0x2e5   :  { %v2604_v13 = vadd.f32 %v12398_v60, %v2567_v15  ;;  %v10177_v12 = vadd.f32 %v2397_v8, %v12357_v49  ;;  %v12513_v6 = vsel %vm2634_vm14, %v2602_v21, %v2666_v27  ;;  %9694 = vmatprep.subr.bf16.mxu0 %v12438_v5  ;;  %v2731_v14 = vrot.slane %v12516_v11, 7 }
 0x2e6   :  { %v2570_v50 = vmul.f32 %v10176_v46, %v12393_v40  ;;  %v2730_v34 = vrot.slane %v12513_v6, 7  ;;  %8647 = vmatprep.mubr.f32.mxu0 %v12513_v6  ;;  %vm2637_vm14 = vcmp.gt.f32.partialorder %v2605_v26, 0.0  ;;  %v2669_v52 = vmul.f32 0.01, %v2605_v26 }
 0x2e7   :  { %v2569_v62 = vmul.f32 %v10177_v12, %v12393_v40  ;;  %v8578_v49 = vpop.f32.mrb[24].mxu1  ;;  %8648 = vmatmul.mubr.f32.gmra.mrb[50].mxu0 %v12516_v11  ;;  %vm2636_vm2 = vcmp.gt.f32.partialorder %v2604_v13, 0.0  ;;  %v2668_v39 = vmul.f32 0.01, %v2604_v13 }
 0x2e8   :  { %v2607_v44 = vadd.f32 %v12398_v60, %v2570_v50  ;;  %v10178_v9 = vadd.f32 %v8578_v49, %v12365_v7  ;;  %v2407_v15 = vpop.f32.mrb[25].mxu1  ;;  %9696 = vmatpush3.bf16.msra.mxu0 %v12438_v5  ;;  %v12537_v8 = vsel %vm15375_vm1, %v2729_v29, %v2730_v34  ;;  %v12543_v5 = vsel %vm2637_vm14, %v2605_v26, %v2669_v52  ;;  %vm15376_vm14 = vmmov %vm15375_vm1 }
 0x2e9   :  { %v2606_v27 = vadd.f32 %v12398_v60, %v2569_v62  ;;  %v10179_v35 = vadd.f32 %v2407_v15, %v12367_v59  ;;  %v12532_v46 = vsel %vm2636_vm2, %v2604_v13, %v2668_v39  ;;  %9698 = vmatprep.subr.bf16.mxu0 %v12440_v38  ;;  %v2733_v62 = vrot.slane %v12543_v5, 7 }
 0x2ea   :  { %v2572_v12 = vmul.f32 %v10178_v9, %v12393_v40  ;;  %v15103_v7 = vrot.slane %v12532_v46, 7  ;;  %8650 = vmatprep.mubr.f32.mxu0 %v12532_v46  ;;  %v12559_v36 = vsel %vm15376_vm14, %v2730_v34, %v2731_v14  ;;  %vm15377_vm13 = vcmp.gt.f32.partialorder %v2607_v44, 0.0 }
 0x2eb   :  { %v2571_v59 = vmul.f32 %v10179_v35, %v12393_v40  ;;  %v8581_v13 = vpop.f32.mrb[26].mxu1  ;;  %8651 = vmatmul.mubr.f32.gmra.mrb[52].mxu0 %v12543_v5  ;;  %vm2638_vm2 = vcmp.gt.f32.partialorder %v2606_v27, 0.0  ;;  %v2670_v15 = vmul.f32 0.01, %v2606_v27  ;;  %v2671_v35 = vmul.f32 0.01, %v2607_v44 }
 0x2ec   :  { %v2609_v29 = vadd.f32 %v12398_v60, %v2572_v12  ;;  %v10180_v39 = vadd.f32 %v8581_v13, %v12369_v54  ;;  %v2417_v9 = vpop.f32.mrb[27].mxu1  ;;  %9700 = vmatpush3.bf16.msra.mxu0 %v12440_v38 }
 0x2ed   :  { %v2608_v26 = vadd.f32 %v12398_v60, %v2571_v59  ;;  %v10181_v52 = vadd.f32 %v2417_v9, %v12371_v30  ;;  %9702 = vmatprep.subr.bf16.mxu0 %v12449_v17  ;;  %v12562_v12 = vsel %vm2638_vm2, %v2606_v27, %v2670_v15  ;;  %v12569_v49 = vsel %vm15377_vm13, %v2607_v44, %v2671_v35 }
 0x2ee   :  { %v2574_v54 = vmul.f32 %v10180_v39, %v12393_v40  ;;  %vm2641_vm1 = vcmp.gt.f32.partialorder %v2609_v29, 0.0  ;;  %v2673_v13 = vmul.f32 0.01, %v2609_v29  ;;  %8653 = vmatprep.mubr.f32.mxu0 %v12562_v12 }
 0x2ef   :  { %v2573_v38 = vmul.f32 %v10181_v52, %v12393_v40  ;;  %v8584_v9 = vpop.f32.mrb[28].mxu1  ;;  %8654 = vmatmul.mubr.f32.gmra.mrb[54].mxu0 %v12569_v49  ;;  %vm2640_vm2 = vcmp.gt.f32.partialorder %v2608_v26, 0.0  ;;  %v2672_v4 = vmul.f32 0.01, %v2608_v26 }
 0x2f0   :  { %v2611_v34 = vadd.f32 %v12398_v60, %v2574_v54  ;;  %v10182_v39 = vadd.f32 %v8584_v9, %v12373_v0  ;;  %v2427_v52 = vpop.f32.mrb[29].mxu1  ;;  %9704 = vmatpush3.bf16.msra.mxu0 %v12449_v17  ;;  %v12581_v35 = vsel %vm2641_vm1, %v2609_v29, %v2673_v13 }
 0x2f1   :  { %v2610_v50 = vadd.f32 %v12398_v60, %v2573_v38  ;;  %v10183_v30 = vadd.f32 %v2427_v52, %v12375_v10  ;;  %9706 = vmatprep.subr.bf16.mxu0 %v12451_v61  ;;  %v12585_v9 = vsel %vm2640_vm2, %v2608_v26, %v2672_v4  ;;  %v15389_v41 = vrot.slane %v12581_v35, 7 }
 0x2f2   :  { %v2576_v44 = vmul.f32 %v10182_v39, %v12393_v40  ;;  %vm2643_vm13 = vcmp.gt.f32.partialorder %v2611_v34, 0.0  ;;  %v2675_v0 = vmul.f32 0.01, %v2611_v34  ;;  %8656 = vmatprep.mubr.f32.mxu0 %v12585_v9  ;;  %v15386_v18 = vrot.slane %v12585_v9, 7 }
 0x2f3   :  { %v2575_v54 = vmul.f32 %v10183_v30, %v12393_v40  ;;  %v8587_v38 = vpop.f32.mrb[30].mxu1  ;;  %8657 = vmatmul.mubr.f32.gmra.mrb[56].mxu0 %v12581_v35  ;;  %vm2642_vm1 = vcmp.gt.f32.partialorder %v2610_v50, 0.0  ;;  %v2674_v26 = vmul.f32 0.01, %v2610_v50 }
 0x2f4   :  { %v2613_v17 = vadd.f32 %v12398_v60, %v2576_v44  ;;  %v10184_v13 = vadd.f32 %v8587_v38, %v12377_v23  ;;  %v2437_v15 = vpop.f32.mrb[31].mxu1  ;;  %v12599_v44 = vsel %vm2643_vm13, %v2611_v34, %v2675_v0  ;;  %9708 = vmatpush3.bf16.msra.mxu0 %v12451_v61 }
 0x2f5   :  { %v2612_v30 = vadd.f32 %v12398_v60, %v2575_v54  ;;  %v10185_v4 = vadd.f32 %v2437_v15, %v12379_v57  ;;  %v12603_v38 = vsel %vm2642_vm1, %v2610_v50, %v2674_v26  ;;  %9710 = vmatprep.subr.bf16.mxu0 %v12461_v43  ;;  %v15402_v19 = vrot.slane %v12599_v44, 7 }
 0x2f6   :  { %v2578_v52 = vmul.f32 %v10184_v13, %v12393_v40  ;;  %vm2645_vm14 = vcmp.gt.f32.partialorder %v2613_v17, 0.0  ;;  %v2677_v29 = vmul.f32 0.01, %v2613_v17  ;;  %8659 = vmatprep.mubr.f32.mxu0 %v12603_v38 }
 0x2f7   :  { %v2577_v23 = vmul.f32 %v10185_v4, %v12393_v40  ;;  %v8590_v54 = vpop.f32.mrb[0].mxu1  ;;  %8660 = vmatmul.mubr.f32.gmra.mrb[58].mxu0 %v12599_v44  ;;  %vm2644_vm2 = vcmp.gt.f32.partialorder %v2612_v30, 0.0  ;;  %v2676_v26 = vmul.f32 0.01, %v2612_v30 }
 0x2f8   :  { %v2615_v15 = vadd.f32 %v12398_v60, %v2578_v52  ;;  %v2580_v61 = vmul.f32 %v8590_v54, %v12393_v40  ;;  %v2447_v13 = vpop.f32.mrb[1].mxu1  ;;  %v12618_v52 = vsel %vm2645_vm14, %v2613_v17, %v2677_v29  ;;  %9712 = vmatpush3.bf16.msra.mxu0 %v12461_v43 }
 0x2f9   :  { %v2614_v50 = vadd.f32 %v12398_v60, %v2577_v23  ;;  %v2579_v4 = vmul.f32 %v12393_v40, %v2447_v13  ;;  %v12622_v3 = vsel %vm2644_vm2, %v2612_v30, %v2676_v26  ;;  %9714 = vmatprep.subr.bf16.mxu0 %v12463_v55 }
 0x2fa   :  { %v2617_v57 = vadd.f32 %v12398_v60, %v2580_v61  ;;  %vm2647_vm13 = vcmp.gt.f32.partialorder %v2615_v15, 0.0  ;;  %v2679_v0 = vmul.f32 0.01, %v2615_v15  ;;  %8662 = vmatprep.mubr.f32.mxu0 %v12622_v3 }
 0x2fb   :  { %v2616_v54 = vadd.f32 %v12398_v60, %v2579_v4  ;;  %v8593_v23 = vpop.f32.mrb[2].mxu1  ;;  %vm2646_vm1 = vcmp.gt.f32.partialorder %v2614_v50, 0.0  ;;  %8663 = vmatmul.mubr.f32.gmra.mrb[60].mxu0 %v12618_v52  ;;  %v2678_v4 = vmul.f32 0.01, %v2614_v50 }
 0x2fc   :  { %v2582_v29 = vmul.f32 %v8593_v23, %v12393_v40  ;;  %v2457_v43 = vpop.f32.mrb[3].mxu1  ;;  %v12634_v26 = vsel %vm2647_vm13, %v2615_v15, %v2679_v0  ;;  %9716 = vmatpush3.bf16.msra.mxu0 %v12463_v55  ;;  %vm2649_vm2 = vcmp.gt.f32.partialorder %v2617_v57, 0.0 }
 0x2fd   :  { %v2581_v30 = vmul.f32 %v12393_v40, %v2457_v43  ;;  %vm2648_vm14 = vcmp.gt.f32.partialorder %v2616_v54, 0.0  ;;  %v2680_v61 = vmul.f32 0.01, %v2616_v54  ;;  %v12641_v34 = vsel %vm2646_vm1, %v2614_v50, %v2678_v4  ;;  %9718 = vmatprep.subr.bf16.mxu0 %v12472_v2 }
 0x2fe   :  { %v2619_v13 = vadd.f32 %v12398_v60, %v2582_v29  ;;  %v2681_v43 = vmul.f32 0.01, %v2617_v57  ;;  %8665 = vmatprep.mubr.f32.mxu0 %v12641_v34 }
 0x2ff   :  { %v2618_v23 = vadd.f32 %v12398_v60, %v2581_v30  ;;  %v8596_v10 = vpop.f32.mrb[4].mxu1  ;;  %v12649_v55 = vsel %vm2648_vm14, %v2616_v54, %v2680_v61  ;;  %8666 = vmatmul.mubr.f32.gmra.mrb[62].mxu0 %v12634_v26 }
 0x300   :  { %v2584_v29 = vmul.f32 %v8596_v10, %v12393_v40  ;;  %v2467_v17 = vpop.f32.mrb[5].mxu1  ;;  %v12655_v21 = vsel %vm2649_vm2, %v2617_v57, %v2681_v43  ;;  %8668 = vmatprep.mubr.f32.mxu0 %v12649_v55  ;;  %9720 = vmatpush3.bf16.msra.mxu0 %v12472_v2  ;;  %vm2651_vm1 = vcmp.gt.f32.partialorder %v2619_v13, 0.0  ;;  %v2683_v30 = vmul.f32 0.01, %v2619_v13 }
 0x301   :  { %v2583_v50 = vmul.f32 %v12393_v40, %v2467_v17  ;;  %vm2650_vm13 = vcmp.gt.f32.partialorder %v2618_v23, 0.0  ;;  %v2682_v17 = vmul.f32 0.01, %v2618_v23  ;;  %9722 = vmatprep.subr.bf16.mxu0 %v12475_v48  ;;  %vm15378_vm2 = vcmp.lt.s32.totalorder %v10575_v22, 1 }
 0x302   :  { %v2621_v0 = vadd.f32 %v12398_v60, %v2584_v29  ;;  %v12671_v2 = vsel %vm15378_vm2, %v2731_v14, %v15103_v7  ;;  %v12677_v4 = vsel %vm2651_vm1, %v2619_v13, %v2683_v30 }
 0x303   :  { %v2620_v54 = vadd.f32 %v12398_v60, %v2583_v50  ;;  %v8599_v61 = vpop.f32.mrb[6].mxu1  ;;  %8669 = vmatmul.mubr.f32.gmra.mrb[64].mxu0 %v12655_v21  ;;  %v12675_v15 = vsel %vm2650_vm13, %v2618_v23, %v2682_v17 }
 0x304   :  { %v2586_v57 = vmul.f32 %v8599_v61, %v12393_v40  ;;  %v2477_v43 = vpop.f32.mrb[7].mxu1  ;;  %vm2653_vm14 = vcmp.gt.f32.partialorder %v2621_v0, 0.0  ;;  %v2685_v29 = vmul.f32 0.01, %v2621_v0  ;;  %8671 = vmatprep.mubr.f32.mxu0 %v12675_v15 }
 0x305   :  { %v2585_v50 = vmul.f32 %v12393_v40, %v2477_v43  ;;  %vm2652_vm15 = vcmp.gt.f32.partialorder %v2620_v54, 0.0  ;;  %v2684_v23 = vmul.f32 0.01, %v2620_v54 }
 0x306   :  { %v2623_v61 = vadd.f32 %v12398_v60, %v2586_v57  ;;  %v12687_v13 = vsel %vm2653_vm14, %v2621_v0, %v2685_v29  ;;  %vm15382_vm14 = vmmov %vm15378_vm2 }
 0x307   :  { %v2622_v27 = vadd.f32 %v12398_v60, %v2585_v50  ;;  %v8602_v59 = vpop.f32.mrb[8].mxu1  ;;  %8672 = vmatmul.mubr.f32.gmra.mrb[66].mxu0 %v12677_v4  ;;  %v12695_v50 = vsel %vm2652_vm15, %v2620_v54, %v2684_v23  ;;  %v15379_v54 = vrot.slane %v12532_v46, 7  ;;  %vm15380_vm15 = vmmov %vm15378_vm2 }
 0x308   :  { %v2588_v30 = vmul.f32 %v8602_v59, %v12393_v40  ;;  %v2487_v17 = vpop.f32.mrb[9].mxu1  ;;  %vm2655_vm13 = vcmp.gt.f32.partialorder %v2623_v61, 0.0  ;;  %8674 = vmatprep.mubr.f32.mxu0 %v12695_v50  ;;  %v2687_v57 = vmul.f32 0.01, %v2623_v61 }
 0x309   :  { %v2587_v14 = vmul.f32 %v12393_v40, %v2487_v17  ;;  %vm2654_vm1 = vcmp.gt.f32.partialorder %v2622_v27, 0.0  ;;  %v2686_v43 = vmul.f32 0.01, %v2622_v27  ;;  %v12710_v23 = vsel %vm15380_vm15, %v15379_v54, %v2733_v62 }
 0x30a   :  { %v2625_v0 = vadd.f32 %v12398_v60, %v2588_v30  ;;  %v15381_v30 = vrot.slane %v12562_v12, 7  ;;  %v12724_v29 = vsel %vm2655_vm13, %v2623_v61, %v2687_v57  ;;  %v15383_v57 = vrot.slane %v12569_v49, 7  ;;  %vm15385_vm13 = vmmov %vm15382_vm14 }
 0x30b   :  { %v2624_v39 = vadd.f32 %v12398_v60, %v2587_v14  ;;  %v8605_v10 = vpop.f32.mrb[10].mxu1  ;;  %v12702_v7 = vsel %vm2654_vm1, %v2622_v27, %v2686_v43  ;;  %8675 = vmatmul.mubr.f32.gmra.mrb[68].mxu0 %v12687_v13  ;;  %v15384_v43 = vrot.slane %v12562_v12, 7  ;;  %vm15388_vm15 = vmmov %vm15385_vm13 }
 0x30c   :  { %v12718_v17 = vsel %vm15382_vm14, %v2733_v62, %v15381_v30  ;;  %v2590_v14 = vmul.f32 %v8605_v10, %v12393_v40  ;;  %v2497_v27 = vpop.f32.mrb[11].mxu1  ;;  %8677 = vmatprep.mubr.f32.mxu0 %v12702_v7  ;;  %vm2657_vm1 = vcmp.gt.f32.partialorder %v2625_v0, 0.0  ;;  %v2689_v30 = vmul.f32 0.01, %v2625_v0  ;;  %vm15391_vm14 = vmmov %vm15385_vm13 }
 0x30d   :  { %v2589_v54 = vmul.f32 %v12393_v40, %v2497_v27  ;;  %vm2656_vm2 = vcmp.gt.f32.partialorder %v2624_v39, 0.0  ;;  %v2688_v10 = vmul.f32 0.01, %v2624_v39  ;;  %v12739_v27 = vsel %vm15385_vm13, %v15384_v43, %v15383_v57 }
 0x30e   :  { %v2627_v62 = vadd.f32 %v12398_v60, %v2590_v14  ;;  %v15387_v14 = vmov %v15383_v57  ;;  %v12760_v1 = vsel %vm2657_vm1, %v2625_v0, %v2689_v30  ;;  %vm15395_vm1 = vmmov %vm15391_vm14 }
 0x30f   :  { %v2626_v59 = vadd.f32 %v12398_v60, %v2589_v54  ;;  %v8608_v61 = vpop.f32.mrb[12].mxu1  ;;  %v12747_v25 = vsel %vm15388_vm15, %v15387_v14, %v15386_v18  ;;  %v15390_v54 = vmov %v15386_v18  ;;  %v12758_v57 = vsel %vm2656_vm2, %v2624_v39, %v2688_v10  ;;  %8678 = vmatmul.mubr.f32.gmra.mrb[70].mxu0 %v12724_v29  ;;  %vm15399_vm15 = vmmov %vm15395_vm1 }
 0x310   :  { %v12755_v33 = vsel %vm15391_vm14, %v15390_v54, %v15389_v41  ;;  %v2592_v24 = vmul.f32 %v8608_v61, %v12393_v40  ;;  %v2507_v43 = vpop.f32.mrb[13].mxu1  ;;  %vm2659_vm13 = vcmp.gt.f32.partialorder %v2627_v62, 0.0  ;;  %8680 = vmatprep.mubr.f32.mxu0 %v12758_v57  ;;  %v2691_v61 = vmul.f32 0.01, %v2627_v62 }
 0x311   :  { %15392 = vst [vmem:[#allocation16_spill] sm:$0xff] %v12755_v33  ;;  %v2591_v18 = vmul.f32 %v12393_v40, %v2507_v43  ;;  %vm2658_vm2 = vcmp.gt.f32.partialorder %v2626_v59, 0.0  ;;  %v2690_v0 = vmul.f32 0.01, %v2626_v59  ;;  %v15393_v54 = vrot.slane %v12603_v38, 7 }
 0x312   :  { %v2629_v41 = vadd.f32 %v12398_v60, %v2592_v24  ;;  %v15394_v43 = vrot.slane %v12581_v35, 7  ;;  %v15397_v24 = vrot.slane %v12599_v44, 7  ;;  %v12795_v63 = vsel %vm2659_vm13, %v2627_v62, %v2691_v61  ;;  %vm15403_vm13 = vmmov %vm15395_vm1 }
 0x313   :  { %v2628_v10 = vadd.f32 %v12398_v60, %v2591_v18  ;;  %v8611_v30 = vpop.f32.mrb[14].mxu1  ;;  %v15398_v20 = vmov %v15393_v54  ;;  %v12788_v45 = vsel %vm2658_vm2, %v2626_v59, %v2690_v0  ;;  %8681 = vmatmul.mubr.f32.gmra.mrb[72].mxu0 %v12760_v1  ;;  %v2755_v59 = vrot.slane %v12795_v63, 7 }
 0x314   :  { %v12777_v42 = vsel %vm15395_vm1, %v15394_v43, %v15393_v54  ;;  %v12785_v39 = vsel %vm15399_vm15, %v15398_v20, %v15397_v24  ;;  %v2594_v18 = vmul.f32 %v8611_v30, %v12393_v40  ;;  %v2517_v14 = vpop.f32.mrb[15].mxu1  ;;  %vm2661_vm14 = vcmp.gt.f32.partialorder %v2629_v41, 0.0  ;;  %8683 = vmatprep.mubr.f32.mxu0 %v12788_v45 }
 0x315   :  { %15396 = vst [vmem:[#allocation10_spill] sm:$0xff] %v12777_v42  ;;  %15400 = vst [vmem:[#allocation11_spill] sm:$0xff] %v12785_v39  ;;  %v2693_v28 = vmul.f32 0.01, %v2629_v41  ;;  %v2593_v54 = vmul.f32 %v12393_v40, %v2517_v14  ;;  %v2754_v43 = vrot.slane %v12788_v45, 7  ;;  %vm2660_vm2 = vcmp.gt.f32.partialorder %v2628_v10, 0.0 }
 0x316   :  { %v2631_v20 = vadd.f32 %v12398_v60, %v2594_v18  ;;  %v2692_v24 = vmul.f32 0.01, %v2628_v10  ;;  %v15401_v14 = vrot.slane %v12622_v3, 7  ;;  %v15413_v18 = vrot.slane %v12634_v26, 7 }
 0x317   :  { %v2630_v30 = vadd.f32 %v12398_v60, %v2593_v54  ;;  %v12802_v40 = vsel %vm2661_vm14, %v2629_v41, %v2693_v28  ;;  %8684 = vmatmul.mubr.f32.gmra.mrb[74].mxu0 %v12795_v63  ;;  %v15405_v41 = vrot.slane %v12618_v52, 7  ;;  %vm15407_vm14 = vmmov %vm15403_vm13 }
 0x318   :  { %v12810_v62 = vsel %vm15403_vm13, %v15402_v19, %v15401_v14  ;;  %v2757_v61 = vrot.slane %v12802_v40, 7  ;;  %vm2663_vm1 = vcmp.gt.f32.partialorder %v2631_v20, 0.0  ;;  %v2695_v0 = vmul.f32 0.01, %v2631_v20 }
 0x319   :  { %15404 = vst [vmem:[#allocation12_spill] sm:$0xff] %v12810_v62  ;;  %v12815_v60 = vsel %vm2660_vm2, %v2628_v10, %v2692_v24  ;;  %vm2662_vm15 = vcmp.gt.f32.partialorder %v2630_v30, 0.0  ;;  %v2694_v28 = vmul.f32 0.01, %v2630_v30  ;;  %v15406_v54 = vmov %v15401_v14  ;;  %vm15411_vm2 = vmmov %vm15403_vm13 }
 0x31a   :  { %v12823_v19 = vsel %vm15407_vm14, %v15406_v54, %v15405_v41  ;;  %v2756_v14 = vrot.slane %v12815_v60, 7  ;;  %8686 = vmatprep.mubr.f32.mxu0 %v12815_v60  ;;  %v12828_v31 = vsel %vm2663_vm1, %v2631_v20, %v2695_v0  ;;  %v15409_v10 = vrot.slane %v12641_v34, 7  ;;  %vm15415_vm13 = vmmov %vm15411_vm2 }
 0x31b   :  { %15408 = vst [vmem:[#allocation13_spill] sm:$0xff] %v12823_v19  ;;  %v15410_v24 = vmov %v15405_v41  ;;  %v12838_v39 = vsel %vm2662_vm15, %v2630_v30, %v2694_v28  ;;  %v2759_v41 = vrot.slane %v12828_v31, 7  ;;  %v15418_v30 = vmov %v15413_v18  ;;  %vm15419_vm1 = vmmov %vm15411_vm2  ;;  %8687 = vmatmul.mubr.f32.gmra.mrb[76].mxu0 %v12802_v40 }
 0x31c   :  { %v12836_v62 = vsel %vm15411_vm2, %v15410_v24, %v15409_v10  ;;  %v15414_v19 = vmov %v15409_v10  ;;  %v2758_v0 = vrot.slane %v12838_v39, 7  ;;  %v2854_v42 = vrot.slane %v12838_v39, 1  ;;  %vm15423_vm15 = vmmov %vm15419_vm1  ;;  %8689 = vmatprep.mubr.f32.mxu0 %v12838_v39 }
 0x31d   :  { %15412 = vst [vmem:[#allocation14_spill] sm:$0xff] %v12836_v62  ;;  %v12848_v20 = vsel %vm15415_vm13, %v15414_v19, %v15413_v18  ;;  %v15417_v10 = vrot.slane %v12649_v55, 7  ;;  %v15421_v24 = vrot.slane %v12655_v21, 7  ;;  %v15425_v19 = vrot.slane %v12491_v16, 7  ;;  %vm15426_vm14 = vmmov %vm15419_vm1 }
 0x31e   :  { %15416 = vst [vmem:[#allocation15_spill] sm:$0xff] %v12848_v20  ;;  %v15427_v62 = vrot.slane %v12675_v15, 7  ;;  %vm15429_vm2 = vmmov %vm15419_vm1 }
 0x31f   :  { %v12858_v28 = vsel %vm15419_vm1, %v15418_v30, %v15417_v10  ;;  %v15422_v54 = vmov %v15417_v10  ;;  %v2791_v20 = vsel %vm15426_vm14, %v2759_v41, %v15425_v19  ;;  %v15428_v10 = vmov %v15421_v24  ;;  %vm15433_vm13 = vmmov %vm15419_vm1  ;;  %8690 = vmatmul.mubr.f32.gmra.mrb[78].mxu0 %v12828_v31 }
 0x320   :  { %15420 = vst [vmem:[#allocation18_spill] sm:$0xff] %v12858_v28  ;;  %v12866_v18 = vsel %vm15423_vm15, %v15422_v54, %v15421_v24  ;;  %v12879_v30 = vsel %vm15429_vm2, %v15428_v10, %v15427_v62  ;;  %v15431_v28 = vrot.slane %v12677_v4, 7  ;;  %v15432_v54 = vmov %v15427_v62  ;;  %vm15440_vm15 = vmmov %vm15419_vm1 }
 0x321   :  { %15424 = vst [vmem:[#allocation19_spill] sm:$0xff] %v12866_v18  ;;  %15430 = vst [vmem:[#allocation35_spill] sm:$0xff] %v12879_v30  ;;  %v15435_v18 = vrot.slane %v12695_v50, 7  ;;  %v15438_v62 = vrot.slane %v12687_v13, 7 }
 0x322   :  { %v12887_v24 = vsel %vm15433_vm13, %v15432_v54, %v15431_v28  ;;  %v15436_v19 = vmov %v15431_v28  ;;  %v15442_v28 = vrot.slane %v12702_v7, 7  ;;  %vm15444_vm14 = vmmov %vm15419_vm1 }
 0x323   :  { %15434 = vst [vmem:[#allocation36_spill] sm:$0xff] %v12887_v24  ;;  %v12895_v33 = vsel %vm15419_vm1, %v15436_v19, %v15435_v18  ;;  %v15439_v10 = vmov %v15435_v18  ;;  %v15443_v54 = vmov %v15438_v62  ;;  %v15446_v18 = vrot.slane %v12724_v29, 7  ;;  %vm15448_vm2 = vmmov %vm15419_vm1 }
 0x324   :  { %15437 = vst [vmem:[#allocation37_spill] sm:$0xff] %v12895_v33  ;;  %v12904_v30 = vsel %vm15440_vm15, %v15439_v10, %v15438_v62  ;;  %v12912_v24 = vsel %vm15444_vm14, %v15443_v54, %v15442_v28  ;;  %v15447_v39 = vmov %v15442_v28  ;;  %v15449_v33 = vrot.slane %v12758_v57, 7  ;;  %vm15451_vm13 = vmmov %vm15419_vm1 }
 0x325   :  { %15441 = vst [vmem:[#allocation38_spill] sm:$0xff] %v12904_v30  ;;  %15445 = vst [vmem:[#allocation39_spill] sm:$0xff] %v12912_v24  ;;  %v12920_v19 = vsel %vm15448_vm2, %v15447_v39, %v15446_v18  ;;  %v15450_v62 = vmov %v15446_v18  ;;  %v15452_v30 = vrot.slane %v12760_v1, 7 }
 0x326   :  { %v12928_v10 = vsel %vm15451_vm13, %v15450_v62, %v15449_v33  ;;  %v15453_v28 = vmov %v15449_v33  ;;  %vm15455_vm15 = vmmov %vm15419_vm1 }
 0x327   :  { %v12936_v54 = vsel %vm15419_vm1, %v15453_v28, %v15452_v30  ;;  %v15454_v24 = vmov %v15452_v30  ;;  %vm15456_vm14 = vmmov %vm15419_vm1  ;;  %v12958_v30 = vsel %vm15419_vm1, %v2757_v61, %v2758_v0  ;;  %v2825_v28 = vrot.slane %v12485_v56, 1 }
 0x328   :  { %v12942_v18 = vsel %vm15455_vm15, %v15454_v24, %v2754_v43  ;;  %v12946_v39 = vsel %vm15456_vm14, %v2754_v43, %v2755_v59  ;;  %vm15457_vm2 = vmmov %vm15419_vm1  ;;  %15460 = vst [vmem:[#allocation6_spill] sm:$0xff] %v12958_v30  ;;  %v15463_v43 = vrot.slane %v12516_v11, 1  ;;  %vm15465_vm15 = vcmp.lt.s32.totalorder %v10575_v22, 7 }
 0x329   :  { %v12950_v33 = vsel %vm15457_vm2, %v2755_v59, %v2756_v14  ;;  %vm15458_vm13 = vmmov %vm15419_vm1  ;;  %v15464_v59 = vrot.slane %v12513_v6, 1  ;;  %v15469_v56 = vrot.slane %v12543_v5, 1  ;;  %v15472_v30 = vrot.slane %v12562_v12, 1 }
 0x32a   :  { %v12954_v62 = vsel %vm15458_vm13, %v2756_v14, %v2757_v61  ;;  %vm15461_vm0 = vmmov %vm15419_vm1  ;;  %v15467_v61 = vmov %v15463_v43  ;;  %v15476_v11 = vrot.slane %v12491_v16, 1  ;;  %v15480_v5 = vrot.slane %v12569_v49, 1 }
 0x32b   :  { %15459 = vst [vmem:[#allocation40_spill] sm:$0xff] %v12954_v62  ;;  %v12962_v24 = vsel %vm15461_vm0, %v2758_v0, %v2759_v41  ;;  %v12972_v14 = vsel %vm15465_vm15, %v15464_v59, %v15463_v43  ;;  %v15466_v62 = vrot.slane %v12532_v46, 1  ;;  %vm15468_vm14 = vmmov %vm15465_vm15  ;;  %v15473_v43 = vmov %v15469_v56 }
 0x32c   :  { %15462 = vst [vmem:[#allocation7_spill] sm:$0xff] %v12962_v24  ;;  %vm15471_vm0 = vmmov %vm15468_vm14  ;;  %v15487_v12 = vrot.slane %v12603_v38, 1  ;;  %v15490_v49 = vrot.slane %v12599_v44, 1  ;;  %v15499_v38 = vrot.slane %v12641_v34, 1  ;;  %v15502_v44 = vrot.slane %v12634_v26, 1 }
 0x32d   :  { %v12980_v41 = vsel %vm15468_vm14, %v15467_v61, %v15466_v62  ;;  %v15470_v0 = vmov %v15466_v62  ;;  %vm15474_vm2 = vmmov %vm15471_vm0  ;;  %v15478_v62 = vrot.slane %v12513_v6, 1  ;;  %v15485_v6 = vrot.slane %v12581_v35, 1 }
 0x32e   :  { %v12988_v24 = vsel %vm15471_vm0, %v15470_v0, %v15469_v56  ;;  %v12996_v59 = vsel %vm15474_vm2, %v15473_v43, %v15472_v30  ;;  %vm15475_vm13 = vmneg %vm10999_vm3  ;;  %v15483_v56 = vmov %v15480_v5  ;;  %v15496_v35 = vrot.slane %v12618_v52, 1 }
 0x32f   :  { %8724 = vmatprep.mubr.msk.f32.mxu0 %vm15475_vm13, %v2791_v20  ;;  %vm15477_vm1 = vmmov %vm15471_vm0  ;;  %v15482_v20 = vrot.slane %v12585_v9, 1  ;;  %v15493_v9 = vrot.slane %v12622_v3, 1  ;;  %v15505_v3 = vrot.slane %v12649_v55, 1  ;;  %v15507_v52 = vrot.slane %v12655_v21, 1 }
 0x330   :  { %v13005_v46 = vsel %vm15477_vm1, %v15476_v11, %v2825_v28  ;;  %vm15479_vm15 = vmmov %vm15471_vm0  ;;  %v15488_v11 = vmov %v15485_v6  ;;  %8725 = vmatmul.mubr.f32.vlgmr.msra.gmra.mrb[48].mxu0 %v12509_v51  ;;  %v15516_v55 = vrot.slane %v12695_v50, 1  ;;  %v15519_v21 = vrot.slane %v12687_v13, 1 }
 0x331   :  { %v13011_v61 = vsel %vm15479_vm15, %v2825_v28, %v15478_v62  ;;  %vm15481_vm14 = vmmov %vm15471_vm0  ;;  %v15486_v28 = vmov %v15482_v20  ;;  %8727 = vmatprep.mubr.f32.mxu0 %v12537_v8  ;;  %9724 = vmatpush3.bf16.msra.mxu0 %v12475_v48  ;;  %v15525_v8 = vrot.slane %v12724_v29, 1  ;;  %v15527_v50 = vrot.slane %v12758_v57, 1  ;;  %v7134_v57 = vld [vmem:[%s15016_s3 + $0x130] sm:$0xff] }
 0x332   :  { %v13019_v47 = vsel %vm15481_vm14, %v15472_v30, %v15480_v5  ;;  %vm15484_vm3 = vmmov %vm15471_vm0  ;;  %v13035_v43 = vsel %vm15471_vm0, %v15486_v28, %v15485_v6  ;;  %v15491_v5 = vmov %v15487_v12  ;;  %v15497_v6 = vmov %v15493_v9  ;;  %9726 = vmatprep.subr.bf16.mxu0 %v12487_v37 }
 0x333   :  { %v13027_v0 = vsel %vm15484_vm3, %v15483_v56, %v15482_v20  ;;  %vm15489_vm2 = vmmov %vm15471_vm0  ;;  %v15494_v20 = vmov %v15490_v49  ;;  %v15536_v29 = vrot.slane %v12795_v63, 1  ;;  %v15546_v63 = vrot.slane %v12828_v31, 1  ;;  %v7137_v31 = vld [vmem:[%s15016_s3 + $0x148] sm:$0xff] }
 0x334   :  { %v13043_v62 = vsel %vm15489_vm2, %v15488_v11, %v15487_v12  ;;  %vm15492_vm13 = vmmov %vm15471_vm0  ;;  %v15500_v12 = vmov %v15496_v35  ;;  %8728 = vmatmul.mubr.f32.gmra.mrb[50].mxu0 %v12559_v36  ;;  %v7139_v36 = vld [vmem:[%s15016_s3 + $0x158] sm:$0xff] }
 0x335   :  { %v13051_v30 = vsel %vm15492_vm13, %v15491_v5, %v15490_v49  ;;  %vm15495_vm1 = vmmov %vm15471_vm0  ;;  %v15503_v49 = vmov %v15499_v38  ;;  %9728 = vmatpush3.bf16.msra.mxu0 %v12487_v37  ;;  %v7138_v37 = vld [vmem:[%s15016_s3 + $0x150] sm:$0xff] }
 0x336   :  { %v13059_v56 = vsel %vm15495_vm1, %v15494_v20, %v15493_v9  ;;  %vm15498_vm15 = vmmov %vm15471_vm0  ;;  %v15506_v9 = vmov %v15502_v44  ;;  %9730 = vmatprep.subr.bf16.mxu0 %v12497_v53 }
 0x337   :  { %v13067_v28 = vsel %vm15498_vm15, %v15497_v6, %v15496_v35  ;;  %vm15501_vm14 = vmmov %vm15471_vm0  ;;  %v13091_v20 = vsel %vm15471_vm0, %v15506_v9, %v15505_v3  ;;  %v15508_v35 = vmov %v15505_v3  ;;  %v15510_v6 = vrot.slane %v12675_v15, 1 }
 0x338   :  { %v13075_v11 = vsel %vm15501_vm14, %v15500_v12, %v15499_v38  ;;  %vm15504_vm3 = vmmov %vm15471_vm0  ;;  %v15511_v38 = vmov %v15507_v52  ;;  %v15513_v12 = vrot.slane %v12677_v4, 1  ;;  %v15520_v15 = vmov %v15516_v55 }
 0x339   :  { %v13083_v5 = vsel %vm15504_vm3, %v15503_v49, %v15502_v44  ;;  %vm15509_vm2 = vmmov %vm15471_vm0  ;;  %v15514_v51 = vmov %v15510_v6  ;;  %v15523_v4 = vmov %v15519_v21  ;;  %9732 = vmatpush3.bf16.msra.mxu0 %v12497_v53  ;;  %v9741_v53 = vpack.c.bf16 %v7139_v36, %v7138_v37  ;;  %v15572_v37 = vld [vmem:[#allocation39_spill] sm:$0xff] }
 0x33a   :  { %v13100_v34 = vsel %vm15509_vm2, %v15508_v35, %v15507_v52  ;;  %vm15512_vm13 = vmmov %vm15471_vm0  ;;  %v15517_v49 = vmov %v15513_v12  ;;  %v15522_v52 = vrot.slane %v12702_v7, 1 }
 0x33b   :  { %v13108_v26 = vsel %vm15512_vm13, %v15511_v38, %v15510_v6  ;;  %vm15515_vm1 = vmmov %vm15471_vm0  ;;  %v15528_v38 = vmov %v15525_v8 }
 0x33c   :  { %v13116_v44 = vsel %vm15515_vm1, %v15514_v51, %v15513_v12  ;;  %vm15518_vm15 = vmmov %vm15471_vm0  ;;  %v15526_v48 = vmov %v15522_v52  ;;  %v15530_v12 = vrot.slane %v12760_v1, 1  ;;  %v15531_v51 = vmov %v15527_v50  ;;  %v7135_v1 = vld [vmem:[%s15016_s3 + $0x138] sm:$0xff] }
 0x33d   :  { %v13124_v3 = vsel %vm15518_vm15, %v15517_v49, %v15516_v55  ;;  %vm15521_vm14 = vmmov %vm15471_vm0  ;;  %v13150_v6 = vsel %vm15471_vm0, %v15526_v48, %v15525_v8  ;;  %v15533_v55 = vrot.slane %v12788_v45, 1  ;;  %v15540_v8 = vmov %v15536_v29 }
 0x33e   :  { %v13134_v9 = vsel %vm15521_vm14, %v15520_v15, %v15519_v21  ;;  %vm15524_vm3 = vmmov %vm15471_vm0  ;;  %v15534_v49 = vmov %v15530_v12  ;;  %v15542_v45 = vrot.slane %v12802_v40, 1  ;;  %v15554_v40 = vld [vmem:[#allocation10_spill] sm:$0xff] }
 0x33f   :  { %v13142_v35 = vsel %vm15524_vm3, %v15523_v4, %v15522_v52  ;;  %vm15529_vm2 = vmmov %vm15471_vm0  ;;  %v15537_v15 = vmov %v15533_v55  ;;  %v15539_v4 = vrot.slane %v12815_v60, 1  ;;  %v15548_v60 = vrot.slane %v12491_v16, 1  ;;  %v7136_v16 = vld [vmem:[%s15016_s3 + $0x140] sm:$0xff] }
 0x340   :  { %v13159_v13 = vsel %vm15529_vm2, %v15528_v38, %v15527_v50  ;;  %vm15532_vm13 = vmmov %vm15471_vm0  ;;  %v9737_v32 = vpack.c.bf16 %v7137_v31, %v7136_v16  ;;  %v15568_v16 = vld [vmem:[#allocation37_spill] sm:$0xff] }
 0x341   :  { %v13167_v7 = vsel %vm15532_vm13, %v15531_v51, %v15530_v12  ;;  %vm15535_vm1 = vmmov %vm15471_vm0  ;;  %v15543_v50 = vmov %v15539_v4  ;;  %v15545_v12 = vmov %v15542_v45 }
 0x342   :  { %v13175_v21 = vsel %vm15535_vm1, %v15534_v49, %v15533_v55  ;;  %vm15538_vm15 = vmmov %vm15471_vm0  ;;  %v13211_v51 = vsel %vm15471_vm0, %v15545_v12, %v2854_v42  ;;  %v15549_v49 = vmov %v15546_v63  ;;  %v15562_v12 = vld [vmem:[#allocation18_spill] sm:$0xff] }
 0x343   :  { %v13183_v52 = vsel %vm15538_vm15, %v15537_v15, %v15536_v29  ;;  %vm15541_vm14 = vmmov %vm15471_vm0  ;;  %v15555_v15 = vld [vmem:[#allocation11_spill] sm:$0xff] }
 0x344   :  { %v13197_v48 = vsel %vm15541_vm14, %v15540_v8, %v15539_v4  ;;  %vm15544_vm3 = vmmov %vm15471_vm0  ;;  %v15559_v8 = vld [vmem:[#allocation13_spill] sm:$0xff] }
 0x345   :  { %v13205_v38 = vsel %vm15544_vm3, %v15543_v50, %v15542_v45  ;;  %vm15547_vm2 = vmmov %vm15471_vm0  ;;  %v15560_v45 = vld [vmem:[#allocation14_spill] sm:$0xff]  ;;  %v15561_v50 = vld [vmem:[#allocation15_spill] sm:$0xff] }
 0x346   :  { %v13217_v55 = vsel %vm15547_vm2, %v2854_v42, %v15546_v63  ;;  %vm15550_vm13 = vmmov %vm15471_vm0  ;;  %v9733_v42 = vpack.c.bf16 %v7135_v1, %v7134_v57  ;;  %v15556_v57 = vld [vmem:[#allocation12_spill] sm:$0xff] }
 0x347   :  { %v13226_v29 = vsel %vm15550_vm13, %v15549_v49, %v15548_v60  ;;  %vm15551_vm1 = vmneg %vm11057_vm4  ;;  %v15565_v60 = vld [vmem:[#allocation19_spill] sm:$0xff] }
 0x348   :  { %8730 = vmatprep.mubr.msk.f32.mxu0 %vm15551_vm1, %v12671_v2  ;;  %9734 = vmatprep.subr.bf16.mxu0 %v9733_v42  ;;  %vm15552_vm4 = vmneg %vm11116_vm5  ;;  %v7140_v2 = vld [vmem:[%s15016_s3 + $0x160] sm:$0xff]  ;;  %v15566_v49 = vld [vmem:[#allocation35_spill] sm:$0xff] }
 0x349   :  { %8731 = vmatmul.mubr.f32.gmra.mrb[52].mxu0 %v12710_v23  ;;  %v7141_v23 = vld [vmem:[%s15016_s3 + $0x168] sm:$0xff]  ;;  %vm15558_vm5 = vmneg %vm11174_vm6 }
 0x34a   :  { %8733 = vmatprep.mubr.f32.mxu0 %v12718_v17  ;;  %9736 = vmatpush3.bf16.msra.mxu0 %v9733_v42  ;;  %v15553_v17 = vld [vmem:[#allocation16_spill] sm:$0xff]  ;;  %v9745_v58 = vpack.c.bf16 %v7141_v23, %v7140_v2  ;;  %vm15564_vm15 = vmneg %vm11204_vm7  ;;  %v15578_v23 = vld [vmem:[#allocation6_spill] sm:$0xff] }
 0x34b   :  { %9738 = vmatprep.subr.bf16.mxu0 %v9737_v32  ;;  %v15567_v42 = vld [vmem:[#allocation36_spill] sm:$0xff]  ;;  %vm15570_vm6 = vmneg %vm11227_vm8 }
 0x34c   :  { %vm15574_vm7 = vmneg %vm11250_vm9  ;;  %v15577_v2 = vld [vmem:[#allocation40_spill] sm:$0xff] }
 0x34d   :  { %8734 = vmatmul.mubr.f32.gmra.mrb[54].mxu0 %v12739_v27  ;;  %v7143_v27 = vld [vmem:[%s15016_s3 + $0x178] sm:$0xff]  ;;  %vm15576_vm8 = vmneg %vm11273_vm10 }
 0x34e   :  { %8736 = vmatprep.mubr.msk.f32.mxu0 %vm15552_vm4, %v12747_v25  ;;  %9740 = vmatpush3.bf16.msra.mxu0 %v9737_v32  ;;  %v7142_v25 = vld [vmem:[%s15016_s3 + $0x170] sm:$0xff]  ;;  %v15571_v32 = vld [vmem:[#allocation38_spill] sm:$0xff]  ;;  %vm15581_vm9 = vmneg %vm11304_vm11 }
 0x34f   :  { %9742 = vmatprep.subr.bf16.mxu0 %v9741_v53  ;;  %v9749_v4 = vpack.c.bf16 %v7143_v27, %v7142_v25  ;;  %vm15583_vm10 = vmneg %vm11325_vm12 }
 0x351   :  { %8737 = vmatmul.mubr.f32.gmra.mrb[56].mxu0 %v15553_v17 }
 0x352   :  { %8739 = vmatprep.mubr.f32.mxu0 %v15554_v40  ;;  %9744 = vmatpush3.bf16.msra.mxu0 %v9741_v53 }
 0x353   :  { %9746 = vmatprep.subr.bf16.mxu0 %v9745_v58 }
 0x355   :  { %8740 = vmatmul.mubr.f32.gmra.mrb[58].mxu0 %v15555_v15 }
 0x356   :  { %8742 = vmatprep.mubr.msk.f32.mxu0 %vm15558_vm5, %v15556_v57  ;;  %9748 = vmatpush3.bf16.msra.mxu0 %v9745_v58 }
 0x357   :  { %9750 = vmatprep.subr.bf16.mxu0 %v9749_v4 }
 0x359   :  { %8743 = vmatmul.mubr.f32.gmra.mrb[60].mxu0 %v15559_v8 }
 0x35a   :  { %8745 = vmatprep.mubr.f32.mxu0 %v15560_v45  ;;  %9752 = vmatpush3.bf16.msra.mxu0 %v9749_v4 }
 0x35d   :  { %8746 = vmatmul.mubr.f32.gmra.mrb[62].mxu0 %v15561_v50 }
 0x35e   :  { %8748 = vmatprep.mubr.msk.f32.mxu0 %vm15564_vm15, %v15562_v12 }
 0x361   :  { %8749 = vmatmul.mubr.f32.gmra.mrb[64].mxu0 %v15565_v60 }
 0x362   :  { %8751 = vmatprep.mubr.f32.mxu0 %v15566_v49 }
 0x365   :  { %8752 = vmatmul.mubr.f32.gmra.mrb[66].mxu0 %v15567_v42 }
 0x366   :  { %8754 = vmatprep.mubr.msk.f32.mxu0 %vm15570_vm6, %v15568_v16 }
 0x369   :  { %8755 = vmatmul.mubr.f32.gmra.mrb[68].mxu0 %v15571_v32 }
 0x36a   :  { %8757 = vmatprep.mubr.f32.mxu0 %v15572_v37 }
 0x36d   :  { %8758 = vmatmul.mubr.f32.gmra.mrb[70].mxu0 %v12920_v19  ;;  %v15579_v19 = vld [vmem:[#allocation7_spill] sm:$0xff] }
 0x36e   :  { %8760 = vmatprep.mubr.msk.f32.mxu0 %vm15574_vm7, %v12928_v10 }
 0x371   :  { %8761 = vmatmul.mubr.f32.gmra.mrb[72].mxu0 %v12936_v54 }
 0x372   :  { %8763 = vmatprep.mubr.f32.mxu0 %v12942_v18  ;;  %v15584_v18 = vld [vmem:[#allocation32_spill] sm:$0xff] }
 0x373   :  { %vm15585_vm11 = vnez %v15584_v18 }
 0x374   :  { %vm15586_vm14 = vmneg %vm15585_vm11 }
 0x375   :  { %8764 = vmatmul.mubr.f32.gmra.mrb[74].mxu0 %v12946_v39  ;;  %v15587_v39 = vld [vmem:[#allocation34_spill] sm:$0xff] }
 0x376   :  { %8766 = vmatprep.mubr.msk.f32.mxu0 %vm15576_vm8, %v12950_v33  ;;  %vm15588_vm12 = vnez %v15587_v39  ;;  %v15590_v33 = vld [vmem:[#allocation2_spill] sm:$0xff] }
 0x377   :  { %vm15589_vm3 = vmneg %vm15588_vm12  ;;  %vm15591_vm0 = vnez %v15590_v33 }
 0x378   :  { %vm15592_vm2 = vmneg %vm15591_vm0 }
 0x379   :  { %8767 = vmatmul.mubr.f32.gmra.mrb[76].mxu0 %v15577_v2 }
 0x37a   :  { %8769 = vmatprep.mubr.f32.mxu0 %v15578_v23 }
 0x37d   :  { %8770 = vmatmul.mubr.f32.gmra.mrb[78].mxu0 %v15579_v19 }
 0x37e   :  { %8804 = vmatprep.mubr.f32.mxu0 %v13005_v46  ;;  %v13366_v46 = vld [vmem:[%s15015_s14 + $0x4] ss:$0 sm:$0xff] }
 0x381   :  { %8805 = vmatmul.mubr.f32.vlgmr.msra.gmra.mrb[48].mxu0 %v13011_v61 }
 0x382   :  { %8807 = vmatprep.mubr.f32.mxu0 %v12972_v14  ;;  %v15596_v14 = vld [vmem:[#allocation4_spill] sm:$0xff] }
 0x383   :  { %vm15597_vm4 = vnez %v15596_v14 }
 0x384   :  { %vm15598_vm5 = vmneg %vm15597_vm4 }
 0x385   :  { %8808 = vmatmul.mubr.msk.f32.gmra.mrb[50].mxu0 %vm15581_vm9, %v12980_v41  ;;  %v15599_v41 = vld [vmem:[#allocation5_spill] sm:$0xff] }
 0x386   :  { %8810 = vmatprep.mubr.f32.mxu0 %v12988_v24  ;;  %v15593_v24 = vld [vmem:[#allocation3_spill] sm:$0xff]  ;;  %vm15600_vm15 = vnez %v15599_v41 }
 0x387   :  { %vm15594_vm13 = vnez %v15593_v24  ;;  %vm15601_vm6 = vmneg %vm15600_vm15 }
 0x388   :  { %vm15595_vm1 = vmneg %vm15594_vm13 }
 0x389   :  { %8811 = vmatmul.mubr.f32.gmra.mrb[52].mxu0 %v12996_v59  ;;  %v3848_v59 = vld [vmem:[%s15017_s6 + $0x8] sm:$0xff] }
 0x38a   :  { %8813 = vmatprep.mubr.f32.mxu0 %v13019_v47  ;;  %3943 = vmatprep.mubr.f32.mxu1 %v3848_v59  ;;  %v13371_v47 = vld [vmem:[%s15015_s14 + $0x5] ss:$0 sm:$0xff] }
 0x38d   :  { %8814 = vmatmul.mubr.msk.f32.gmra.mrb[54].mxu0 %vm15583_vm10, %v13027_v0 }
 0x38e   :  { %8816 = vmatprep.mubr.f32.mxu0 %v13035_v43 }
 0x391   :  { %8817 = vmatmul.mubr.f32.gmra.mrb[56].mxu0 %v13043_v62 }
 0x392   :  { %8819 = vmatprep.mubr.f32.mxu0 %v13051_v30 }
 0x395   :  { %8820 = vmatmul.mubr.msk.f32.gmra.mrb[58].mxu0 %vm15586_vm14, %v13059_v56 }
 0x396   :  { %8822 = vmatprep.mubr.f32.mxu0 %v13067_v28 }
 0x399   :  { %8823 = vmatmul.mubr.f32.gmra.mrb[60].mxu0 %v13075_v11 }
 0x39a   :  { %8825 = vmatprep.mubr.f32.mxu0 %v13083_v5 }
 0x39d   :  { %8826 = vmatmul.mubr.msk.f32.gmra.mrb[62].mxu0 %vm15589_vm3, %v13091_v20 }
 0x39e   :  { %8828 = vmatprep.mubr.f32.mxu0 %v13100_v34 }
 0x3a1   :  { %8829 = vmatmul.mubr.f32.gmra.mrb[64].mxu0 %v13108_v26 }
 0x3a2   :  { %8831 = vmatprep.mubr.f32.mxu0 %v13116_v44 }
 0x3a5   :  { %8832 = vmatmul.mubr.msk.f32.gmra.mrb[66].mxu0 %vm15592_vm2, %v13124_v3 }
 0x3a6   :  { %8834 = vmatprep.mubr.f32.mxu0 %v13134_v9 }
 0x3a9   :  { %8835 = vmatmul.mubr.f32.gmra.mrb[68].mxu0 %v13142_v35 }
 0x3aa   :  { %8837 = vmatprep.mubr.f32.mxu0 %v13150_v6 }
 0x3ad   :  { %8838 = vmatmul.mubr.msk.f32.gmra.mrb[70].mxu0 %vm15595_vm1, %v13159_v13 }
 0x3ae   :  { %8840 = vmatprep.mubr.f32.mxu0 %v13167_v7 }
 0x3b1   :  { %8841 = vmatmul.mubr.f32.gmra.mrb[72].mxu0 %v13175_v21 }
 0x3b2   :  { %8843 = vmatprep.mubr.f32.mxu0 %v13183_v52 }
 0x3b5   :  { %8844 = vmatmul.mubr.msk.f32.gmra.mrb[74].mxu0 %vm15598_vm5, %v13197_v48 }
 0x3b6   :  { %8846 = vmatprep.mubr.f32.mxu0 %v13205_v38 }
 0x3b9   :  { %8847 = vmatmul.mubr.f32.gmra.mrb[76].mxu0 %v13211_v51 }
 0x3ba   :  { %8849 = vmatprep.mubr.f32.mxu0 %v13217_v55 }
 0x3bd   :  { %8850 = vmatmul.mubr.msk.f32.gmra.mrb[78].mxu0 %vm15601_vm6, %v13226_v29 }
 0x454   :  { %v8806_v61 = vpop.f32.mrb[48].mxu0 }
 0x455   :  { %v3683_v0 = vmul.f32 %v8806_v61, %v13366_v46  ;;  %v3486_v43 = vpop.f32.mrb[49].mxu0 }
 0x456   :  { %v3682_v62 = vmul.f32 %v13366_v46, %v3486_v43 }
 0x457   :  { %v3720_v30 = vadd.f32 %v13371_v47, %v3683_v0 }
 0x458   :  { %v3719_v56 = vadd.f32 %v13371_v47, %v3682_v62  ;;  %v8809_v28 = vpop.f32.mrb[50].mxu0 }
 0x459   :  { %vm3752_vm7 = vcmp.gt.f32.partialorder %v3720_v30, 0.0  ;;  %v3784_v11 = vmul.f32 0.01, %v3720_v30  ;;  %v3685_v5 = vmul.f32 %v8809_v28, %v13366_v46  ;;  %v3496_v20 = vpop.f32.mrb[51].mxu0 }
 0x45a   :  { %vm3751_vm8 = vcmp.gt.f32.partialorder %v3719_v56, 0.0  ;;  %v3783_v34 = vmul.f32 0.01, %v3719_v56  ;;  %v3684_v26 = vmul.f32 %v13366_v46, %v3496_v20 }
 0x45b   :  { %v13379_v44 = vsel %vm3752_vm7, %v3720_v30, %v3784_v11  ;;  %v3722_v3 = vadd.f32 %v13371_v47, %v3685_v5 }
 0x45c   :  { %v13382_v9 = vsel %vm3751_vm8, %v3719_v56, %v3783_v34  ;;  %v3721_v35 = vadd.f32 %v13371_v47, %v3684_v26  ;;  %v8812_v6 = vpop.f32.mrb[52].mxu0 }
 0x45d   :  { %vm3754_vm9 = vcmp.gt.f32.partialorder %v3722_v3, 0.0  ;;  %v3786_v13 = vmul.f32 0.01, %v3722_v3  ;;  %v3687_v7 = vmul.f32 %v8812_v6, %v13366_v46  ;;  %v3506_v21 = vpop.f32.mrb[53].mxu0  ;;  %v9755_v52 = vpack.c.bf16 %v13379_v44, %v13382_v9 }
 0x45e   :  { %vm3753_vm10 = vcmp.gt.f32.partialorder %v3721_v35, 0.0  ;;  %v3785_v48 = vmul.f32 0.01, %v3721_v35  ;;  %v3686_v38 = vmul.f32 %v13366_v46, %v3506_v21 }
 0x45f   :  { %v13389_v51 = vsel %vm3754_vm9, %v3722_v3, %v3786_v13  ;;  %v3724_v55 = vadd.f32 %v13371_v47, %v3687_v7 }
 0x460   :  { %v13392_v29 = vsel %vm3753_vm10, %v3721_v35, %v3785_v48  ;;  %v3723_v17 = vadd.f32 %v13371_v47, %v3686_v38  ;;  %v8815_v40 = vpop.f32.mrb[54].mxu0 }
 0x461   :  { %vm3756_vm11 = vcmp.gt.f32.partialorder %v3724_v55, 0.0  ;;  %v3788_v58 = vmul.f32 0.01, %v3724_v55  ;;  %v3689_v25 = vmul.f32 %v8815_v40, %v13366_v46  ;;  %v3516_v27 = vpop.f32.mrb[55].mxu0  ;;  %v9759_v15 = vpack.c.bf16 %v13389_v51, %v13392_v29 }
 0x462   :  { %vm3755_vm14 = vcmp.gt.f32.partialorder %v3723_v17, 0.0  ;;  %v3787_v57 = vmul.f32 0.01, %v3723_v17  ;;  %v3688_v1 = vmul.f32 %v13366_v46, %v3516_v27 }
 0x463   :  { %v13399_v4 = vsel %vm3756_vm11, %v3724_v55, %v3788_v58  ;;  %v3726_v8 = vadd.f32 %v13371_v47, %v3689_v25 }
 0x464   :  { %v13402_v45 = vsel %vm3755_vm14, %v3723_v17, %v3787_v57  ;;  %v3725_v50 = vadd.f32 %v13371_v47, %v3688_v1  ;;  %v8818_v12 = vpop.f32.mrb[56].mxu0 }
 0x465   :  { %vm3758_vm12 = vcmp.gt.f32.partialorder %v3726_v8, 0.0  ;;  %v3790_v63 = vmul.f32 0.01, %v3726_v8  ;;  %v3691_v60 = vmul.f32 %v8818_v12, %v13366_v46  ;;  %v3526_v49 = vpop.f32.mrb[57].mxu0  ;;  %v9763_v42 = vpack.c.bf16 %v13399_v4, %v13402_v45 }
 0x466   :  { %vm3757_vm3 = vcmp.gt.f32.partialorder %v3725_v50, 0.0  ;;  %v3789_v16 = vmul.f32 0.01, %v3725_v50  ;;  %v3690_v31 = vmul.f32 %v13366_v46, %v3526_v49 }
 0x467   :  { %v13409_v32 = vsel %vm3758_vm12, %v3726_v8, %v3790_v63  ;;  %v3728_v37 = vadd.f32 %v13371_v47, %v3691_v60 }
 0x468   :  { %v13412_v36 = vsel %vm3757_vm3, %v3725_v50, %v3789_v16  ;;  %v3727_v53 = vadd.f32 %v13371_v47, %v3690_v31  ;;  %v8821_v2 = vpop.f32.mrb[58].mxu0 }
 0x469   :  { %vm3760_vm0 = vcmp.gt.f32.partialorder %v3728_v37, 0.0  ;;  %v3792_v23 = vmul.f32 0.01, %v3728_v37  ;;  %v3693_v19 = vmul.f32 %v8821_v2, %v13366_v46  ;;  %v3536_v10 = vpop.f32.mrb[59].mxu0  ;;  %v9767_v54 = vpack.c.bf16 %v13409_v32, %v13412_v36 }
 0x46a   :  { %vm3759_vm2 = vcmp.gt.f32.partialorder %v3727_v53, 0.0  ;;  %v3791_v18 = vmul.f32 0.01, %v3727_v53  ;;  %v3692_v39 = vmul.f32 %v13366_v46, %v3536_v10 }
 0x46b   :  { %v13419_v33 = vsel %vm3760_vm0, %v3728_v37, %v3792_v23  ;;  %v3730_v24 = vadd.f32 %v13371_v47, %v3693_v19 }
 0x46c   :  { %v13422_v14 = vsel %vm3759_vm2, %v3727_v53, %v3791_v18  ;;  %v3729_v41 = vadd.f32 %v13371_v47, %v3692_v39  ;;  %v8824_v59 = vpop.f32.mrb[60].mxu0 }
 0x46d   :  { %vm3762_vm13 = vcmp.gt.f32.partialorder %v3730_v24, 0.0  ;;  %v3794_v61 = vmul.f32 0.01, %v3730_v24  ;;  %v3695_v0 = vmul.f32 %v8824_v59, %v13366_v46  ;;  %v3546_v43 = vpop.f32.mrb[61].mxu0  ;;  %v9771_v62 = vpack.c.bf16 %v13419_v33, %v13422_v14 }
 0x46e   :  { %vm3761_vm1 = vcmp.gt.f32.partialorder %v3729_v41, 0.0  ;;  %v3793_v30 = vmul.f32 0.01, %v3729_v41  ;;  %v3694_v56 = vmul.f32 %v13366_v46, %v3546_v43 }
 0x46f   :  { %v13429_v28 = vsel %vm3762_vm13, %v3730_v24, %v3794_v61  ;;  %v3732_v11 = vadd.f32 %v13371_v47, %v3695_v0 }
 0x470   :  { %v13432_v5 = vsel %vm3761_vm1, %v3729_v41, %v3793_v30  ;;  %v3731_v20 = vadd.f32 %v13371_v47, %v3694_v56  ;;  %v8827_v34 = vpop.f32.mrb[62].mxu0 }
 0x471   :  { %vm3764_vm4 = vcmp.gt.f32.partialorder %v3732_v11, 0.0  ;;  %v3796_v26 = vmul.f32 0.01, %v3732_v11  ;;  %v3697_v3 = vmul.f32 %v8827_v34, %v13366_v46  ;;  %v3556_v35 = vpop.f32.mrb[63].mxu0  ;;  %v9775_v6 = vpack.c.bf16 %v13429_v28, %v13432_v5 }
 0x472   :  { %vm3763_vm5 = vcmp.gt.f32.partialorder %v3731_v20, 0.0  ;;  %v3795_v13 = vmul.f32 0.01, %v3731_v20  ;;  %v3696_v7 = vmul.f32 %v13366_v46, %v3556_v35 }
 0x473   :  { %v13439_v21 = vsel %vm3764_vm4, %v3732_v11, %v3796_v26  ;;  %v3734_v48 = vadd.f32 %v13371_v47, %v3697_v3 }
 0x474   :  { %v13442_v38 = vsel %vm3763_vm5, %v3731_v20, %v3795_v13  ;;  %v3733_v55 = vadd.f32 %v13371_v47, %v3696_v7  ;;  %v8830_v17 = vpop.f32.mrb[64].mxu0 }
 0x475   :  { %vm3766_vm15 = vcmp.gt.f32.partialorder %v3734_v48, 0.0  ;;  %v3798_v40 = vmul.f32 0.01, %v3734_v48  ;;  %v3699_v58 = vmul.f32 %v8830_v17, %v13366_v46  ;;  %v3566_v25 = vpop.f32.mrb[65].mxu0  ;;  %v9779_v27 = vpack.c.bf16 %v13439_v21, %v13442_v38  ;;  %v3847_v21 = vld [vmem:[%s15017_s6] sm:$0xff]  ;;  %v3850_v38 = vld [vmem:[%s15017_s6 + $0x18] sm:$0xff] }
 0x476   :  { %vm3765_vm6 = vcmp.gt.f32.partialorder %v3733_v55, 0.0  ;;  %v3797_v57 = vmul.f32 0.01, %v3733_v55  ;;  %v3698_v1 = vmul.f32 %v13366_v46, %v3566_v25 }
 0x477   :  { %v13449_v8 = vsel %vm3766_vm15, %v3734_v48, %v3798_v40  ;;  %v3736_v50 = vadd.f32 %v13371_v47, %v3699_v58 }
 0x478   :  { %v13452_v12 = vsel %vm3765_vm6, %v3733_v55, %v3797_v57  ;;  %v3735_v63 = vadd.f32 %v13371_v47, %v3698_v1  ;;  %v8833_v60 = vpop.f32.mrb[66].mxu0 }
 0x479   :  { %vm3768_vm7 = vcmp.gt.f32.partialorder %v3736_v50, 0.0  ;;  %v3800_v49 = vmul.f32 0.01, %v3736_v50  ;;  %v3701_v16 = vmul.f32 %v8833_v60, %v13366_v46  ;;  %v3576_v31 = vpop.f32.mrb[67].mxu0  ;;  %v9783_v37 = vpack.c.bf16 %v13449_v8, %v13452_v12  ;;  %v3849_v8 = vld [vmem:[%s15017_s6 + $0x10] sm:$0xff]  ;;  %v3852_v12 = vld [vmem:[%s15017_s6 + $0x28] sm:$0xff] }
 0x47a   :  { %vm3767_vm8 = vcmp.gt.f32.partialorder %v3735_v63, 0.0  ;;  %v3799_v53 = vmul.f32 0.01, %v3735_v63  ;;  %v3700_v2 = vmul.f32 %v13366_v46, %v3576_v31 }
 0x47b   :  { %v3738_v23 = vadd.f32 %v13371_v47, %v3701_v16  ;;  %v3832_v19 = vsel %vm3768_vm7, %v3736_v50, %v3800_v49  ;;  %vm15119_vm7 = vcmask 523264  }
 0x47c   :  { %v3737_v10 = vadd.f32 %v13371_v47, %v3700_v2  ;;  %v8836_v18 = vpop.f32.mrb[68].mxu0  ;;  %v3831_v39 = vsel %vm3767_vm8, %v3735_v63, %v3799_v53  ;;  %vm15602_vm8 = vcmp.lt.s32.totalorder %v10575_v22, 1 }
 0x47d   :  { %vm3770_vm9 = vcmp.gt.f32.partialorder %v3738_v23, 0.0  ;;  %v3802_v24 = vmul.f32 0.01, %v3738_v23  ;;  %v3703_v41 = vmul.f32 %v8836_v18, %v13366_v46  ;;  %v3586_v59 = vpop.f32.mrb[69].mxu0  ;;  %v9753_v61 = vpack.c.bf16 %v3832_v19, %v3831_v39 }
 0x47e   :  { %vm3769_vm10 = vcmp.gt.f32.partialorder %v3737_v10, 0.0  ;;  %v3801_v0 = vmul.f32 0.01, %v3737_v10  ;;  %v3702_v43 = vmul.f32 %v13366_v46, %v3586_v59 }
 0x47f   :  { %v3740_v30 = vadd.f32 %v13371_v47, %v3703_v41  ;;  %9754 = vmatprep.subr.bf16.mxu1 %v9753_v61  ;;  %v3834_v56 = vsel %vm3770_vm9, %v3738_v23, %v3802_v24  ;;  %vm15603_vm9 = vcmp.lt.s32.totalorder %v10575_v22, 7 }
 0x480   :  { %v3739_v11 = vadd.f32 %v13371_v47, %v3702_v43  ;;  %v8839_v20 = vpop.f32.mrb[70].mxu0  ;;  %9756 = vmatpush3.bf16.msra.mxu1 %v9755_v52  ;;  %v3833_v34 = vsel %vm3769_vm10, %v3737_v10, %v3801_v0  ;;  %vm15604_vm10 = vmmov %vm15603_vm9 }
 0x481   :  { %vm3772_vm11 = vcmp.gt.f32.partialorder %v3740_v30, 0.0  ;;  %v3804_v26 = vmul.f32 0.01, %v3740_v30  ;;  %v3705_v3 = vmul.f32 %v8839_v20, %v13366_v46  ;;  %v3596_v35 = vpop.f32.mrb[71].mxu0  ;;  %v9757_v13 = vpack.c.bf16 %v3834_v56, %v3833_v34 }
 0x482   :  { %vm3771_vm14 = vcmp.gt.f32.partialorder %v3739_v11, 0.0  ;;  %v3803_v7 = vmul.f32 0.01, %v3739_v11  ;;  %v3704_v48 = vmul.f32 %v13366_v46, %v3596_v35 }
 0x483   :  { %v3742_v55 = vadd.f32 %v13371_v47, %v3705_v3  ;;  %9758 = vmatprep.subr.bf16.mxu1 %v9757_v13  ;;  %v3836_v17 = vsel %vm3772_vm11, %v3740_v30, %v3804_v26  ;;  %vm15605_vm11 = vmmov %vm15602_vm8 }
 0x484   :  { %v3741_v40 = vadd.f32 %v13371_v47, %v3704_v48  ;;  %v8842_v58 = vpop.f32.mrb[72].mxu0  ;;  %9760 = vmatpush3.bf16.msra.mxu1 %v9759_v15  ;;  %v3835_v44 = vsel %vm3771_vm14, %v3739_v11, %v3803_v7  ;;  %v4025_v48 = vld [vmem:[%s15018_s7 + $0x8] sm:$0xff]  ;;  %vm15606_vm14 = vmmov %vm15602_vm8 }
 0x485   :  { %vm3774_vm12 = vcmp.gt.f32.partialorder %v3742_v55, 0.0  ;;  %v3806_v9 = vmul.f32 0.01, %v3742_v55  ;;  %v3707_v52 = vmul.f32 %v8842_v58, %v13366_v46  ;;  %v3606_v25 = vpop.f32.mrb[73].mxu0  ;;  %v9761_v57 = vpack.c.bf16 %v3836_v17, %v3835_v44  ;;  %v4027_v17 = vld [vmem:[%s15018_s7 + $0x18] sm:$0xff]  ;;  %v4029_v58 = vld [vmem:[%s15018_s7 + $0x28] sm:$0xff] }
 0x486   :  { %vm3773_vm3 = vcmp.gt.f32.partialorder %v3741_v40, 0.0  ;;  %v3805_v1 = vmul.f32 0.01, %v3741_v40  ;;  %v3706_v50 = vmul.f32 %v13366_v46, %v3606_v25  ;;  %v4030_v44 = vld [vmem:[%s15018_s7 + $0x30] sm:$0xff]  ;;  %v3854_v25 = vld [vmem:[%s15017_s6 + $0x38] sm:$0xff] }
 0x487   :  { %v3744_v63 = vadd.f32 %v13371_v47, %v3707_v52  ;;  %9762 = vmatprep.subr.bf16.mxu1 %v9761_v57  ;;  %v3838_v60 = vsel %vm3774_vm12, %v3742_v55, %v3806_v9  ;;  %v4026_v55 = vld [vmem:[%s15018_s7 + $0x10] sm:$0xff]  ;;  %v4031_v9 = vld [vmem:[%s15018_s7 + $0x38] sm:$0xff]  ;;  %v3851_v52 = vld [vmem:[%s15017_s6 + $0x20] sm:$0xff] }
 0x488   :  { %v3743_v49 = vadd.f32 %v13371_v47, %v3706_v50  ;;  %v8845_v16 = vpop.f32.mrb[74].mxu0  ;;  %9764 = vmatpush3.bf16.msra.mxu1 %v9763_v42  ;;  %v3837_v51 = vsel %vm3773_vm3, %v3741_v40, %v3805_v1  ;;  %v4028_v40 = vld [vmem:[%s15018_s7 + $0x20] sm:$0xff]  ;;  %v9797_v57 = vpack.c.bf16 %v4031_v9, %v4030_v44  ;;  %v4033_v50 = vld [vmem:[%s15018_s7 + $0x48] sm:$0xff]  ;;  %vm15607_vm12 = vmmov %vm15603_vm9 }
 0x489   :  { %vm3776_vm0 = vcmp.gt.f32.partialorder %v3744_v63, 0.0  ;;  %v3808_v29 = vmul.f32 0.01, %v3744_v63  ;;  %v3709_v15 = vmul.f32 %v8845_v16, %v13366_v46  ;;  %v3616_v31 = vpop.f32.mrb[75].mxu0  ;;  %v9765_v53 = vpack.c.bf16 %v3838_v60, %v3837_v51  ;;  %v4032_v1 = vld [vmem:[%s15018_s7 + $0x40] sm:$0xff]  ;;  %v3856_v60 = vld [vmem:[%s15017_s6 + $0x48] sm:$0xff]  ;;  %vm15608_vm3 = vmmov %vm15602_vm8 }
 0x48a   :  { %vm3775_vm2 = vcmp.gt.f32.partialorder %v3743_v49, 0.0  ;;  %v3807_v2 = vmul.f32 0.01, %v3743_v49  ;;  %v3708_v23 = vmul.f32 %v13366_v46, %v3616_v31  ;;  %v4034_v16 = vld [vmem:[%s15018_s7 + $0x50] sm:$0xff]  ;;  %v4035_v51 = vld [vmem:[%s15018_s7 + $0x58] sm:$0xff] }
 0x48b   :  { %v3746_v19 = vadd.f32 %v13371_v47, %v3709_v15  ;;  %9766 = vmatprep.subr.bf16.mxu1 %v9765_v53  ;;  %v3840_v10 = vsel %vm3776_vm0, %v3744_v63, %v3808_v29  ;;  %v3853_v63 = vld [vmem:[%s15017_s6 + $0x30] sm:$0xff]  ;;  %v3855_v29 = vld [vmem:[%s15017_s6 + $0x40] sm:$0xff]  ;;  %v3858_v15 = vld [vmem:[%s15017_s6 + $0x58] sm:$0xff]  ;;  %v9805_v31 = vpack.c.bf16 %v4035_v51, %v4034_v16 }
 0x48c   :  { %v3745_v18 = vadd.f32 %v13371_v47, %v3708_v23  ;;  %v8848_v39 = vpop.f32.mrb[76].mxu0  ;;  %9768 = vmatpush3.bf16.msra.mxu1 %v9767_v54  ;;  %v3839_v4 = vsel %vm3775_vm2, %v3743_v49, %v3807_v2  ;;  %v9801_v49 = vpack.c.bf16 %v4033_v50, %v4032_v1  ;;  %v4036_v53 = vld [vmem:[%s15018_s7 + $0x60] sm:$0xff]  ;;  %v4037_v2 = vld [vmem:[%s15018_s7 + $0x68] sm:$0xff]  ;;  %v3857_v23 = vld [vmem:[%s15017_s6 + $0x50] sm:$0xff] }
 0x48d   :  { %vm3778_vm13 = vcmp.gt.f32.partialorder %v3746_v19, 0.0  ;;  %v3810_v45 = vmul.f32 0.01, %v3746_v19  ;;  %v3711_v42 = vmul.f32 %v8848_v39, %v13366_v46  ;;  %v3626_v24 = vpop.f32.mrb[77].mxu0  ;;  %v9769_v41 = vpack.c.bf16 %v3840_v10, %v3839_v4  ;;  %v3862_v39 = vld [vmem:[%s15017_s6 + $0x78] sm:$0xff]  ;;  %v3861_v4 = vld [vmem:[%s15017_s6 + $0x70] sm:$0xff]  ;;  %vm15609_vm0 = vmmov %vm15608_vm3 }
 0x48e   :  { %vm3777_vm1 = vcmp.gt.f32.partialorder %v3745_v18, 0.0  ;;  %v3809_v59 = vmul.f32 0.01, %v3745_v18  ;;  %v3710_v61 = vmul.f32 %v13366_v46, %v3626_v24  ;;  %v9809_v10 = vpack.c.bf16 %v4037_v2, %v4036_v53  ;;  %v3866_v24 = vld [vmem:[%s15017_s6 + $0x98] sm:$0xff]  ;;  %vm15610_vm2 = vmmov %vm15603_vm9 }
 0x48f   :  { %v3748_v0 = vadd.f32 %v13371_v47, %v3711_v42  ;;  %9770 = vmatprep.subr.bf16.mxu1 %v9769_v41  ;;  %v3842_v43 = vsel %vm3778_vm13, %v3746_v19, %v3810_v45  ;;  %v3860_v19 = vld [vmem:[%s15017_s6 + $0x68] sm:$0xff]  ;;  %v3863_v42 = vld [vmem:[%s15017_s6 + $0x80] sm:$0xff]  ;;  %v3865_v41 = vld [vmem:[%s15017_s6 + $0x90] sm:$0xff] }
 0x490   :  { %v3747_v30 = vadd.f32 %v13371_v47, %v3710_v61  ;;  %v8851_v56 = vpop.f32.mrb[78].mxu0  ;;  %9772 = vmatpush3.bf16.msra.mxu1 %v9771_v62  ;;  %v3841_v32 = vsel %vm3777_vm1, %v3745_v18, %v3809_v59  ;;  %v3859_v18 = vld [vmem:[%s15017_s6 + $0x60] sm:$0xff]  ;;  %v3864_v45 = vld [vmem:[%s15017_s6 + $0x88] sm:$0xff]  ;;  %vm15611_vm13 = vmmov %vm15610_vm2 }
 0x491   :  { %vm3780_vm4 = vcmp.gt.f32.partialorder %v3748_v0, 0.0  ;;  %v3812_v36 = vmul.f32 0.01, %v3748_v0  ;;  %v3713_v54 = vmul.f32 %v8851_v56, %v13366_v46  ;;  %v3636_v11 = vpop.f32.mrb[79].mxu0  ;;  %v9773_v20 = vpack.c.bf16 %v3842_v43, %v3841_v32  ;;  %v3868_v59 = vld [vmem:[%s15017_s6 + $0xa8] sm:$0xff]  ;;  %v3867_v61 = vld [vmem:[%s15017_s6 + $0xa0] sm:$0xff]  ;;  %vm15612_vm1 = vmmov %vm15609_vm0 }
 0x492   :  { %vm3779_vm5 = vcmp.gt.f32.partialorder %v3747_v30, 0.0  ;;  %v3811_v34 = vmul.f32 0.01, %v3747_v30  ;;  %v3712_v26 = vmul.f32 %v13366_v46, %v3636_v11  ;;  %v4024_v46 = vld [vmem:[%s15018_s7] sm:$0xff]  ;;  %v3869_v43 = vld [vmem:[%s15017_s6 + $0xb0] sm:$0xff]  ;;  %v3874_v32 = vld [vmem:[%s15017_s6 + $0xd8] sm:$0xff] }
 0x493   :  { %v3750_v3 = vadd.f32 %v13371_v47, %v3713_v54  ;;  %9774 = vmatprep.subr.bf16.mxu1 %v9773_v20  ;;  %v3844_v35 = vsel %vm3780_vm4, %v3748_v0, %v3812_v36  ;;  %v3870_v0 = vld [vmem:[%s15017_s6 + $0xb8] sm:$0xff]  ;;  %v3871_v56 = vld [vmem:[%s15017_s6 + $0xc0] sm:$0xff]  ;;  %v3873_v36 = vld [vmem:[%s15017_s6 + $0xd0] sm:$0xff] }
 0x494   :  { %v3749_v13 = vadd.f32 %v13371_v47, %v3712_v26  ;;  %9776 = vmatpush3.bf16.msra.mxu1 %v9775_v6  ;;  %v3843_v33 = vsel %vm3779_vm5, %v3747_v30, %v3811_v34  ;;  %v9785_v6 = vpack.c.bf16 %v4025_v48, %v4024_v46  ;;  %v3872_v30 = vld [vmem:[%s15017_s6 + $0xc8] sm:$0xff]  ;;  %v3875_v11 = vld [vmem:[%s15017_s6 + $0xe0] sm:$0xff]  ;;  %v3878_v20 = vld [vmem:[%s15017_s6 + $0xf8] sm:$0xff] }
 0x495   :  { %vm3782_vm15 = vcmp.gt.f32.partialorder %v3750_v3, 0.0  ;;  %v3814_v14 = vmul.f32 0.01, %v3750_v3  ;;  %v9777_v62 = vpack.c.bf16 %v3844_v35, %v3843_v33  ;;  %v3876_v54 = vld [vmem:[%s15017_s6 + $0xe8] sm:$0xff]  ;;  %v3877_v34 = vld [vmem:[%s15017_s6 + $0xf0] sm:$0xff]  ;;  %vm15613_vm4 = vmmov %vm15609_vm0 }
 0x496   :  { %vm3781_vm6 = vcmp.gt.f32.partialorder %v3749_v13, 0.0  ;;  %v3813_v7 = vmul.f32 0.01, %v3749_v13  ;;  %v4038_v26 = vld [vmem:[%s15018_s7 + $0x70] sm:$0xff]  ;;  %v7163_v33 = vld [vmem:[%s15019_s4 + $0x48] sm:$0xff]  ;;  %vm15614_vm5 = vmmov %vm15610_vm2 }
 0x497   :  { %9778 = vmatprep.subr.bf16.mxu1 %v9777_v62  ;;  %v3846_v47 = vsel %vm3782_vm15, %v3750_v3, %v3814_v14  ;;  %v4039_v3 = vld [vmem:[%s15018_s7 + $0x78] sm:$0xff]  ;;  %v7164_v48 = vld [vmem:[%s15019_s4 + $0x50] sm:$0xff]  ;;  %vm15615_vm15 = vmmov %vm15610_vm2 }
 0x498   :  { %9780 = vmatpush3.bf16.msra.mxu1 %v9779_v27  ;;  %v3845_v28 = vsel %vm3781_vm6, %v3749_v13, %v3813_v7  ;;  %v9789_v27 = vpack.c.bf16 %v4027_v17, %v4026_v55  ;;  %v9813_v35 = vpack.c.bf16 %v4039_v3, %v4038_v26  ;;  %v7162_v13 = vld [vmem:[%s15019_s4 + $0x40] sm:$0xff]  ;;  %v4330_v3 = vld [vmem:[%s15019_s4 + $0x8] sm:$0xff]  ;;  %vm15616_vm6 = vmmov %vm15609_vm0 }
 0x499   :  { %v9781_v5 = vpack.c.bf16 %v3846_v47, %v3845_v28  ;;  %v9817_v14 = vpack.c.bf16 %v7163_v33, %v7162_v13  ;;  %v7165_v47 = vld [vmem:[%s15019_s4 + $0x58] sm:$0xff]  ;;  %v7166_v17 = vld [vmem:[%s15019_s4 + $0x60] sm:$0xff]  ;;  %v7229_v33 = vld [vmem:[%s15020_s5 + $0x88] sm:$0xff] }
 0x49a   :  { %v9821_v55 = vpack.c.bf16 %v7165_v47, %v7164_v48  ;;  %v4329_v26 = vld [vmem:[%s15019_s4] sm:$0xff]  ;;  %v4332_v48 = vld [vmem:[%s15019_s4 + $0x18] sm:$0xff] }
 0x49b   :  { %9782 = vmatprep.subr.bf16.mxu1 %v9781_v5  ;;  %v7228_v13 = vld [vmem:[%s15020_s5 + $0x80] sm:$0xff] }
 0x49c   :  { %9784 = vmatpush3.bf16.msra.mxu1 %v9783_v37  ;;  %v9793_v37 = vpack.c.bf16 %v4029_v58, %v4028_v40 }
 0x49d   :  { %9786 = vmatprep.subr.bf16.mxu1 %v9785_v6 }
 0x49f   :  { %3944 = vmatmul.mubr.f32.vlgmr.msra.gmra.mrb[32].mxu1 %v3847_v21  ;;  %v7167_v21 = vld [vmem:[%s15019_s4 + $0x68] sm:$0xff] }
 0x4a0   :  { %3948 = vmatprep.mubr.f32.mxu1 %v3850_v38  ;;  %9788 = vmatpush3.bf16.msra.mxu1 %v9785_v6  ;;  %v9825_v58 = vpack.c.bf16 %v7167_v21, %v7166_v17 }
 0x4a1   :  { %9790 = vmatprep.subr.bf16.mxu1 %v9789_v27 }
 0x4a3   :  { %3949 = vmatmul.mubr.f32.gmra.mrb[34].mxu1 %v3849_v8  ;;  %v7168_v8 = vld [vmem:[%s15019_s4 + $0x70] sm:$0xff] }
 0x4a4   :  { %3953 = vmatprep.mubr.f32.mxu1 %v3852_v12  ;;  %9792 = vmatpush3.bf16.msra.mxu1 %v9789_v27  ;;  %v7169_v12 = vld [vmem:[%s15019_s4 + $0x78] sm:$0xff] }
 0x4a5   :  { %9794 = vmatprep.subr.bf16.mxu1 %v9793_v37 }
 0x4a7   :  { %3954 = vmatmul.mubr.f32.gmra.mrb[36].mxu1 %v3851_v52  ;;  %v9829_v52 = vpack.c.bf16 %v7169_v12, %v7168_v8  ;;  %v4334_v12 = vld [vmem:[%s15019_s4 + $0x28] sm:$0xff] }
 0x4a8   :  { %3958 = vmatprep.mubr.f32.mxu1 %v3854_v25  ;;  %9796 = vmatpush3.bf16.msra.mxu1 %v9793_v37 }
 0x4a9   :  { %9798 = vmatprep.subr.bf16.mxu1 %v9797_v57 }
 0x4ab   :  { %3959 = vmatmul.mubr.f32.gmra.mrb[38].mxu1 %v3853_v63 }
 0x4ac   :  { %3963 = vmatprep.mubr.f32.mxu1 %v3856_v60  ;;  %9800 = vmatpush3.bf16.msra.mxu1 %v9797_v57 }
 0x4ad   :  { %9802 = vmatprep.subr.bf16.mxu1 %v9801_v49 }
 0x4af   :  { %3964 = vmatmul.mubr.f32.gmra.mrb[40].mxu1 %v3855_v29 }
 0x4b0   :  { %3968 = vmatprep.mubr.f32.mxu1 %v3858_v15  ;;  %9804 = vmatpush3.bf16.msra.mxu1 %v9801_v49 }
 0x4b1   :  { %9806 = vmatprep.subr.bf16.mxu1 %v9805_v31 }
 0x4b3   :  { %3969 = vmatmul.mubr.f32.gmra.mrb[42].mxu1 %v3857_v23 }
 0x4b4   :  { %3973 = vmatprep.mubr.f32.mxu1 %v3860_v19  ;;  %9808 = vmatpush3.bf16.msra.mxu1 %v9805_v31 }
 0x4b5   :  { %9810 = vmatprep.subr.bf16.mxu1 %v9809_v10 }
 0x4b7   :  { %3974 = vmatmul.mubr.f32.gmra.mrb[44].mxu1 %v3859_v18 }
 0x4b8   :  { %3978 = vmatprep.mubr.f32.mxu1 %v3862_v39  ;;  %9812 = vmatpush3.bf16.msra.mxu1 %v9809_v10 }
 0x4b9   :  { %9814 = vmatprep.subr.bf16.mxu1 %v9813_v35 }
 0x4bb   :  { %3979 = vmatmul.mubr.f32.gmra.mrb[46].mxu1 %v3861_v4 }
 0x4bc   :  { %3983 = vmatprep.mubr.f32.mxu1 %v3864_v45  ;;  %9816 = vmatpush3.bf16.msra.mxu1 %v9813_v35  ;;  %v9833_v35 = vpack.c.bf16 %v4330_v3, %v4329_v26 }
 0x4bd   :  { %9818 = vmatprep.subr.bf16.mxu1 %v9817_v14 }
 0x4bf   :  { %3984 = vmatmul.mubr.f32.gmra.mrb[48].mxu1 %v3863_v42 }
 0x4c0   :  { %3988 = vmatprep.mubr.f32.mxu1 %v3866_v24 }
 0x4c3   :  { %3989 = vmatmul.mubr.f32.gmra.mrb[50].mxu1 %v3865_v41 }
 0x4c4   :  { %3993 = vmatprep.mubr.f32.mxu1 %v3868_v59 }
 0x4c7   :  { %3994 = vmatmul.mubr.f32.gmra.mrb[52].mxu1 %v3867_v61 }
 0x4c8   :  { %3998 = vmatprep.mubr.f32.mxu1 %v3870_v0 }
 0x4cb   :  { %3999 = vmatmul.mubr.f32.gmra.mrb[54].mxu1 %v3869_v43 }
 0x4cc   :  { %4003 = vmatprep.mubr.f32.mxu1 %v3872_v30 }
 0x4cf   :  { %4004 = vmatmul.mubr.f32.gmra.mrb[56].mxu1 %v3871_v56 }
 0x4d0   :  { %4008 = vmatprep.mubr.f32.mxu1 %v3874_v32 }
 0x4d3   :  { %4009 = vmatmul.mubr.f32.gmra.mrb[58].mxu1 %v3873_v36 }
 0x4d4   :  { %4013 = vmatprep.mubr.f32.mxu1 %v3876_v54 }
 0x4d7   :  { %4014 = vmatmul.mubr.f32.gmra.mrb[60].mxu1 %v3875_v11 }
 0x4d8   :  { %4018 = vmatprep.mubr.f32.mxu1 %v3878_v20 }
 0x4db   :  { %4019 = vmatmul.mubr.f32.gmra.mrb[62].mxu1 %v3877_v34 }
 0x572   :  { %v7763_v62 = vpop.f32.mrb[32].mxu1 }
 0x573   :  { %v7764_v7 = vpop.f32.mrb[33].mxu1 }
 0x574   :  { %v7765_v46 = vadd.f32 %v7764_v7, %v7763_v62  ;;  %v4331_v62 = vld [vmem:[%s15019_s4 + $0x10] sm:$0xff]  ;;  %v9865_v7 = vpack.c.bf16 %v7229_v33, %v7228_v13 }
 0x576   :  { %v7766_v28 = vpop.f32.mrb[34].mxu1  ;;  %8884 = vmatprep.mubr.f32.mxu1 %v7765_v46  ;;  %v7231_v46 = vld [vmem:[%s15020_s5 + $0x98] sm:$0xff]  ;;  %9866 = vmatprep.subr.bf16.mxu0 %v9865_v7 }
 0x577   :  { %v7767_v5 = vpop.f32.mrb[35].mxu1  ;;  %9868 = vmatpush3.bf16.msra.mxu0 %v9865_v7 }
 0x578   :  { %v7768_v6 = vadd.f32 %v7767_v5, %v7766_v28  ;;  %v7232_v28 = vld [vmem:[%s15020_s5 + $0xa0] sm:$0xff]  ;;  %v7233_v5 = vld [vmem:[%s15020_s5 + $0xa8] sm:$0xff] }
 0x57a   :  { %v7769_v38 = vpop.f32.mrb[36].mxu1  ;;  %8885 = vmatmul.mubr.f32.vlgmr.msra.gmra.mrb[64].mxu1 %v7768_v6 }
 0x57b   :  { %v7770_v27 = vpop.f32.mrb[37].mxu1  ;;  %9820 = vmatpush3.bf16.msra.mxu1 %v9817_v14  ;;  %v7230_v14 = vld [vmem:[%s15020_s5 + $0x90] sm:$0xff] }
 0x57c   :  { %v7771_v40 = vadd.f32 %v7770_v27, %v7769_v38  ;;  %9822 = vmatprep.subr.bf16.mxu1 %v9821_v55  ;;  %v9869_v47 = vpack.c.bf16 %v7231_v46, %v7230_v14  ;;  %v9837_v38 = vpack.c.bf16 %v4332_v48, %v4331_v62  ;;  %v4333_v27 = vld [vmem:[%s15019_s4 + $0x20] sm:$0xff] }
 0x57e   :  { %v7772_v37 = vpop.f32.mrb[38].mxu1  ;;  %8887 = vmatprep.mubr.f32.mxu1 %v7771_v40  ;;  %9870 = vmatprep.subr.bf16.mxu0 %v9869_v47  ;;  %v9873_v40 = vpack.c.bf16 %v7233_v5, %v7232_v28 }
 0x57f   :  { %v7773_v44 = vpop.f32.mrb[39].mxu1  ;;  %9824 = vmatpush3.bf16.msra.mxu1 %v9821_v55  ;;  %9872 = vmatpush3.bf16.msra.mxu0 %v9869_v47 }
 0x580   :  { %v7774_v9 = vadd.f32 %v7773_v44, %v7772_v37  ;;  %9826 = vmatprep.subr.bf16.mxu1 %v9825_v58  ;;  %v7234_v37 = vld [vmem:[%s15020_s5 + $0xb0] sm:$0xff]  ;;  %v7235_v44 = vld [vmem:[%s15020_s5 + $0xb8] sm:$0xff]  ;;  %9874 = vmatprep.subr.bf16.mxu0 %v9873_v40 }
 0x582   :  { %v7775_v25 = vpop.f32.mrb[40].mxu1  ;;  %8888 = vmatmul.mubr.f32.gmra.mrb[66].mxu1 %v7774_v9 }
 0x583   :  { %v7776_v57 = vpop.f32.mrb[41].mxu1  ;;  %9828 = vmatpush3.bf16.msra.mxu1 %v9825_v58  ;;  %9876 = vmatpush3.bf16.msra.mxu0 %v9873_v40 }
 0x584   :  { %v7777_v1 = vadd.f32 %v7776_v57, %v7775_v25  ;;  %9830 = vmatprep.subr.bf16.mxu1 %v9829_v52  ;;  %v9841_v25 = vpack.c.bf16 %v4334_v12, %v4333_v27  ;;  %v9877_v57 = vpack.c.bf16 %v7235_v44, %v7234_v37 }
 0x586   :  { %v7778_v50 = vpop.f32.mrb[42].mxu1  ;;  %8890 = vmatprep.mubr.f32.mxu1 %v7777_v1  ;;  %v4335_v1 = vld [vmem:[%s15019_s4 + $0x30] sm:$0xff]  ;;  %9878 = vmatprep.subr.bf16.mxu0 %v9877_v57 }
 0x587   :  { %v7779_v63 = vpop.f32.mrb[43].mxu1  ;;  %9832 = vmatpush3.bf16.msra.mxu1 %v9829_v52  ;;  %9880 = vmatpush3.bf16.msra.mxu0 %v9877_v57 }
 0x588   :  { %v7780_v60 = vadd.f32 %v7779_v63, %v7778_v50  ;;  %9834 = vmatprep.subr.bf16.mxu1 %v9833_v35  ;;  %v4336_v50 = vld [vmem:[%s15019_s4 + $0x38] sm:$0xff]  ;;  %v7236_v63 = vld [vmem:[%s15020_s5 + $0xc0] sm:$0xff] }
 0x58a   :  { %v7781_v49 = vpop.f32.mrb[44].mxu1  ;;  %8891 = vmatmul.mubr.f32.gmra.mrb[68].mxu1 %v7780_v60  ;;  %v7237_v60 = vld [vmem:[%s15020_s5 + $0xc8] sm:$0xff] }
 0x58b   :  { %v7782_v16 = vpop.f32.mrb[45].mxu1 }
 0x58c   :  { %v7783_v51 = vadd.f32 %v7782_v16, %v7781_v49 }
 0x58e   :  { %v7784_v29 = vpop.f32.mrb[46].mxu1  ;;  %8893 = vmatprep.mubr.f32.mxu1 %v7783_v51 }
 0x58f   :  { %v7785_v15 = vpop.f32.mrb[47].mxu1 }
 0x590   :  { %v7786_v31 = vadd.f32 %v7785_v15, %v7784_v29  ;;  %v9845_v15 = vpack.c.bf16 %v4336_v50, %v4335_v1 }
 0x592   :  { %v7787_v53 = vpop.f32.mrb[48].mxu1  ;;  %8894 = vmatmul.mubr.f32.gmra.mrb[70].mxu1 %v7786_v31 }
 0x593   :  { %v7788_v2 = vpop.f32.mrb[49].mxu1 }
 0x594   :  { %v7789_v23 = vadd.f32 %v7788_v2, %v7787_v53  ;;  %v7202_v2 = vld [vmem:[%s15019_s4 + $0x80] sm:$0xff] }
 0x596   :  { %v7790_v19 = vpop.f32.mrb[50].mxu1  ;;  %8896 = vmatprep.mubr.f32.mxu1 %v7789_v23  ;;  %v7203_v23 = vld [vmem:[%s15019_s4 + $0x88] sm:$0xff] }
 0x597   :  { %v7791_v10 = vpop.f32.mrb[51].mxu1 }
 0x598   :  { %v7792_v18 = vadd.f32 %v7791_v10, %v7790_v19  ;;  %v9881_v19 = vpack.c.bf16 %v7237_v60, %v7236_v63  ;;  %v7238_v10 = vld [vmem:[%s15020_s5 + $0xd0] sm:$0xff] }
 0x59a   :  { %v7793_v39 = vpop.f32.mrb[52].mxu1  ;;  %8897 = vmatmul.mubr.f32.gmra.mrb[72].mxu1 %v7792_v18  ;;  %v7239_v18 = vld [vmem:[%s15020_s5 + $0xd8] sm:$0xff]  ;;  %9882 = vmatprep.subr.bf16.mxu0 %v9881_v19 }
 0x59b   :  { %v7794_v4 = vpop.f32.mrb[53].mxu1  ;;  %9884 = vmatpush3.bf16.msra.mxu0 %v9881_v19 }
 0x59c   :  { %v7795_v45 = vadd.f32 %v7794_v4, %v7793_v39 }
 0x59e   :  { %v7796_v42 = vpop.f32.mrb[54].mxu1  ;;  %8899 = vmatprep.mubr.f32.mxu1 %v7795_v45 }
 0x59f   :  { %v7797_v24 = vpop.f32.mrb[55].mxu1 }
 0x5a0   :  { %v7798_v41 = vadd.f32 %v7797_v24, %v7796_v42  ;;  %v13777_v24 = vpack.c.bf16 %v7203_v23, %v7202_v2 }
 0x5a2   :  { %v7799_v59 = vpop.f32.mrb[56].mxu1  ;;  %8900 = vmatmul.mubr.f32.gmra.mrb[74].mxu1 %v7798_v41  ;;  %v9885_v41 = vpack.c.bf16 %v7239_v18, %v7238_v10  ;;  %v4185_v18 = vand.u32 15, %v10575_v22 }
 0x5a3   :  { %v7800_v61 = vpop.f32.mrb[57].mxu1 }
 0x5a4   :  { %v7801_v0 = vadd.f32 %v7800_v61, %v7799_v59  ;;  %9886 = vmatprep.subr.bf16.mxu0 %v9885_v41 }
 0x5a5   :  { %9888 = vmatpush3.bf16.msra.mxu0 %v9885_v41 }
 0x5a6   :  { %v7802_v43 = vpop.f32.mrb[58].mxu1  ;;  %8902 = vmatprep.mubr.f32.mxu1 %v7801_v0 }
 0x5a7   :  { %v7803_v30 = vpop.f32.mrb[59].mxu1 }
 0x5a8   :  { %v7804_v56 = vadd.f32 %v7803_v30, %v7802_v43 }
 0x5aa   :  { %v7805_v32 = vpop.f32.mrb[60].mxu1  ;;  %8903 = vmatmul.mubr.f32.gmra.mrb[76].mxu1 %v7804_v56 }
 0x5ab   :  { %v7806_v36 = vpop.f32.mrb[61].mxu1 }
 0x5ac   :  { %v7807_v54 = vadd.f32 %v7806_v36, %v7805_v32 }
 0x5ae   :  { %v7808_v11 = vpop.f32.mrb[62].mxu1  ;;  %8905 = vmatprep.mubr.f32.mxu1 %v7807_v54 }
 0x5af   :  { %v7809_v20 = vpop.f32.mrb[63].mxu1 }
 0x5b0   :  { %v7810_v34 = vadd.f32 %v7809_v20, %v7808_v11 }
 0x5b2   :  { %8906 = vmatmul.mubr.f32.gmra.mrb[78].mxu1 %v7810_v34 }
 0x64d   :  { %v8886_v6 = vpop.f32.mrb[64].mxu1 }
 0x64e   :  { %v4218_v55 = vrot.slane %v8886_v6, 7  ;;  %v4282_v17 = vrot.slane %v8886_v6, 1  ;;  %v13704_v21 = vpop.f32.mrb[65].mxu1 }
 0x64f   :  { %v4217_v58 = vrot.slane %v13704_v21, 7  ;;  %v4281_v8 = vrot.slane %v13704_v21, 1  ;;  %8924 = vmatprep.mubr.msk.f32.mxu1 %vm15119_vm7, %v13704_v21 }
 0x650   :  { %8925 = vmatmul.mubr.msk.f32.vlgmr.msra.gmra.mrb[80].mxu1 %vm15119_vm7, %v8886_v6 }
 0x651   :  { %v13727_v9 = vsel %vm15602_vm8, %v4217_v58, %v4218_v55  ;;  %9836 = vmatpush3.bf16.msra.mxu1 %v9833_v35  ;;  %v13733_v52 = vsel %vm15603_vm9, %v4281_v8, %v4282_v17  ;;  %vm15617_vm8 = vmmov %vm15609_vm0 }
 0x652   :  { %9838 = vmatprep.subr.bf16.mxu1 %v9837_v38  ;;  %vm15618_vm9 = vmmov %vm15610_vm2 }
 0x655   :  { %v8889_v49 = vpop.f32.mrb[66].mxu1  ;;  %9840 = vmatpush3.bf16.msra.mxu1 %v9837_v38 }
 0x656   :  { %v4220_v16 = vrot.slane %v8889_v49, 7  ;;  %v4284_v51 = vrot.slane %v8889_v49, 1  ;;  %v4116_v29 = vpop.f32.mrb[67].mxu1  ;;  %9842 = vmatprep.subr.bf16.mxu1 %v9841_v25 }
 0x657   :  { %v4219_v31 = vrot.slane %v4116_v29, 7  ;;  %v4283_v53 = vrot.slane %v4116_v29, 1  ;;  %8927 = vmatprep.mubr.msk.f32.mxu1 %vm15119_vm7, %v4116_v29 }
 0x658   :  { %8928 = vmatmul.mubr.msk.f32.gmra.mrb[82].mxu1 %vm15119_vm7, %v8889_v49 }
 0x659   :  { %v13763_v39 = vsel %vm15604_vm10, %v4282_v17, %v4283_v53  ;;  %9844 = vmatpush3.bf16.msra.mxu1 %v9841_v25  ;;  %v13767_v4 = vsel %vm15605_vm11, %v4218_v55, %v4219_v31  ;;  %v13771_v45 = vsel %vm15606_vm14, %v4219_v31, %v4220_v16  ;;  %v13775_v42 = vsel %vm15607_vm12, %v4283_v53, %v4284_v51  ;;  %vm15619_vm10 = vmmov %vm15610_vm2 }
 0x65a   :  { %9846 = vmatprep.subr.bf16.mxu1 %v9845_v15  ;;  %vm15620_vm11 = vmmov %vm15609_vm0  ;;  %v85_v53 = vadd.s32 16, %v10575_v22 }
 0x65b   :  { %vm15621_vm14 = vmmov %vm15609_vm0 }
 0x65c   :  { %vm15622_vm12 = vmmov %vm15610_vm2  ;;  %v4187_v41 = vand.u32 15, %v85_v53  ;;  %v15647_v53 = vld [vmem:[#allocation21_spill] sm:$0xff] }
 0x65d   :  { %v8892_v59 = vpop.f32.mrb[68].mxu1  ;;  %9848 = vmatpush3.bf16.msra.mxu1 %v9845_v15 }
 0x65e   :  { %v4222_v61 = vrot.slane %v8892_v59, 7  ;;  %v4286_v0 = vrot.slane %v8892_v59, 1  ;;  %v4126_v43 = vpop.f32.mrb[69].mxu1  ;;  %9850 = vmatprep.subr.bf16.mxu1 %v13777_v24 }
 0x65f   :  { %v4221_v30 = vrot.slane %v4126_v43, 7  ;;  %v4285_v56 = vrot.slane %v4126_v43, 1  ;;  %8930 = vmatprep.mubr.msk.f32.mxu1 %vm15119_vm7, %v4126_v43 }
 0x660   :  { %8931 = vmatmul.mubr.msk.f32.gmra.mrb[84].mxu1 %vm15119_vm7, %v8892_v59 }
 0x661   :  { %v13784_v32 = vsel %vm15608_vm3, %v4220_v16, %v4221_v30  ;;  %v13788_v36 = vsel %vm15609_vm0, %v4221_v30, %v4222_v61  ;;  %v13792_v54 = vsel %vm15610_vm2, %v4284_v51, %v4285_v56  ;;  %v13796_v11 = vsel %vm15611_vm13, %v4285_v56, %v4286_v0  ;;  %vm15623_vm3 = vmmov %vm15610_vm2  ;;  %v7262_v30 = vld [vmem:[%s15020_s5 + $0x110] sm:$0xff] }
 0x662   :  { %vm15624_vm2 = vmmov %vm15609_vm0 }
 0x663   :  { %vm15625_vm13 = vmmov %vm15623_vm3 }
 0x665   :  { %v8895_v20 = vpop.f32.mrb[70].mxu1 }
 0x666   :  { %v4224_v34 = vrot.slane %v8895_v20, 7  ;;  %v4288_v26 = vrot.slane %v8895_v20, 1  ;;  %v4136_v3 = vpop.f32.mrb[71].mxu1 }
 0x667   :  { %v4223_v35 = vrot.slane %v4136_v3, 7  ;;  %v4287_v13 = vrot.slane %v4136_v3, 1  ;;  %8933 = vmatprep.mubr.msk.f32.mxu1 %vm15119_vm7, %v4136_v3  ;;  %v7205_v3 = vld [vmem:[%s15019_s4 + $0x98] sm:$0xff] }
 0x668   :  { %8934 = vmatmul.mubr.msk.f32.gmra.mrb[86].mxu1 %vm15119_vm7, %v8895_v20 }
 0x669   :  { %v13802_v33 = vsel %vm15612_vm1, %v4222_v61, %v4223_v35  ;;  %v13806_v14 = vsel %vm15613_vm4, %v4223_v35, %v4224_v34  ;;  %v13810_v62 = vsel %vm15614_vm5, %v4286_v0, %v4287_v13  ;;  %v13814_v7 = vsel %vm15615_vm15, %v4287_v13, %v4288_v26  ;;  %vm15626_vm1 = vmmov %vm15623_vm3  ;;  %v15632_v13 = vld [vmem:[#allocation17_spill] sm:$0xff] }
 0x66a   :  { %vm13872_vm4 = vcmp.eq.s32.totalorder %v4185_v18, 0  ;;  %vm13877_vm5 = vcmp.eq.s32.totalorder %v4187_v41, 0  ;;  %vm15631_vm15 = vmmov %vm15609_vm0  ;;  %v4197_v18 = vand.u32 15, %v15647_v53  ;;  %v97_v41 = vadd.s32 112, %v10575_v22  ;;  %v5141_v53 = vld [vmem:[%s15020_s5 + $0x20] sm:$0xff] }
 0x66d   :  { %v8898_v46 = vpop.f32.mrb[72].mxu1 }
 0x66e   :  { %v4226_v48 = vrot.slane %v8898_v46, 7  ;;  %v4290_v47 = vrot.slane %v8898_v46, 1  ;;  %v4146_v28 = vpop.f32.mrb[73].mxu1 }
 0x66f   :  { %v4225_v5 = vrot.slane %v4146_v28, 7  ;;  %v4289_v6 = vrot.slane %v4146_v28, 1  ;;  %8936 = vmatprep.mubr.msk.f32.mxu1 %vm15119_vm7, %v4146_v28 }
 0x670   :  { %8937 = vmatmul.mubr.msk.f32.gmra.mrb[88].mxu1 %vm15119_vm7, %v8898_v46  ;;  %v4189_v46 = vand.u32 15, %v15632_v13 }
 0x671   :  { %v13820_v55 = vsel %vm15616_vm6, %v4224_v34, %v4225_v5  ;;  %v13824_v17 = vsel %vm15617_vm8, %v4225_v5, %v4226_v48  ;;  %v13828_v38 = vsel %vm15618_vm9, %v4288_v26, %v4289_v6  ;;  %v13832_v27 = vsel %vm15619_vm10, %v4289_v6, %v4290_v47  ;;  %v7204_v26 = vld [vmem:[%s15019_s4 + $0x90] sm:$0xff]  ;;  %vm15633_vm6 = vmmov %vm15626_vm1 }
 0x672   :  { %vm15634_vm8 = vmmov %vm15609_vm0  ;;  %v9853_v21 = vpack.c.bf16 %v7205_v3, %v7204_v26  ;;  %v7266_v34 = vld [vmem:[%s15020_s5 + $0x130] sm:$0xff] }
 0x673   :  { %vm15635_vm9 = vmmov %vm15609_vm0 }
 0x674   :  { %vm15636_vm10 = vmmov %vm15626_vm1 }
 0x675   :  { %v8901_v40 = vpop.f32.mrb[74].mxu1 }
 0x676   :  { %v4228_v12 = vrot.slane %v8901_v40, 7  ;;  %v4292_v37 = vrot.slane %v8901_v40, 1  ;;  %v4156_v44 = vpop.f32.mrb[75].mxu1 }
 0x677   :  { %v4227_v25 = vrot.slane %v4156_v44, 7  ;;  %v4291_v57 = vrot.slane %v4156_v44, 1  ;;  %8939 = vmatprep.mubr.msk.f32.mxu1 %vm15119_vm7, %v4156_v44 }
 0x678   :  { %8940 = vmatmul.mubr.msk.f32.gmra.mrb[90].mxu1 %vm15119_vm7, %v8901_v40  ;;  %v7206_v40 = vld [vmem:[%s15019_s4 + $0xa0] sm:$0xff] }
 0x679   :  { %v13838_v1 = vsel %vm15620_vm11, %v4226_v48, %v4227_v25  ;;  %v13842_v50 = vsel %vm15621_vm14, %v4227_v25, %v4228_v12  ;;  %v13846_v63 = vsel %vm15622_vm12, %v4290_v47, %v4291_v57  ;;  %v13850_v60 = vsel %vm15623_vm3, %v4291_v57, %v4292_v37  ;;  %vm15637_vm11 = vmmov %vm15626_vm1 }
 0x67a   :  { %v89_v48 = vadd.s32 48, %v10575_v22  ;;  %vm13927_vm14 = vcmp.eq.s32.totalorder %v4189_v46, 0  ;;  %v92_v46 = vadd.s32 72, %v10575_v22 }
 0x67c   :  { %v4191_v25 = vand.u32 15, %v89_v48  ;;  %v4194_v48 = vand.u32 15, %v92_v46 }
 0x67d   :  { %v8904_v49 = vpop.f32.mrb[76].mxu1 }
 0x67e   :  { %v4230_v16 = vrot.slane %v8904_v49, 7  ;;  %v4294_v51 = vrot.slane %v8904_v49, 1  ;;  %v4166_v29 = vpop.f32.mrb[77].mxu1  ;;  %vm13944_vm12 = vcmp.eq.s32.totalorder %v4191_v25, 0 }
 0x67f   :  { %v4229_v15 = vrot.slane %v4166_v29, 7  ;;  %v4293_v31 = vrot.slane %v4166_v29, 1  ;;  %8942 = vmatprep.mubr.msk.f32.mxu1 %vm15119_vm7, %v4166_v29  ;;  %v93_v29 = vadd.s32 80, %v10575_v22 }
 0x680   :  { %8943 = vmatmul.mubr.msk.f32.gmra.mrb[92].mxu1 %vm15119_vm7, %v8904_v49  ;;  %v7208_v49 = vld [vmem:[%s15019_s4 + $0xb0] sm:$0xff] }
 0x681   :  { %v13857_v2 = vsel %vm15609_vm0, %v4228_v12, %v4229_v15  ;;  %v13861_v23 = vsel %vm15624_vm2, %v4229_v15, %v4230_v16  ;;  %v13865_v19 = vsel %vm15625_vm13, %v4292_v37, %v4293_v31  ;;  %v13869_v10 = vsel %vm15626_vm1, %v4293_v31, %v4294_v51  ;;  %v7207_v12 = vld [vmem:[%s15019_s4 + $0xa8] sm:$0xff] }
 0x682   :  { %v4251_v37 = vsel %vm13877_vm5, 0.0, %v13767_v4  ;;  %v9857_v57 = vpack.c.bf16 %v7207_v12, %v7206_v40  ;;  %v4253_v4 = vsel %vm13927_vm14, 0.0, %v13784_v32  ;;  %v4195_v31 = vand.u32 15, %v93_v29  ;;  %v14112_v29 = vld [vmem:[%s15015_s14 + $0x7] ss:$0 sm:$0xff] }
 0x683   :  { %vm13978_vm2 = vcmp.eq.s32.totalorder %v4197_v18, 0  ;;  %v5142_v18 = vld [vmem:[%s15020_s5 + $0x28] sm:$0xff] }
 0x684   :  { %vm13966_vm0 = vcmp.eq.s32.totalorder %v4195_v31, 0 }
 0x685   :  { %v8907_v59 = vpop.f32.mrb[78].mxu1 }
 0x686   :  { %v4232_v61 = vrot.slane %v8907_v59, 7  ;;  %v4296_v0 = vrot.slane %v8907_v59, 1  ;;  %v4176_v43 = vpop.f32.mrb[79].mxu1 }
 0x687   :  { %v4231_v56 = vrot.slane %v4176_v43, 7  ;;  %v4295_v20 = vrot.slane %v4176_v43, 1  ;;  %8945 = vmatprep.mubr.msk.f32.mxu1 %vm15119_vm7, %v4176_v43 }
 0x688   :  { %8946 = vmatmul.mubr.msk.f32.gmra.mrb[94].mxu1 %vm15119_vm7, %v8907_v59  ;;  %v4248_v35 = vsel %vm15631_vm15, %v4232_v61, %v4217_v58  ;;  %v13898_v47 = vsel %vm15633_vm6, %v4296_v0, %v4281_v8  ;;  %v4199_v59 = vand.u32 15, %v97_v41 }
 0x689   :  { %v4249_v28 = vsel %vm13872_vm4, 0.0, %v4248_v35  ;;  %v4234_v5 = vsel %vm15634_vm8, %v4230_v16, %v4231_v56  ;;  %v4233_v6 = vsel %vm15635_vm9, %v4231_v56, %v4232_v61  ;;  %v13908_v58 = vsel %vm15636_vm10, %v4294_v51, %v4295_v20  ;;  %v15642_v16 = vld [vmem:[#allocation20_spill] sm:$0xff] }
 0x68a   :  { %8964 = vmatprep.mubr.msk.f32.mxu1 %vm15119_vm7, %v4249_v28  ;;  %v13913_v8 = vsel %vm15637_vm11, %v4295_v20, %v4296_v0  ;;  %v4193_v51 = vand.u32 15, %v15642_v16  ;;  %v4261_v61 = vsel %vm13978_vm2, 0.0, %v13857_v2  ;;  %vm13989_vm13 = vcmp.eq.s32.totalorder %v4199_v59, 0  ;;  %v15654_v2 = vld [vmem:[#allocation27_spill] sm:$0xff]  ;;  %v14107_v16 = vld [vmem:[%s15015_s14 + $0x6] ss:$0 sm:$0xff] }
 0x68b   :  { %v4263_v0 = vsel %vm13989_vm13, 0.0, %v4234_v5  ;;  %v4188_v56 = vand.u32 15, %v15654_v2  ;;  %v88_v20 = vadd.s32 40, %v10575_v22  ;;  %vm14043_vm9 = vcmp.eq.s32.totalorder %v4194_v48, 15  ;;  %v5144_v59 = vld [vmem:[%s15020_s5 + $0x38] sm:$0xff] }
 0x68c   :  { %8965 = vmatmul.mubr.msk.f32.vlgmr.msra.gmra.mrb[80].mxu1 %vm15119_vm7, %v13727_v9  ;;  %v7209_v9 = vld [vmem:[%s15019_s4 + $0xb8] sm:$0xff]  ;;  %vm13956_vm3 = vcmp.eq.s32.totalorder %v4193_v51, 0 }
 0x68d   :  { %8967 = vmatprep.mubr.msk.f32.mxu1 %vm15119_vm7, %v4251_v37  ;;  %9852 = vmatpush3.bf16.msra.mxu1 %v13777_v24  ;;  %v9861_v15 = vpack.c.bf16 %v7209_v9, %v7208_v49  ;;  %vm14011_vm15 = vcmp.eq.s32.totalorder %v4188_v56, 15  ;;  %v4190_v3 = vand.u32 15, %v88_v20  ;;  %v5137_v49 = vld [vmem:[%s15020_s5] sm:$0xff]  ;;  %v5138_v9 = vld [vmem:[%s15020_s5 + $0x8] sm:$0xff] }
 0x68e   :  { %9854 = vmatprep.subr.bf16.mxu1 %v9853_v21  ;;  %v4316_v35 = vsel %vm14011_vm15, 0.0, %v13792_v54  ;;  %v15660_v54 = vmov 0 }
 0x68f   :  { %vm14021_vm6 = vcmp.eq.s32.totalorder %v4190_v3, 15  ;;  %v5148_v3 = vld [vmem:[%s15020_s5 + $0x58] sm:$0xff] }
 0x690   :  { %8968 = vmatmul.mubr.msk.f32.gmra.mrb[82].mxu1 %vm15119_vm7, %v13771_v45  ;;  %v4255_v45 = vsel %vm13944_vm12, 0.0, %v13802_v33 }
 0x691   :  { %8970 = vmatprep.mubr.msk.f32.mxu1 %vm15119_vm7, %v4253_v4  ;;  %9856 = vmatpush3.bf16.msra.mxu1 %v9853_v21  ;;  %v9897_v4 = vpack.c.bf16 %v5138_v9, %v5137_v49  ;;  %v7260_v9 = vld [vmem:[%s15020_s5 + $0x100] sm:$0xff] }
 0x692   :  { %9858 = vmatprep.subr.bf16.mxu1 %v9857_v57 }
 0x694   :  { %8971 = vmatmul.mubr.msk.f32.gmra.mrb[84].mxu1 %vm15119_vm7, %v13788_v36  ;;  %v4257_v36 = vsel %vm13956_vm3, 0.0, %v13820_v55 }
 0x695   :  { %8973 = vmatprep.mubr.msk.f32.mxu1 %vm15119_vm7, %v4255_v45  ;;  %9860 = vmatpush3.bf16.msra.mxu1 %v9857_v57 }
 0x696   :  { %9862 = vmatprep.subr.bf16.mxu1 %v9861_v15 }
 0x698   :  { %8974 = vmatmul.mubr.msk.f32.gmra.mrb[86].mxu1 %vm15119_vm7, %v13806_v14  ;;  %v4259_v14 = vsel %vm13966_vm0, 0.0, %v13838_v1  ;;  %v5728_v1 = vld [vmem:[%s15021_s8] sm:$0xff] }
 0x699   :  { %8976 = vmatprep.mubr.msk.f32.mxu1 %vm15119_vm7, %v4257_v36  ;;  %9864 = vmatpush3.bf16.msra.mxu1 %v9861_v15  ;;  %v5139_v15 = vld [vmem:[%s15020_s5 + $0x10] sm:$0xff]  ;;  %v5140_v36 = vld [vmem:[%s15020_s5 + $0x18] sm:$0xff] }
 0x69a   :  { %v9901_v20 = vpack.c.bf16 %v5140_v36, %v5139_v15 }
 0x69c   :  { %8977 = vmatmul.mubr.msk.f32.gmra.mrb[88].mxu1 %vm15119_vm7, %v13824_v17  ;;  %v84_v17 = vadd.s32 8, %v10575_v22 }
 0x69d   :  { %8979 = vmatprep.mubr.msk.f32.mxu1 %vm15119_vm7, %v4259_v14  ;;  %v5143_v14 = vld [vmem:[%s15020_s5 + $0x30] sm:$0xff] }
 0x69e   :  { %v4186_v43 = vand.u32 15, %v84_v17  ;;  %v5145_v17 = vld [vmem:[%s15020_s5 + $0x40] sm:$0xff]  ;;  %v14157_v48 = vpack.c.bf16 %v5144_v59, %v5143_v14 }
 0x6a0   :  { %8980 = vmatmul.mubr.msk.f32.gmra.mrb[90].mxu1 %vm15119_vm7, %v13842_v50  ;;  %vm13999_vm1 = vcmp.eq.s32.totalorder %v4186_v43, 15  ;;  %v5147_v43 = vld [vmem:[%s15020_s5 + $0x50] sm:$0xff]  ;;  %v14537_v50 = vld [vmem:[%s15015_s14 + $0x8] ss:$0 sm:$0xff] }
 0x6a1   :  { %8982 = vmatprep.mubr.msk.f32.mxu1 %vm15119_vm7, %v4261_v61 }
 0x6a4   :  { %8983 = vmatmul.mubr.msk.f32.gmra.mrb[92].mxu1 %vm15119_vm7, %v13861_v23  ;;  %v4314_v23 = vsel %vm13999_vm1, 0.0, %v13763_v39  ;;  %v15659_v39 = vld [vmem:[#allocation29_spill] sm:$0xff] }
 0x6a5   :  { %8985 = vmatprep.mubr.msk.f32.mxu1 %vm15119_vm7, %v4263_v0  ;;  %v4192_v13 = vand.u32 15, %v15659_v39  ;;  %v5146_v0 = vld [vmem:[%s15020_s5 + $0x48] sm:$0xff] }
 0x6a6   :  { %v5150_v39 = vld [vmem:[%s15020_s5 + $0x68] sm:$0xff] }
 0x6a7   :  { %vm14033_vm8 = vcmp.eq.s32.totalorder %v4192_v13, 15 }
 0x6a8   :  { %8986 = vmatmul.mubr.msk.f32.gmra.mrb[94].mxu1 %vm15119_vm7, %v4233_v6  ;;  %v15661_v54 = vsel %vm14033_vm8, 4294967295, %v15660_v54  ;;  %v4320_v28 = vsel %vm14033_vm8, 0.0, %v13828_v38  ;;  %v96_v6 = vadd.s32 104, %v10575_v22  ;;  %v15665_v38 = vmov 0 }
 0x6a9   :  { %9004 = vmatprep.mubr.msk.f32.mxu1 %vm15119_vm7, %v13733_v52  ;;  %v15657_v52 = vmov 0  ;;  %vm15676_vm8 = vcmp.lt.s32.totalorder %v10575_v22, 7 }
 0x6aa   :  { %v15658_v52 = vsel %vm14021_vm6, 4294967295, %v15657_v52  ;;  %v4198_v21 = vand.u32 15, %v96_v6 }
 0x6ac   :  { %9005 = vmatmul.mubr.msk.f32.vlgmr.msra.gmra.mrb[80].mxu1 %vm15119_vm7, %v4314_v23  ;;  %vm14065_vm11 = vcmp.eq.s32.totalorder %v4198_v21, 15  ;;  %v14145_v23 = vpack.c.bf16 %v5142_v18, %v5141_v53  ;;  %v14163_v21 = vpack.c.bf16 %v5148_v3, %v5147_v43 }
 0x6ad   :  { %9007 = vmatprep.mubr.msk.f32.mxu1 %vm15119_vm7, %v13775_v42  ;;  %v4318_v42 = vsel %vm14021_vm6, 0.0, %v13810_v62  ;;  %v15664_v62 = vld [vmem:[#allocation31_spill] sm:$0xff]  ;;  %v4326_v37 = vsel %vm14065_vm11, 0.0, %v13908_v58 }
 0x6ae   :  { %v4196_v5 = vand.u32 15, %v15664_v62  ;;  %v7241_v58 = vld [vmem:[%s15020_s5 + $0xe8] sm:$0xff] }
 0x6b0   :  { %9008 = vmatmul.mubr.msk.f32.gmra.mrb[82].mxu1 %vm15119_vm7, %v4316_v35  ;;  %vm14055_vm10 = vcmp.eq.s32.totalorder %v4196_v5, 15  ;;  %v5149_v35 = vld [vmem:[%s15020_s5 + $0x60] sm:$0xff]  ;;  %v14160_v5 = vpack.c.bf16 %v5146_v0, %v5145_v17 }
 0x6b1   :  { %9010 = vmatprep.mubr.msk.f32.mxu1 %vm15119_vm7, %v13796_v11  ;;  %v15662_v11 = vmov 0  ;;  %v15666_v38 = vsel %vm14055_vm10, 4294967295, %v15665_v38  ;;  %v4324_v40 = vsel %vm14055_vm10, 0.0, %v13865_v19 }
 0x6b2   :  { %v15663_v11 = vsel %vm14043_vm9, 4294967295, %v15662_v11 }
 0x6b4   :  { %9011 = vmatmul.mubr.msk.f32.gmra.mrb[84].mxu1 %vm15119_vm7, %v4318_v42 }
 0x6b5   :  { %9013 = vmatprep.mubr.msk.f32.mxu1 %vm15119_vm7, %v13814_v7  ;;  %v4322_v7 = vsel %vm14043_vm9, 0.0, %v13846_v63  ;;  %v15669_v63 = vld [vmem:[#allocation33_spill] sm:$0xff] }
 0x6b6   :  { %v4200_v12 = vand.u32 15, %v15669_v63 }
 0x6b8   :  { %9014 = vmatmul.mubr.msk.f32.gmra.mrb[86].mxu1 %vm15119_vm7, %v4320_v28  ;;  %vm14076_vm9 = vcmp.eq.s32.totalorder %v4200_v12, 15 }
 0x6b9   :  { %9016 = vmatprep.mubr.msk.f32.mxu1 %vm15119_vm7, %v13832_v27  ;;  %v15667_v27 = vmov 0  ;;  %v4328_v19 = vsel %vm14076_vm9, 0.0, %v13898_v47  ;;  %v7243_v47 = vld [vmem:[%s15020_s5 + $0xf8] sm:$0xff] }
 0x6ba   :  { %v15668_v27 = vsel %vm14065_vm11, 4294967295, %v15667_v27  ;;  %vm15673_vm11 = vcmp.lt.s32.totalorder %v10575_v22, 7 }
 0x6bc   :  { %9017 = vmatmul.mubr.msk.f32.gmra.mrb[88].mxu1 %vm15119_vm7, %v4322_v7 }
 0x6bd   :  { %9019 = vmatprep.mubr.msk.f32.mxu1 %vm15119_vm7, %v13850_v60  ;;  %v15670_v60 = vmov 0 }
 0x6be   :  { %v15671_v60 = vsel %vm14076_vm9, 4294967295, %v15670_v60 }
 0x6c0   :  { %9020 = vmatmul.mubr.msk.f32.gmra.mrb[90].mxu1 %vm15119_vm7, %v4324_v40  ;;  %v14165_v40 = vpack.c.bf16 %v5150_v39, %v5149_v35 }
 0x6c1   :  { %9022 = vmatprep.mubr.msk.f32.mxu1 %vm15119_vm7, %v13869_v10  ;;  %v7240_v10 = vld [vmem:[%s15020_s5 + $0xe0] sm:$0xff] }
 0x6c2   :  { %v9889_v25 = vpack.c.bf16 %v7241_v58, %v7240_v10  ;;  %v5151_v10 = vld [vmem:[%s15020_s5 + $0x70] sm:$0xff]  ;;  %v5152_v58 = vld [vmem:[%s15020_s5 + $0x78] sm:$0xff] }
 0x6c3   :  { %v14188_v53 = vpack.c.bf16 %v5152_v58, %v5151_v10 }
 0x6c4   :  { %9023 = vmatmul.mubr.msk.f32.gmra.mrb[92].mxu1 %vm15119_vm7, %v4326_v37  ;;  %9890 = vmatprep.subr.bf16.mxu0 %v9889_v25 }
 0x6c5   :  { %9025 = vmatprep.mubr.msk.f32.mxu1 %vm15119_vm7, %v13913_v8  ;;  %v7242_v8 = vld [vmem:[%s15020_s5 + $0xf0] sm:$0xff]  ;;  %9892 = vmatpush3.bf16.msra.mxu0 %v9889_v25 }
 0x6c6   :  { %v9893_v57 = vpack.c.bf16 %v7243_v47, %v7242_v8 }
 0x6c8   :  { %9026 = vmatmul.mubr.msk.f32.gmra.mrb[94].mxu1 %vm15119_vm7, %v4328_v19  ;;  %9894 = vmatprep.subr.bf16.mxu0 %v9893_v57 }
 0x6c9   :  { %9896 = vmatpush3.bf16.msra.mxu0 %v9893_v57  ;;  %9228 = vmatprep.mubr.f32.mxu1 %v5728_v1 }
 0x6ca   :  { %9898 = vmatprep.subr.bf16.mxu0 %v9897_v4 }
 0x77f   :  { %v9006_v51 = vpop.f32.mrb[80].mxu1 }
 0x780   :  { %v4957_v45 = vmul.f32 %v9006_v51, %v14107_v16  ;;  %v4856_v31 = vpop.f32.mrb[81].mxu1  ;;  %v7261_v51 = vld [vmem:[%s15020_s5 + $0x108] sm:$0xff] }
 0x781   :  { %v4956_v41 = vmul.f32 %v14107_v16, %v4856_v31  ;;  %v14206_v17 = vpack.c.bf16 %v7261_v51, %v7260_v9 }
 0x782   :  { %v4978_v61 = vadd.f32 %v14112_v29, %v4957_v45 }
 0x783   :  { %v4977_v2 = vadd.f32 %v14112_v29, %v4956_v41  ;;  %v9009_v56 = vpop.f32.mrb[82].mxu1 }
 0x784   :  { %vm4994_vm7 = vcmp.gt.f32.partialorder %v4978_v61, 0.0  ;;  %v5010_v13 = vmul.f32 0.01, %v4978_v61  ;;  %v4959_v46 = vmul.f32 %v9009_v56, %v14107_v16  ;;  %v4866_v42 = vpop.f32.mrb[83].mxu1 }
 0x785   :  { %v4958_v28 = vmul.f32 %v14107_v16, %v4866_v42  ;;  %vm4993_vm9 = vcmp.gt.f32.partialorder %v4977_v2, 0.0  ;;  %v5009_v62 = vmul.f32 0.01, %v4977_v2 }
 0x786   :  { %v4980_v6 = vadd.f32 %v14112_v29, %v4959_v46  ;;  %v5026_v7 = vsel %vm4994_vm7, %v4978_v61, %v5010_v13  ;;  %vm15672_vm7 = vcmp.lt.s32.totalorder %v10575_v22, 1 }
 0x787   :  { %v4979_v63 = vadd.f32 %v14112_v29, %v4958_v28  ;;  %v9012_v12 = vpop.f32.mrb[84].mxu1  ;;  %v14168_v37 = vsel %vm4993_vm9, %v4977_v2, %v5009_v62  ;;  %v5042_v19 = vrot.slane %v5026_v7, 7  ;;  %v5090_v25 = vrot.slane %v5026_v7, 1 }
 0x788   :  { %v4961_v8 = vmul.f32 %v9012_v12, %v14107_v16  ;;  %v4876_v47 = vpop.f32.mrb[85].mxu1  ;;  %v15126_v57 = vrot.slane %v14168_v37, 7  ;;  %v15125_v49 = vrot.slane %v14168_v37, 1  ;;  %9060 = vmatprep.mubr.f32.mxu0 %v14168_v37  ;;  %v5012_v31 = vmul.f32 0.01, %v4980_v6 }
 0x789   :  { %v4960_v15 = vmul.f32 %v14107_v16, %v4876_v47  ;;  %9061 = vmatmul.mubr.f32.vlgmr.msra.gmra.mrb[80].mxu0 %v5026_v7  ;;  %vm4995_vm9 = vcmp.gt.f32.partialorder %v4979_v63, 0.0  ;;  %v5011_v45 = vmul.f32 0.01, %v4979_v63  ;;  %vm15674_vm10 = vcmp.gt.f32.partialorder %v4980_v6, 0.0 }
 0x78a   :  { %v4982_v36 = vadd.f32 %v14112_v29, %v4961_v8  ;;  %9900 = vmatpush3.bf16.msra.mxu0 %v9897_v4  ;;  %v14194_v18 = vsel %vm15672_vm7, %v15126_v57, %v5042_v19  ;;  %v14200_v41 = vsel %vm15673_vm11, %v15125_v49, %v5090_v25  ;;  %v14204_v4 = vsel %vm15674_vm10, %v4980_v6, %v5012_v31 }
 0x78b   :  { %v4981_v14 = vadd.f32 %v14112_v29, %v4960_v15  ;;  %v9015_v59 = vpop.f32.mrb[86].mxu1  ;;  %v5027_v61 = vsel %vm4995_vm9, %v4979_v63, %v5011_v45  ;;  %9902 = vmatprep.subr.bf16.mxu0 %v9901_v20  ;;  %v5044_v3 = vrot.slane %v14204_v4, 7  ;;  %v15127_v39 = vrot.slane %v14204_v4, 1  ;;  %vm15675_vm9 = vmmov %vm15672_vm7 }
 0x78c   :  { %v4963_v0 = vmul.f32 %v9015_v59, %v14107_v16  ;;  %v4886_v43 = vpop.f32.mrb[87].mxu1  ;;  %v5043_v2 = vrot.slane %v5027_v61, 7  ;;  %v5091_v56 = vrot.slane %v5027_v61, 1  ;;  %9063 = vmatprep.mubr.f32.mxu0 %v5027_v61  ;;  %vm4998_vm10 = vcmp.gt.f32.partialorder %v4982_v36, 0.0 }
 0x78d   :  { %v4962_v35 = vmul.f32 %v14107_v16, %v4886_v43  ;;  %9064 = vmatmul.mubr.f32.gmra.mrb[82].mxu0 %v14204_v4  ;;  %vm4997_vm11 = vcmp.gt.f32.partialorder %v4981_v14, 0.0  ;;  %v5013_v13 = vmul.f32 0.01, %v4981_v14  ;;  %v5014_v42 = vmul.f32 0.01, %v4982_v36 }
 0x78e   :  { %v4984_v46 = vadd.f32 %v14112_v29, %v4963_v0  ;;  %9904 = vmatpush3.bf16.msra.mxu0 %v9901_v20  ;;  %v14216_v28 = vsel %vm15672_vm7, %v5042_v19, %v5043_v2  ;;  %v14224_v63 = vsel %vm15675_vm9, %v5043_v2, %v5044_v3  ;;  %v14228_v20 = vsel %vm15676_vm8, %v5090_v25, %v5091_v56 }
 0x78f   :  { %v4983_v62 = vadd.f32 %v14112_v29, %v4962_v35  ;;  %v9018_v6 = vpop.f32.mrb[88].mxu1  ;;  %v14219_v7 = vsel %vm4997_vm11, %v4981_v14, %v5013_v13  ;;  %9906 = vmatprep.subr.bf16.mxu0 %v14145_v23  ;;  %v14234_v8 = vsel %vm4998_vm10, %v4982_v36, %v5014_v42  ;;  %vm15677_vm10 = vmmov %vm15672_vm7  ;;  %vm15678_vm9 = vcmp.lt.s32.totalorder %v10575_v22, 7 }
 0x790   :  { %v4965_v12 = vmul.f32 %v9018_v6, %v14107_v16  ;;  %v4896_v10 = vpop.f32.mrb[89].mxu1  ;;  %v5045_v19 = vrot.slane %v14219_v7, 7  ;;  %v5093_v58 = vrot.slane %v14219_v7, 1  ;;  %9066 = vmatprep.mubr.f32.mxu0 %v14219_v7  ;;  %v5046_v9 = vrot.slane %v14234_v8, 7 }
 0x791   :  { %v4964_v47 = vmul.f32 %v14107_v16, %v4896_v10  ;;  %9067 = vmatmul.mubr.f32.gmra.mrb[84].mxu0 %v14234_v8  ;;  %vm4999_vm8 = vcmp.gt.f32.partialorder %v4983_v62, 0.0  ;;  %v5015_v15 = vmul.f32 0.01, %v4983_v62  ;;  %vm5000_vm11 = vcmp.gt.f32.partialorder %v4984_v46, 0.0 }
 0x792   :  { %v4986_v25 = vadd.f32 %v14112_v29, %v4965_v12  ;;  %9908 = vmatpush3.bf16.msra.mxu0 %v14145_v23  ;;  %v5016_v45 = vmul.f32 0.01, %v4984_v46  ;;  %v14246_v14 = vsel %vm15677_vm10, %v5044_v3, %v5045_v19  ;;  %v14250_v59 = vsel %vm15672_vm7, %v5045_v19, %v5046_v9  ;;  %vm15680_vm10 = vmmov %vm15672_vm7 }
 0x793   :  { %v4985_v31 = vadd.f32 %v14112_v29, %v4964_v47  ;;  %v9021_v36 = vpop.f32.mrb[90].mxu1  ;;  %9910 = vmatprep.subr.bf16.mxu0 %v14157_v48  ;;  %v14256_v23 = vsel %vm15678_vm9, %v5091_v56, %v15127_v39  ;;  %v14259_v43 = vsel %vm4999_vm8, %v4983_v62, %v5015_v15 }
 0x794   :  { %v4967_v61 = vmul.f32 %v9021_v36, %v14107_v16  ;;  %v4906_v0 = vpop.f32.mrb[91].mxu1  ;;  %v14261_v2 = vsel %vm5000_vm11, %v4984_v46, %v5016_v45  ;;  %vm5002_vm6 = vcmp.gt.f32.partialorder %v4986_v25, 0.0  ;;  %v5047_v35 = vrot.slane %v14259_v43, 7  ;;  %9069 = vmatprep.mubr.f32.mxu0 %v14259_v43  ;;  %vm15679_vm11 = vmmov %vm15672_vm7 }
 0x795   :  { %v4966_v3 = vmul.f32 %v14107_v16, %v4906_v0  ;;  %v5048_v42 = vrot.slane %v14261_v2, 7  ;;  %9070 = vmatmul.mubr.f32.gmra.mrb[86].mxu0 %v14261_v2  ;;  %vm5001_vm8 = vcmp.gt.f32.partialorder %v4985_v31, 0.0  ;;  %v5017_v46 = vmul.f32 0.01, %v4985_v31 }
 0x796   :  { %v4988_v56 = vadd.f32 %v14112_v29, %v4967_v61  ;;  %9912 = vmatpush3.bf16.msra.mxu0 %v14157_v48  ;;  %v5018_v10 = vmul.f32 0.01, %v4986_v25  ;;  %v14275_v19 = vsel %vm15679_vm11, %v5046_v9, %v5047_v35  ;;  %v15693_v7 = vrot.slane %v14261_v2, 1  ;;  %v7263_v2 = vld [vmem:[%s15020_s5 + $0x118] sm:$0xff] }
 0x797   :  { %v4987_v62 = vadd.f32 %v14112_v29, %v4966_v3  ;;  %v9024_v12 = vpop.f32.mrb[92].mxu1  ;;  %v14279_v47 = vsel %vm15680_vm10, %v5047_v35, %v5048_v42  ;;  %v14282_v36 = vsel %vm5001_vm8, %v4985_v31, %v5017_v46  ;;  %9914 = vmatprep.subr.bf16.mxu0 %v14160_v5 }
 0x798   :  { %v4969_v15 = vmul.f32 %v9024_v12, %v14107_v16  ;;  %v4916_v45 = vpop.f32.mrb[93].mxu1  ;;  %vm5004_vm7 = vcmp.gt.f32.partialorder %v4988_v56, 0.0  ;;  %v5020_v61 = vmul.f32 0.01, %v4988_v56  ;;  %v5049_v0 = vrot.slane %v14282_v36, 7  ;;  %9072 = vmatprep.mubr.f32.mxu0 %v14282_v36 }
 0x799   :  { %v4968_v48 = vmul.f32 %v14107_v16, %v4916_v45  ;;  %v14290_v3 = vsel %vm5002_vm6, %v4986_v25, %v5018_v10  ;;  %vm5003_vm9 = vcmp.gt.f32.partialorder %v4987_v62, 0.0  ;;  %v5019_v49 = vmul.f32 0.01, %v4987_v62  ;;  %vm15681_vm6 = vmmov %vm15680_vm10 }
 0x79a   :  { %v4990_v35 = vadd.f32 %v14112_v29, %v4969_v15  ;;  %v5050_v31 = vrot.slane %v14290_v3, 7  ;;  %9073 = vmatmul.mubr.f32.gmra.mrb[88].mxu0 %v14290_v3  ;;  %v5036_v57 = vsel %vm5004_vm7, %v4988_v56, %v5020_v61  ;;  %v14301_v25 = vsel %vm15681_vm6, %v5048_v42, %v5049_v0  ;;  %vm15682_vm10 = vmmov %vm15681_vm6 }
 0x79b   :  { %v4989_v12 = vadd.f32 %v14112_v29, %v4968_v48  ;;  %9916 = vmatpush3.bf16.msra.mxu0 %v14160_v5  ;;  %v9027_v45 = vpop.f32.mrb[94].mxu1  ;;  %v5052_v9 = vrot.slane %v5036_v57, 7  ;;  %v5100_v46 = vrot.slane %v5036_v57, 1  ;;  %v5035_v6 = vsel %vm5003_vm9, %v4987_v62, %v5019_v49 }
 0x79c   :  { %v4971_v10 = vmul.f32 %v9027_v45, %v14107_v16  ;;  %v4926_v15 = vpop.f32.mrb[95].mxu1  ;;  %9918 = vmatprep.subr.bf16.mxu0 %v14163_v21  ;;  %vm5006_vm8 = vcmp.gt.f32.partialorder %v4990_v35, 0.0  ;;  %v5051_v56 = vrot.slane %v5035_v6, 7  ;;  %v5099_v61 = vrot.slane %v5035_v6, 1  ;;  %9075 = vmatprep.mubr.f32.mxu0 %v5035_v6 }
 0x79d   :  { %v4970_v48 = vmul.f32 %v14107_v16, %v4926_v15  ;;  %vm5005_vm11 = vcmp.gt.f32.partialorder %v4989_v12, 0.0  ;;  %v5021_v5 = vmul.f32 0.01, %v4989_v12  ;;  %v5022_v42 = vmul.f32 0.01, %v4990_v35 }
 0x79e   :  { %v4992_v13 = vadd.f32 %v14112_v29, %v4971_v10  ;;  %9076 = vmatmul.mubr.f32.gmra.mrb[90].mxu0 %v5036_v57  ;;  %v14310_v39 = vsel %vm15682_vm10, %v5049_v0, %v5050_v31  ;;  %v15683_v16 = vrot.slane %v14204_v4, 1  ;;  %vm15684_vm7 = vcmp.lt.s32.totalorder %v10575_v22, 7 }
 0x79f   :  { %v4991_v51 = vadd.f32 %v14112_v29, %v4970_v48  ;;  %v5037_v45 = vsel %vm5005_vm11, %v4989_v12, %v5021_v5  ;;  %9920 = vmatpush3.bf16.msra.mxu0 %v14163_v21  ;;  %v5038_v29 = vsel %vm5006_vm8, %v4990_v35, %v5022_v42  ;;  %vm15685_vm11 = vmmov %vm15682_vm10  ;;  %v14329_v21 = vsel %vm15682_vm10, %v5051_v56, %v5052_v9 }
 0x7a0   :  { %v14318_v49 = vsel %vm15684_vm7, %v15683_v16, %v5093_v58  ;;  %v5053_v6 = vrot.slane %v5037_v45, 7  ;;  %v5101_v62 = vrot.slane %v5037_v45, 1  ;;  %9078 = vmatprep.mubr.f32.mxu0 %v5037_v45  ;;  %vm5008_vm9 = vcmp.gt.f32.partialorder %v4992_v13, 0.0  ;;  %9922 = vmatprep.subr.bf16.mxu0 %v14165_v40  ;;  %vm15686_vm7 = vmmov %vm15682_vm10 }
 0x7a1   :  { %v5054_v57 = vrot.slane %v5038_v29, 7  ;;  %v5102_v12 = vrot.slane %v5038_v29, 1  ;;  %vm5007_vm6 = vcmp.gt.f32.partialorder %v4991_v51, 0.0  ;;  %v5023_v0 = vmul.f32 0.01, %v4991_v51  ;;  %vm15687_vm8 = vmmov %vm15686_vm7 }
 0x7a2   :  { %v5024_v10 = vmul.f32 0.01, %v4992_v13  ;;  %v14325_v4 = vsel %vm15685_vm11, %v5050_v31, %v5051_v56  ;;  %v14333_v15 = vsel %vm15686_vm7, %v5052_v9, %v5053_v6  ;;  %9079 = vmatmul.mubr.f32.gmra.mrb[92].mxu0 %v5038_v29  ;;  %v15688_v5 = vrot.slane %v14234_v8, 1  ;;  %vm7244_vm7 = vmneg %vm13872_vm4 }
 0x7a3   :  { %v5039_v35 = vsel %vm5007_vm6, %v4991_v51, %v5023_v0  ;;  %v14337_v48 = vsel %vm15687_vm8, %v5053_v6, %v5054_v57  ;;  %vm15689_vm11 = vcmp.lt.s32.totalorder %v10575_v22, 7  ;;  %v15690_v56 = vrot.slane %v14259_v43, 1  ;;  %9924 = vmatpush3.bf16.msra.mxu0 %v14165_v40 }
 0x7a4   :  { %v14345_v31 = vsel %vm15689_vm11, %v5093_v58, %v15688_v5  ;;  %v15691_v42 = vmov %v15688_v5  ;;  %vm15692_vm10 = vmmov %vm15689_vm11  ;;  %v5055_v51 = vrot.slane %v5039_v35, 7  ;;  %v5103_v45 = vrot.slane %v5039_v35, 1  ;;  %9081 = vmatprep.mubr.f32.mxu0 %v5039_v35  ;;  %9926 = vmatprep.subr.bf16.mxu0 %v14188_v53 }
 0x7a5   :  { %v14353_v9 = vsel %vm15692_vm10, %v15691_v42, %v15690_v56  ;;  %v5040_v16 = vsel %vm5008_vm9, %v4992_v13, %v5024_v10  ;;  %v15694_v58 = vmov %v15690_v56  ;;  %vm15695_vm6 = vmmov %vm15692_vm10  ;;  %v15696_v40 = vrot.slane %v14282_v36, 1 }
 0x7a6   :  { %v14363_v6 = vsel %vm15695_vm6, %v15694_v58, %v15693_v7  ;;  %v5056_v8 = vrot.slane %v5040_v16, 7  ;;  %v5104_v29 = vrot.slane %v5040_v16, 1  ;;  %v15697_v0 = vmov %v15693_v7  ;;  %vm15698_vm9 = vmmov %vm15695_vm6  ;;  %9082 = vmatmul.mubr.f32.gmra.mrb[94].mxu0 %v5040_v16 }
 0x7a7   :  { %v14374_v13 = vsel %vm15698_vm9, %v15697_v0, %v15696_v40  ;;  %v15699_v43 = vrot.slane %v14290_v3, 1  ;;  %v15700_v10 = vmov %v15696_v40  ;;  %vm15701_vm8 = vmmov %vm15695_vm6  ;;  %vm15702_vm4 = vcmp.lt.s32.totalorder %v10575_v22, 1  ;;  %9928 = vmatpush3.bf16.msra.mxu0 %v14188_v53  ;;  %v7264_v53 = vld [vmem:[%s15020_s5 + $0x120] sm:$0xff] }
 0x7a8   :  { %v14392_v5 = vsel %vm15702_vm4, %v5054_v57, %v5055_v51  ;;  %vm15704_vm11 = vmmov %vm15695_vm6  ;;  %v14406_v7 = vsel %vm15695_vm6, %v5100_v46, %v5101_v62  ;;  %v15706_v58 = vrot.slane %v14168_v37, 7  ;;  %v15712_v16 = vrot.slane %v14168_v37, 1  ;;  %9930 = vmatprep.subr.bf16.mxu0 %v14206_v17  ;;  %v7267_v37 = vld [vmem:[%s15020_s5 + $0x138] sm:$0xff] }
 0x7a9   :  { %v14382_v35 = vsel %vm15701_vm8, %v15700_v10, %v15699_v43  ;;  %v15703_v56 = vmov %v15699_v43  ;;  %vm15705_vm10 = vmmov %vm15695_vm6  ;;  %v9941_v44 = vpack.c.bf16 %v7267_v37, %v7266_v34 }
 0x7aa   :  { %v14398_v36 = vsel %vm15704_vm11, %v15703_v56, %v5099_v61  ;;  %v14402_v42 = vsel %vm15705_vm10, %v5099_v61, %v5100_v46  ;;  %vm15707_vm9 = vmmov %vm15702_vm4 }
 0x7ab   :  { %v5072_v57 = vsel %vm15707_vm9, %v5056_v8, %v15706_v58  ;;  %vm15708_vm8 = vmmov %vm15702_vm4 }
 0x7ac   :  { %v5057_v3 = vsel %vm15708_vm8, %v5055_v51, %v5056_v8  ;;  %vm15709_vm4 = vmmov %vm15695_vm6  ;;  %9116 = vmatprep.mubr.msk.f32.mxu0 %vm7244_vm7, %v5072_v57  ;;  %vm15714_vm8 = vnez %v15658_v52  ;;  %v14542_v52 = vld [vmem:[%s15015_s14 + $0x9] ss:$0 sm:$0xff] }
 0x7ad   :  { %v14416_v40 = vsel %vm15709_vm4, %v5101_v62, %v5102_v12  ;;  %vm15710_vm11 = vmmov %vm15709_vm4  ;;  %v9933_v62 = vpack.c.bf16 %v7263_v2, %v7262_v30  ;;  %9117 = vmatmul.mubr.f32.vlgmr.msra.gmra.mrb[80].mxu0 %v14194_v18  ;;  %v7268_v18 = vld [vmem:[%s15020_s5 + $0x140] sm:$0xff] }
 0x7ae   :  { %v14420_v61 = vsel %vm15710_vm11, %v5102_v12, %v5103_v45  ;;  %vm15711_vm10 = vmmov %vm15709_vm4  ;;  %v7265_v12 = vld [vmem:[%s15020_s5 + $0x128] sm:$0xff]  ;;  %9932 = vmatpush3.bf16.msra.mxu0 %v14206_v17 }
 0x7af   :  { %v14425_v46 = vsel %vm15711_vm10, %v5103_v45, %v5104_v29  ;;  %vm15713_vm6 = vmmov %vm15709_vm4  ;;  %9934 = vmatprep.subr.bf16.mxu0 %v9933_v62  ;;  %v9937_v22 = vpack.c.bf16 %v7265_v12, %v7264_v53  ;;  %v7269_v17 = vld [vmem:[%s15020_s5 + $0x148] sm:$0xff] }
 0x7b0   :  { %v14431_v51 = vsel %vm15713_vm6, %v5104_v29, %v15712_v16  ;;  %vm7246_vm9 = vmneg %vm13877_vm5  ;;  %v9945_v24 = vpack.c.bf16 %v7269_v17, %v7268_v18  ;;  %vm15717_vm6 = vnez %v15666_v38 }
 0x7b1   :  { %9119 = vmatprep.mubr.msk.f32.mxu0 %vm7246_vm9, %v14216_v28  ;;  %vm7248_vm7 = vmneg %vm13927_vm14  ;;  %v7270_v28 = vld [vmem:[%s15020_s5 + $0x150] sm:$0xff] }
 0x7b2   :  { %9120 = vmatmul.mubr.f32.gmra.mrb[82].mxu0 %v14224_v63  ;;  %vm7250_vm5 = vmneg %vm13944_vm12  ;;  %v7271_v63 = vld [vmem:[%s15020_s5 + $0x158] sm:$0xff] }
 0x7b3   :  { %9122 = vmatprep.mubr.msk.f32.mxu0 %vm7248_vm7, %v14246_v14  ;;  %9936 = vmatpush3.bf16.msra.mxu0 %v9933_v62  ;;  %vm7252_vm14 = vmneg %vm13956_vm3  ;;  %v9949_v32 = vpack.c.bf16 %v7271_v63, %v7270_v28  ;;  %v7272_v14 = vld [vmem:[%s15020_s5 + $0x160] sm:$0xff]  ;;  %vm15718_vm7 = vnez %v15668_v27 }
 0x7b4   :  { %9938 = vmatprep.subr.bf16.mxu0 %v9937_v22  ;;  %vm7254_vm12 = vmneg %vm13966_vm0 }
 0x7b5   :  { %vm7256_vm3 = vmneg %vm13978_vm2 }
 0x7b6   :  { %9123 = vmatmul.mubr.f32.gmra.mrb[84].mxu0 %v14250_v59  ;;  %v7273_v59 = vld [vmem:[%s15020_s5 + $0x168] sm:$0xff]  ;;  %vm7258_vm0 = vmneg %vm13989_vm13 }
 0x7b7   :  { %9125 = vmatprep.mubr.msk.f32.mxu0 %vm7250_vm5, %v14275_v19  ;;  %9940 = vmatpush3.bf16.msra.mxu0 %v9937_v22  ;;  %v9953_v33 = vpack.c.bf16 %v7273_v59, %v7272_v14  ;;  %v7274_v19 = vld [vmem:[%s15020_s5 + $0x170] sm:$0xff]  ;;  %vm7276_vm2 = vmneg %vm13999_vm1  ;;  %vm15715_vm1 = vnez %v15661_v54 }
 0x7b8   :  { %9942 = vmatprep.subr.bf16.mxu0 %v9941_v44  ;;  %vm7278_vm13 = vmneg %vm14011_vm15  ;;  %vm15716_vm15 = vnez %v15663_v11 }
 0x7b9   :  { %vm7280_vm4 = vmneg %vm15714_vm8 }
 0x7ba   :  { %9126 = vmatmul.mubr.f32.gmra.mrb[86].mxu0 %v14279_v47  ;;  %v7275_v47 = vld [vmem:[%s15020_s5 + $0x178] sm:$0xff]  ;;  %vm7282_vm11 = vmneg %vm15715_vm1 }
 0x7bb   :  { %9128 = vmatprep.mubr.msk.f32.mxu0 %vm7252_vm14, %v14301_v25  ;;  %9944 = vmatpush3.bf16.msra.mxu0 %v9941_v44  ;;  %v9957_v55 = vpack.c.bf16 %v7275_v47, %v7274_v19  ;;  %vm7284_vm10 = vmneg %vm15716_vm15  ;;  %vm15719_vm14 = vnez %v15671_v60 }
 0x7bc   :  { %9946 = vmatprep.subr.bf16.mxu0 %v9945_v24  ;;  %vm7286_vm9 = vmneg %vm15717_vm6 }
 0x7bd   :  { %vm7288_vm5 = vmneg %vm15718_vm7 }
 0x7be   :  { %9129 = vmatmul.mubr.f32.gmra.mrb[88].mxu0 %v14310_v39 }
 0x7bf   :  { %9131 = vmatprep.mubr.msk.f32.mxu0 %vm7254_vm12, %v14325_v4  ;;  %9948 = vmatpush3.bf16.msra.mxu0 %v9945_v24  ;;  %vm7290_vm12 = vmneg %vm15719_vm14 }
 0x7c0   :  { %9950 = vmatprep.subr.bf16.mxu0 %v9949_v32 }
 0x7c2   :  { %9132 = vmatmul.mubr.f32.gmra.mrb[90].mxu0 %v14329_v21 }
 0x7c3   :  { %9134 = vmatprep.mubr.msk.f32.mxu0 %vm7256_vm3, %v14333_v15  ;;  %9952 = vmatpush3.bf16.msra.mxu0 %v9949_v32 }
 0x7c4   :  { %9954 = vmatprep.subr.bf16.mxu0 %v9953_v33 }
 0x7c6   :  { %9135 = vmatmul.mubr.f32.gmra.mrb[92].mxu0 %v14337_v48 }
 0x7c7   :  { %9137 = vmatprep.mubr.msk.f32.mxu0 %vm7258_vm0, %v14392_v5  ;;  %9956 = vmatpush3.bf16.msra.mxu0 %v9953_v33 }
 0x7c8   :  { %9958 = vmatprep.subr.bf16.mxu0 %v9957_v55 }
 0x7ca   :  { %9138 = vmatmul.mubr.f32.gmra.mrb[94].mxu0 %v5057_v3 }
 0x7cb   :  { %9960 = vmatpush3.bf16.msra.mxu0 %v9957_v55  ;;  %9172 = vmatprep.mubr.f32.mxu0 %v14200_v41 }
 0x7ce   :  { %9173 = vmatmul.mubr.msk.f32.vlgmr.msra.gmra.mrb[80].mxu0 %vm7276_vm2, %v14228_v20 }
 0x7cf   :  { %9175 = vmatprep.mubr.f32.mxu0 %v14256_v23 }
 0x7d2   :  { %9176 = vmatmul.mubr.msk.f32.gmra.mrb[82].mxu0 %vm7278_vm13, %v14318_v49 }
 0x7d3   :  { %9178 = vmatprep.mubr.f32.mxu0 %v14345_v31 }
 0x7d6   :  { %9179 = vmatmul.mubr.msk.f32.gmra.mrb[84].mxu0 %vm7280_vm4, %v14353_v9 }
 0x7d7   :  { %9181 = vmatprep.mubr.f32.mxu0 %v14363_v6 }
 0x7da   :  { %9182 = vmatmul.mubr.msk.f32.gmra.mrb[86].mxu0 %vm7282_vm11, %v14374_v13 }
 0x7db   :  { %9184 = vmatprep.mubr.f32.mxu0 %v14382_v35 }
 0x7de   :  { %9185 = vmatmul.mubr.msk.f32.gmra.mrb[88].mxu0 %vm7284_vm10, %v14398_v36 }
 0x7df   :  { %9187 = vmatprep.mubr.f32.mxu0 %v14402_v42 }
 0x7e2   :  { %9188 = vmatmul.mubr.msk.f32.gmra.mrb[90].mxu0 %vm7286_vm9, %v14406_v7 }
 0x7e3   :  { %9190 = vmatprep.mubr.f32.mxu0 %v14416_v40 }
 0x7e6   :  { %9191 = vmatmul.mubr.msk.f32.gmra.mrb[92].mxu0 %vm7288_vm5, %v14420_v61 }
 0x7e7   :  { %9193 = vmatprep.mubr.f32.mxu0 %v14425_v46 }
 0x7ea   :  { %9194 = vmatmul.mubr.msk.f32.gmra.mrb[94].mxu0 %vm7290_vm12, %v14431_v51 }
 0x8a1   :  { %v9174_v26 = vpop.f32.mrb[80].mxu0 }
 0x8a2   :  { %v5644_v54 = vmul.f32 %v9174_v26, %v14537_v50  ;;  %v5543_v11 = vpop.f32.mrb[81].mxu0 }
 0x8a3   :  { %v5643_v38 = vmul.f32 %v14537_v50, %v5543_v11 }
 0x8a4   :  { %v5665_v27 = vadd.f32 %v14542_v52, %v5644_v54 }
 0x8a5   :  { %v5664_v60 = vadd.f32 %v14542_v52, %v5643_v38  ;;  %v9177_v41 = vpop.f32.mrb[82].mxu0 }
 0x8a6   :  { %vm5681_vm3 = vcmp.gt.f32.partialorder %v5665_v27, 0.0  ;;  %v5697_v39 = vmul.f32 0.01, %v5665_v27  ;;  %v5646_v20 = vmul.f32 %v9177_v41, %v14537_v50  ;;  %v5553_v23 = vpop.f32.mrb[83].mxu0 }
 0x8a7   :  { %vm5680_vm0 = vcmp.gt.f32.partialorder %v5664_v60, 0.0  ;;  %v5696_v25 = vmul.f32 0.01, %v5664_v60  ;;  %v5645_v49 = vmul.f32 %v14537_v50, %v5553_v23 }
 0x8a8   :  { %v5667_v4 = vadd.f32 %v14542_v52, %v5646_v20  ;;  %v5713_v21 = vsel %vm5681_vm3, %v5665_v27, %v5697_v39  ;;  %vm10444_vm3 = vmmov 0  }
 0x8a9   :  { %v5666_v15 = vadd.f32 %v14542_v52, %v5645_v49  ;;  %v9180_v48 = vpop.f32.mrb[84].mxu0  ;;  %v5712_v31 = vsel %vm5680_vm0, %v5664_v60, %v5696_v25  ;;  %vm15720_vm0 = vcmask 523264  }
 0x8aa   :  { %vm5683_vm2 = vcmp.gt.f32.partialorder %v5667_v4, 0.0  ;;  %v5699_v9 = vmul.f32 0.01, %v5667_v4  ;;  %v5648_v45 = vmul.f32 %v9180_v48, %v14537_v50  ;;  %v5563_v6 = vpop.f32.mrb[85].mxu0  ;;  %v9961_v8 = vpack.c.bf16 %v5713_v21, %v5712_v31 }
 0x8ab   :  { %vm5682_vm13 = vcmp.gt.f32.partialorder %v5666_v15, 0.0  ;;  %v5698_v29 = vmul.f32 0.01, %v5666_v15  ;;  %v5647_v0 = vmul.f32 %v14537_v50, %v5563_v6 }
 0x8ac   :  { %v5669_v13 = vadd.f32 %v14542_v52, %v5648_v45  ;;  %9962 = vmatprep.subr.bf16.mxu1 %v9961_v8  ;;  %v5715_v43 = vsel %vm5683_vm2, %v5667_v4, %v5699_v9  ;;  %vm15721_vm2 = vmmov %vm15720_vm0 }
 0x8ad   :  { %v5668_v10 = vadd.f32 %v14542_v52, %v5647_v0  ;;  %v9183_v35 = vpop.f32.mrb[86].mxu0  ;;  %9964 = vmatpush3.bf16.msra.mxu1 %v9961_v8  ;;  %v5714_v30 = vsel %vm5682_vm13, %v5666_v15, %v5698_v29  ;;  %vm15722_vm13 = vmmov %vm15720_vm0 }
 0x8ae   :  { %vm5685_vm8 = vcmp.gt.f32.partialorder %v5669_v13, 0.0  ;;  %v5701_v2 = vmul.f32 0.01, %v5669_v13  ;;  %v5650_v5 = vmul.f32 %v9183_v35, %v14537_v50  ;;  %v5573_v56 = vpop.f32.mrb[87].mxu0  ;;  %v9965_v36 = vpack.c.bf16 %v5715_v43, %v5714_v30  ;;  %v5843_v30 = vld [vmem:[%s15022_s9 + $0x10] sm:$0xff] }
 0x8af   :  { %vm5684_vm4 = vcmp.gt.f32.partialorder %v5668_v10, 0.0  ;;  %v5700_v42 = vmul.f32 0.01, %v5668_v10  ;;  %v5649_v7 = vmul.f32 %v14537_v50, %v5573_v56  ;;  %v5730_v56 = vld [vmem:[%s15021_s8 + $0x10] sm:$0xff] }
 0x8b0   :  { %v5671_v58 = vadd.f32 %v14542_v52, %v5650_v5  ;;  %9966 = vmatprep.subr.bf16.mxu1 %v9965_v36  ;;  %v5717_v57 = vsel %vm5685_vm8, %v5669_v13, %v5701_v2  ;;  %v5841_v13 = vld [vmem:[%s15022_s9] sm:$0xff]  ;;  %v5844_v2 = vld [vmem:[%s15022_s9 + $0x18] sm:$0xff]  ;;  %v5729_v5 = vld [vmem:[%s15021_s8 + $0x8] sm:$0xff] }
 0x8b1   :  { %v5670_v3 = vadd.f32 %v14542_v52, %v5649_v7  ;;  %v9186_v40 = vpop.f32.mrb[88].mxu0  ;;  %9968 = vmatpush3.bf16.msra.mxu1 %v9965_v36  ;;  %v5716_v61 = vsel %vm5684_vm4, %v5668_v10, %v5700_v42  ;;  %v9997_v36 = vpack.c.bf16 %v5844_v2, %v5843_v30  ;;  %v5845_v42 = vld [vmem:[%s15022_s9 + $0x20] sm:$0xff]  ;;  %v5846_v7 = vld [vmem:[%s15022_s9 + $0x28] sm:$0xff]  ;;  %vm15723_vm8 = vmmov %vm15720_vm0 }
 0x8b2   :  { %vm5687_vm1 = vcmp.gt.f32.partialorder %v5671_v58, 0.0  ;;  %v5703_v46 = vmul.f32 0.01, %v5671_v58  ;;  %v5652_v16 = vmul.f32 %v9186_v40, %v14537_v50  ;;  %v5583_v51 = vpop.f32.mrb[89].mxu0  ;;  %v9969_v62 = vpack.c.bf16 %v5717_v57, %v5716_v61  ;;  %v5732_v57 = vld [vmem:[%s15021_s8 + $0x20] sm:$0xff]  ;;  %v5847_v40 = vld [vmem:[%s15022_s9 + $0x30] sm:$0xff]  ;;  %vm15724_vm4 = vmmov %vm15720_vm0 }
 0x8b3   :  { %vm5686_vm11 = vcmp.gt.f32.partialorder %v5670_v3, 0.0  ;;  %v5702_v53 = vmul.f32 0.01, %v5670_v3  ;;  %v5651_v12 = vmul.f32 %v14537_v50, %v5583_v51  ;;  %v5848_v61 = vld [vmem:[%s15022_s9 + $0x38] sm:$0xff]  ;;  %v6636_v2 = vld [vmem:[%s15024_s11 + $0x40] sm:$0xff] }
 0x8b4   :  { %v5673_v22 = vadd.f32 %v14542_v52, %v5652_v16  ;;  %9970 = vmatprep.subr.bf16.mxu1 %v9969_v62  ;;  %v5719_v34 = vsel %vm5687_vm1, %v5671_v58, %v5703_v46  ;;  %v5731_v58 = vld [vmem:[%s15021_s8 + $0x18] sm:$0xff]  ;;  %v5733_v46 = vld [vmem:[%s15021_s8 + $0x28] sm:$0xff]  ;;  %v5734_v16 = vld [vmem:[%s15021_s8 + $0x30] sm:$0xff]  ;;  %v10005_v51 = vpack.c.bf16 %v5848_v61, %v5847_v40 }
 0x8b5   :  { %v5672_v37 = vadd.f32 %v14542_v52, %v5651_v12  ;;  %v9189_v44 = vpop.f32.mrb[90].mxu0  ;;  %9972 = vmatpush3.bf16.msra.mxu1 %v9969_v62  ;;  %v5718_v18 = vsel %vm5686_vm11, %v5670_v3, %v5702_v53  ;;  %v10001_v3 = vpack.c.bf16 %v5846_v7, %v5845_v42  ;;  %v5849_v62 = vld [vmem:[%s15022_s9 + $0x40] sm:$0xff]  ;;  %v5850_v53 = vld [vmem:[%s15022_s9 + $0x48] sm:$0xff]  ;;  %v5735_v12 = vld [vmem:[%s15021_s8 + $0x38] sm:$0xff] }
 0x8b6   :  { %vm5689_vm15 = vcmp.gt.f32.partialorder %v5673_v22, 0.0  ;;  %v5705_v17 = vmul.f32 0.01, %v5673_v22  ;;  %v5654_v24 = vmul.f32 %v9189_v44, %v14537_v50  ;;  %v5593_v28 = vpop.f32.mrb[91].mxu0  ;;  %v9973_v63 = vpack.c.bf16 %v5719_v34, %v5718_v18  ;;  %v5851_v34 = vld [vmem:[%s15022_s9 + $0x50] sm:$0xff]  ;;  %v5853_v18 = vld [vmem:[%s15022_s9 + $0x60] sm:$0xff]  ;;  %vm15725_vm1 = vmmov %vm15720_vm0 }
 0x8b7   :  { %vm5688_vm10 = vcmp.gt.f32.partialorder %v5672_v37, 0.0  ;;  %v5704_v32 = vmul.f32 0.01, %v5672_v37  ;;  %v5653_v14 = vmul.f32 %v14537_v50, %v5593_v28  ;;  %v5855_v28 = vld [vmem:[%s15022_s9 + $0x70] sm:$0xff]  ;;  %v6639_v40 = vld [vmem:[%s15024_s11 + $0x58] sm:$0xff]  ;;  %v6063_v61 = vld [vmem:[%s15023_s10 + $0xe0] sm:$0xff] }
 0x8b8   :  { %v5675_v59 = vadd.f32 %v14542_v52, %v5654_v24  ;;  %9974 = vmatprep.subr.bf16.mxu1 %v9973_v63  ;;  %v5721_v33 = vsel %vm5689_vm15, %v5673_v22, %v5705_v17  ;;  %v10009_v22 = vpack.c.bf16 %v5850_v53, %v5849_v62  ;;  %v5854_v17 = vld [vmem:[%s15022_s9 + $0x68] sm:$0xff]  ;;  %vm15726_vm11 = vmmov %vm15720_vm0 }
 0x8b9   :  { %v5674_v19 = vadd.f32 %v14542_v52, %v5653_v14  ;;  %v9192_v47 = vpop.f32.mrb[92].mxu0  ;;  %9976 = vmatpush3.bf16.msra.mxu1 %v9973_v63  ;;  %v5720_v55 = vsel %vm5688_vm10, %v5672_v37, %v5704_v32  ;;  %v5852_v37 = vld [vmem:[%s15022_s9 + $0x58] sm:$0xff]  ;;  %v10017_v24 = vpack.c.bf16 %v5854_v17, %v5853_v18  ;;  %v10443_v14 = vmov 0.0|0.0   ;;  %v6148_v18 = vld [vmem:[%s15023_s10 + $0x140] sm:$0xff]  ;;  %v6149_v17 = vld [vmem:[%s15023_s10 + $0x148] sm:$0xff] }
 0x8ba   :  { %vm5691_vm6 = vcmp.gt.f32.partialorder %v5675_v59, 0.0  ;;  %v5707_v1 = vmul.f32 0.01, %v5675_v59  ;;  %v5656_v26 = vmul.f32 %v9192_v47, %v14537_v50  ;;  %v5603_v54 = vpop.f32.mrb[93].mxu0  ;;  %v9977_v11 = vpack.c.bf16 %v5721_v33, %v5720_v55  ;;  %v5856_v63 = vld [vmem:[%s15022_s9 + $0x78] sm:$0xff]  ;;  %10121 = vmatprep.subr.bf16.mxu0 %v10443_v14  ;;  %v5971_v33 = vld [vmem:[%s15023_s10 + $0x48] sm:$0xff]  ;;  %vm15727_vm15 = vmmov %vm15720_vm0 }
 0x8bb   :  { %vm5690_vm9 = vcmp.gt.f32.partialorder %v5674_v19, 0.0  ;;  %v5706_v38 = vmul.f32 0.01, %v5674_v19  ;;  %v5655_v27 = vmul.f32 %v14537_v50, %v5603_v54  ;;  %v10013_v44 = vpack.c.bf16 %v5852_v37, %v5851_v34 }
 0x8bc   :  { %v5677_v60 = vadd.f32 %v14542_v52, %v5656_v26  ;;  %9978 = vmatprep.subr.bf16.mxu1 %v9977_v11  ;;  %v5723_v41 = vsel %vm5691_vm6, %v5675_v59, %v5707_v1  ;;  %v10021_v32 = vpack.c.bf16 %v5856_v63, %v5855_v28  ;;  %v5970_v59 = vld [vmem:[%s15023_s10 + $0x40] sm:$0xff]  ;;  %v5972_v1 = vld [vmem:[%s15023_s10 + $0x50] sm:$0xff]  ;;  %v5973_v26 = vld [vmem:[%s15023_s10 + $0x58] sm:$0xff]  ;;  %v10050_v63 = vpack.c.bf16 %v6149_v17, %v6148_v18 }
 0x8bd   :  { %v5676_v39 = vadd.f32 %v14542_v52, %v5655_v27  ;;  %v9195_v20 = vpop.f32.mrb[94].mxu0  ;;  %9980 = vmatpush3.bf16.msra.mxu1 %v9977_v11  ;;  %v5722_v23 = vsel %vm5690_vm9, %v5674_v19, %v5706_v38  ;;  %v10026_v47 = vpack.c.bf16 %v5971_v33, %v5970_v59  ;;  %v10029_v11 = vpack.c.bf16 %v5973_v26, %v5972_v1  ;;  %v5974_v27 = vld [vmem:[%s15023_s10 + $0x60] sm:$0xff]  ;;  %v6151_v59 = vld [vmem:[%s15023_s10 + $0x158] sm:$0xff]  ;;  %v6154_v1 = vld [vmem:[%s15023_s10 + $0x170] sm:$0xff] }
 0x8be   :  { %vm5693_vm7 = vcmp.gt.f32.partialorder %v5677_v60, 0.0  ;;  %v5709_v25 = vmul.f32 0.01, %v5677_v60  ;;  %v5658_v49 = vmul.f32 %v9195_v20, %v14537_v50  ;;  %v5613_v4 = vpop.f32.mrb[95].mxu0  ;;  %v9981_v21 = vpack.c.bf16 %v5723_v41, %v5722_v23  ;;  %v5976_v23 = vld [vmem:[%s15023_s10 + $0x70] sm:$0xff]  ;;  %v6155_v26 = vld [vmem:[%s15023_s10 + $0x178] sm:$0xff] }
 0x8bf   :  { %vm5692_vm5 = vcmp.gt.f32.partialorder %v5676_v39, 0.0  ;;  %v5708_v15 = vmul.f32 0.01, %v5676_v39  ;;  %v5657_v48 = vmul.f32 %v14537_v50, %v5613_v4  ;;  %v5842_v50 = vld [vmem:[%s15022_s9 + $0x8] sm:$0xff]  ;;  %v6229_v17 = vld [vmem:[%s15023_s10 + $0x180] sm:$0xff]  ;;  %vm6733_vm9 = vcmask 261120  }
 0x8c0   :  { %v5679_v31 = vadd.f32 %v14542_v52, %v5658_v49  ;;  %9982 = vmatprep.subr.bf16.mxu1 %v9981_v21  ;;  %v5725_v9 = vsel %vm5693_vm7, %v5677_v60, %v5709_v25  ;;  %v9993_v35 = vpack.c.bf16 %v5842_v50, %v5841_v13  ;;  %v5975_v60 = vld [vmem:[%s15023_s10 + $0x68] sm:$0xff]  ;;  %v5977_v25 = vld [vmem:[%s15023_s10 + $0x78] sm:$0xff]  ;;  %v6634_v50 = vld [vmem:[%s15024_s11 + $0x30] sm:$0xff] }
 0x8c1   :  { %v5678_v45 = vadd.f32 %v14542_v52, %v5657_v48  ;;  %9984 = vmatpush3.bf16.msra.mxu1 %v9981_v21  ;;  %v5724_v6 = vsel %vm5692_vm5, %v5676_v39, %v5708_v15  ;;  %v10032_v39 = vpack.c.bf16 %v5975_v60, %v5974_v27  ;;  %v10035_v4 = vpack.c.bf16 %v5977_v25, %v5976_v23  ;;  %v6628_v48 = vld [vmem:[%s15024_s11] sm:$0xff]  ;;  %v6239_v60 = vld [vmem:[%s15023_s10 + $0x1d0] sm:$0xff]  ;;  %v6242_v23 = vld [vmem:[%s15023_s10 + $0x1e8] sm:$0xff] }
 0x8c2   :  { %vm5695_vm14 = vcmp.gt.f32.partialorder %v5679_v31, 0.0  ;;  %v5711_v8 = vmul.f32 0.01, %v5679_v31  ;;  %v9985_v29 = vpack.c.bf16 %v5725_v9, %v5724_v6  ;;  %v10445_v15 = vmov 0.0   ;;  %v6630_v9 = vld [vmem:[%s15024_s11 + $0x10] sm:$0xff]  ;;  %v6631_v6 = vld [vmem:[%s15024_s11 + $0x18] sm:$0xff] }
 0x8c3   :  { %vm5694_vm12 = vcmp.gt.f32.partialorder %v5678_v45, 0.0  ;;  %v5710_v0 = vmul.f32 0.01, %v5678_v45  ;;  %9468 = vmatprep.mubr.msk.f32.mxu0 %vm10444_vm3, %v10445_v15  ;;  %vm6829_vm5 = vcmask 130048  }
 0x8c4   :  { %9986 = vmatprep.subr.bf16.mxu1 %v9985_v29  ;;  %v5727_v43 = vsel %vm5695_vm14, %v5679_v31, %v5711_v8  ;;  %v6629_v31 = vld [vmem:[%s15024_s11 + $0x8] sm:$0xff]  ;;  %v10125_v8 = vpack.c.bf16 %v6631_v6, %v6630_v9  ;;  %v5965_v6 = vld [vmem:[%s15023_s10 + $0x18] sm:$0xff] }
 0x8c5   :  { %9988 = vmatpush3.bf16.msra.mxu1 %v9985_v29  ;;  %v5726_v10 = vsel %vm5694_vm12, %v5678_v45, %v5710_v0  ;;  %v10122_v45 = vpack.c.bf16 %v6629_v31, %v6628_v48  ;;  %v6632_v29 = vld [vmem:[%s15024_s11 + $0x20] sm:$0xff]  ;;  %v6633_v0 = vld [vmem:[%s15024_s11 + $0x28] sm:$0xff] }
 0x8c6   :  { %v9989_v52 = vpack.c.bf16 %v5727_v43, %v5726_v10  ;;  %v10128_v13 = vpack.c.bf16 %v6633_v0, %v6632_v29  ;;  %v6635_v43 = vld [vmem:[%s15024_s11 + $0x38] sm:$0xff]  ;;  %v6059_v10 = vld [vmem:[%s15023_s10 + $0xc0] sm:$0xff]  ;;  %v5963_v31 = vld [vmem:[%s15023_s10 + $0x8] sm:$0xff] }
 0x8c7   :  { %10123 = vmatpush3.bf16.msra.mxu0 %v10122_v45  ;;  %v5962_v48 = vld [vmem:[%s15023_s10] sm:$0xff]  ;;  %v5964_v45 = vld [vmem:[%s15023_s10 + $0x10] sm:$0xff]  ;;  %v5967_v0 = vld [vmem:[%s15023_s10 + $0x28] sm:$0xff] }
 0x8c8   :  { %9990 = vmatprep.subr.bf16.mxu1 %v9989_v52  ;;  %10124 = vmatprep.subr.bf16.mxu0 %v10443_v14  ;;  %v10074_v9 = vpack.c.bf16 %v5963_v31, %v5962_v48  ;;  %v5966_v29 = vld [vmem:[%s15023_s10 + $0x20] sm:$0xff]  ;;  %v6730_v31 = vld [vmem:[%s15025_s12 + $0x8] sm:$0xff] }
 0x8c9   :  { %9992 = vmatpush3.bf16.msra.mxu1 %v9989_v52  ;;  %v6060_v52 = vld [vmem:[%s15023_s10 + $0xc8] sm:$0xff]  ;;  %v6729_v48 = vld [vmem:[%s15025_s12] sm:$0xff] }
 0x8ca   :  { %9994 = vmatprep.subr.bf16.mxu1 %v9993_v35  ;;  %v10038_v30 = vpack.c.bf16 %v6060_v52, %v6059_v10  ;;  %v6051_v52 = vld [vmem:[%s15023_s10 + $0x80] sm:$0xff] }
 0x8cb   :  { %10126 = vmatpush3.bf16.msra.mxu0 %v10125_v8  ;;  %v10077_v8 = vpack.c.bf16 %v5965_v6, %v5964_v45  ;;  %v10146_v45 = vpack.c.bf16 %v6730_v31, %v6729_v48  ;;  %v6732_v6 = vld [vmem:[%s15025_s12 + $0x18] sm:$0xff] }
 0x8cc   :  { %9229 = vmatmul.mubr.f32.vlgmr.msra.gmra.mrb[96].mxu1 %v5729_v5  ;;  %10127 = vmatprep.subr.bf16.mxu0 %v10443_v14  ;;  %v6637_v5 = vld [vmem:[%s15024_s11 + $0x48] sm:$0xff] }
 0x8cd   :  { %9231 = vmatprep.mubr.f32.mxu1 %v5730_v56  ;;  %9996 = vmatpush3.bf16.msra.mxu1 %v9993_v35  ;;  %v10131_v35 = vpack.c.bf16 %v6635_v43, %v6634_v50  ;;  %v6061_v56 = vld [vmem:[%s15023_s10 + $0xd0] sm:$0xff]  ;;  %v5969_v43 = vld [vmem:[%s15023_s10 + $0x38] sm:$0xff] }
 0x8ce   :  { %9998 = vmatprep.subr.bf16.mxu1 %v9997_v36  ;;  %v5968_v50 = vld [vmem:[%s15023_s10 + $0x30] sm:$0xff] }
 0x8cf   :  { %10129 = vmatpush3.bf16.msra.mxu0 %v10128_v13  ;;  %v10080_v13 = vpack.c.bf16 %v5967_v0, %v5966_v29  ;;  %v10083_v10 = vpack.c.bf16 %v5969_v43, %v5968_v50  ;;  %v7304_v29 = vld [vmem:[%s15015_s14 + $0xc] ss:$0 sm:$0xff] }
 0x8d0   :  { %9232 = vmatmul.mubr.f32.gmra.mrb[98].mxu1 %v5731_v58  ;;  %10130 = vmatprep.subr.bf16.mxu0 %v10443_v14  ;;  %v10134_v58 = vpack.c.bf16 %v6637_v5, %v6636_v2  ;;  %v6053_v2 = vld [vmem:[%s15023_s10 + $0x90] sm:$0xff]  ;;  %v6054_v5 = vld [vmem:[%s15023_s10 + $0x98] sm:$0xff] }
 0x8d1   :  { %9234 = vmatprep.mubr.f32.mxu1 %v5732_v57  ;;  %10000 = vmatpush3.bf16.msra.mxu1 %v9997_v36  ;;  %v6062_v36 = vld [vmem:[%s15023_s10 + $0xd8] sm:$0xff] }
 0x8d2   :  { %10002 = vmatprep.subr.bf16.mxu1 %v10001_v3  ;;  %v10041_v57 = vpack.c.bf16 %v6062_v36, %v6061_v56  ;;  %v10089_v56 = vpack.c.bf16 %v6054_v5, %v6053_v2  ;;  %v6055_v36 = vld [vmem:[%s15023_s10 + $0xa0] sm:$0xff]  ;;  %v7307_v5 = vld [vmem:[%s15015_s14 + $0xe] ss:$0 sm:$0xff] }
 0x8d3   :  { %10132 = vmatpush3.bf16.msra.mxu0 %v10131_v35  ;;  %v6052_v35 = vld [vmem:[%s15023_s10 + $0x88] sm:$0xff] }
 0x8d4   :  { %9235 = vmatmul.mubr.f32.gmra.mrb[100].mxu1 %v5733_v46  ;;  %v6064_v46 = vld [vmem:[%s15023_s10 + $0xe8] sm:$0xff]  ;;  %10133 = vmatprep.subr.bf16.mxu0 %v10443_v14 }
 0x8d5   :  { %9237 = vmatprep.mubr.f32.mxu1 %v5734_v16  ;;  %10004 = vmatpush3.bf16.msra.mxu1 %v10001_v3  ;;  %v6638_v3 = vld [vmem:[%s15024_s11 + $0x50] sm:$0xff]  ;;  %v10044_v53 = vpack.c.bf16 %v6064_v46, %v6063_v61  ;;  %v6141_v61 = vld [vmem:[%s15023_s10 + $0x108] sm:$0xff] }
 0x8d6   :  { %10006 = vmatprep.subr.bf16.mxu1 %v10005_v51  ;;  %v10137_v62 = vpack.c.bf16 %v6639_v40, %v6638_v3  ;;  %v6140_v40 = vld [vmem:[%s15023_s10 + $0x100] sm:$0xff] }
 0x8d7   :  { %10135 = vmatpush3.bf16.msra.mxu0 %v10134_v58  ;;  %v10098_v46 = vpack.c.bf16 %v6141_v61, %v6140_v40 }
 0x8d8   :  { %9238 = vmatmul.mubr.f32.gmra.mrb[102].mxu1 %v5735_v12  ;;  %10136 = vmatprep.subr.bf16.mxu0 %v10443_v14  ;;  %v6065_v12 = vld [vmem:[%s15023_s10 + $0xf0] sm:$0xff] }
 0x8d9   :  { %10008 = vmatpush3.bf16.msra.mxu1 %v10005_v51 }
 0x8da   :  { %10010 = vmatprep.subr.bf16.mxu1 %v10009_v22 }
 0x8db   :  { %10138 = vmatpush3.bf16.msra.mxu0 %v10137_v62  ;;  %v6143_v62 = vld [vmem:[%s15023_s10 + $0x118] sm:$0xff] }
 0x8dc   :  { %10139 = vmatprep.subr.bf16.mxu0 %v10443_v14 }
 0x8dd   :  { %10012 = vmatpush3.bf16.msra.mxu1 %v10009_v22  ;;  %v6066_v22 = vld [vmem:[%s15023_s10 + $0xf8] sm:$0xff] }
 0x8de   :  { %10014 = vmatprep.subr.bf16.mxu1 %v10013_v44 }
 0x8e1   :  { %10016 = vmatpush3.bf16.msra.mxu1 %v10013_v44  ;;  %v10047_v44 = vpack.c.bf16 %v6066_v22, %v6065_v12  ;;  %v6144_v12 = vld [vmem:[%s15023_s10 + $0x120] sm:$0xff]  ;;  %v6145_v22 = vld [vmem:[%s15023_s10 + $0x128] sm:$0xff] }
 0x8e2   :  { %10018 = vmatprep.subr.bf16.mxu1 %v10017_v24 }
 0x8e5   :  { %10020 = vmatpush3.bf16.msra.mxu1 %v10017_v24 }
 0x8e6   :  { %10022 = vmatprep.subr.bf16.mxu1 %v10021_v32 }
 0x8e9   :  { %10024 = vmatpush3.bf16.msra.mxu1 %v10021_v32  ;;  %v6150_v32 = vld [vmem:[%s15023_s10 + $0x150] sm:$0xff] }
 0x8ea   :  { %10025 = vmatprep.subr.bf16.mxu1 %v10443_v14  ;;  %v10053_v33 = vpack.c.bf16 %v6151_v59, %v6150_v32  ;;  %v6231_v32 = vld [vmem:[%s15023_s10 + $0x190] sm:$0xff]  ;;  %v6232_v59 = vld [vmem:[%s15023_s10 + $0x198] sm:$0xff] }
 0x99f   :  { %v9230_v19 = vpop.f32.mrb[96].mxu1 }
 0x9a0   :  { %v5802_v55 = vpop.f32.mrb[97].mxu1 }
 0x9a1   :  { %9272 = vmatprep.mubr.f32.mxu1 %v5802_v55 }
 0x9a2   :  { %9273 = vmatmul.mubr.f32.vlgmr.msra.gmra.mrb[104].mxu1 %v9230_v19  ;;  %v6152_v19 = vld [vmem:[%s15023_s10 + $0x160] sm:$0xff] }
 0x9a3   :  { %v9233_v54 = vpop.f32.mrb[98].mxu1  ;;  %10027 = vmatpush3.bf16.msra.mxu1 %v10026_v47  ;;  %v6153_v47 = vld [vmem:[%s15023_s10 + $0x168] sm:$0xff] }
 0x9a4   :  { %v5812_v38 = vpop.f32.mrb[99].mxu1  ;;  %10028 = vmatprep.subr.bf16.mxu1 %v10443_v14  ;;  %v10056_v55 = vpack.c.bf16 %v6153_v47, %v6152_v19  ;;  %v6233_v19 = vld [vmem:[%s15023_s10 + $0x1a0] sm:$0xff]  ;;  %v6234_v47 = vld [vmem:[%s15023_s10 + $0x1a8] sm:$0xff] }
 0x9a5   :  { %9275 = vmatprep.mubr.f32.mxu1 %v5812_v38  ;;  %v6238_v38 = vld [vmem:[%s15023_s10 + $0x1c8] sm:$0xff] }
 0x9a6   :  { %9276 = vmatmul.mubr.f32.gmra.mrb[106].mxu1 %v9233_v54  ;;  %v10059_v54 = vpack.c.bf16 %v6155_v26, %v6154_v1  ;;  %v6236_v1 = vld [vmem:[%s15023_s10 + $0x1b8] sm:$0xff] }
 0x9a7   :  { %v9236_v41 = vpop.f32.mrb[100].mxu1  ;;  %10030 = vmatpush3.bf16.msra.mxu1 %v10029_v11  ;;  %v6237_v11 = vld [vmem:[%s15023_s10 + $0x1c0] sm:$0xff] }
 0x9a8   :  { %v5822_v20 = vpop.f32.mrb[101].mxu1  ;;  %10031 = vmatprep.subr.bf16.mxu1 %v10443_v14  ;;  %v10062_v27 = vpack.c.bf16 %v6238_v38, %v6237_v11  ;;  %v6641_v11 = vld [vmem:[%s15024_s11 + $0x68] sm:$0xff]  ;;  %v6642_v38 = vld [vmem:[%s15024_s11 + $0x70] sm:$0xff] }
 0x9a9   :  { %9278 = vmatprep.mubr.f32.mxu1 %v5822_v20  ;;  %v6241_v20 = vld [vmem:[%s15023_s10 + $0x1e0] sm:$0xff] }
 0x9aa   :  { %9279 = vmatmul.mubr.f32.gmra.mrb[108].mxu1 %v9236_v41  ;;  %v6240_v41 = vld [vmem:[%s15023_s10 + $0x1d8] sm:$0xff]  ;;  %v10068_v25 = vpack.c.bf16 %v6242_v23, %v6241_v20  ;;  %v7303_v20 = vld [vmem:[%s15015_s14 + $0xb] ss:$0 sm:$0xff] }
 0x9ab   :  { %v9239_v49 = vpop.f32.mrb[102].mxu1  ;;  %10033 = vmatpush3.bf16.msra.mxu1 %v10032_v39  ;;  %v10065_v39 = vpack.c.bf16 %v6240_v41, %v6239_v60  ;;  %v6643_v60 = vld [vmem:[%s15024_s11 + $0x78] sm:$0xff] }
 0x9ac   :  { %v5832_v21 = vpop.f32.mrb[103].mxu1  ;;  %10034 = vmatprep.subr.bf16.mxu1 %v10443_v14  ;;  %v10143_v41 = vpack.c.bf16 %v6643_v60, %v6642_v38 }
 0x9ad   :  { %9281 = vmatprep.mubr.f32.mxu1 %v5832_v21 }
 0x9ae   :  { %9282 = vmatmul.mubr.f32.gmra.mrb[110].mxu1 %v9239_v49  ;;  %v6243_v49 = vld [vmem:[%s15023_s10 + $0x1f0] sm:$0xff] }
 0x9af   :  { %10036 = vmatpush3.bf16.msra.mxu1 %v10035_v4  ;;  %9300 = vmatprep.mubr.msk.f32.mxu1 %vm10444_vm3, %v10445_v15  ;;  %v6244_v4 = vld [vmem:[%s15023_s10 + $0x1f8] sm:$0xff] }
 0x9b0   :  { %10037 = vmatprep.subr.bf16.mxu1 %v10443_v14  ;;  %v10071_v21 = vpack.c.bf16 %v6244_v4, %v6243_v49 }
 0xa75   :  { %v9274_v42 = vpop.f32.mrb[104].mxu1 }
 0xa76   :  { %9301 = vmatmul.mubr.msk.f32.vlgmr.msra.gmra.mrb[112].mxu1 %vm15720_vm0, %v9274_v42  ;;  %v14725_v7 = vpop.f32.mrb[105].mxu1  ;;  %v6056_v42 = vld [vmem:[%s15023_s10 + $0xa8] sm:$0xff] }
 0xa77   :  { %10039 = vmatpush3.bf16.msra.mxu1 %v10038_v30  ;;  %9319 = vmatprep.mubr.msk.f32.mxu1 %vm10444_vm3, %v10445_v15  ;;  %v10086_v30 = vpack.c.bf16 %v6052_v35, %v6051_v52  ;;  %v10092_v58 = vpack.c.bf16 %v6056_v42, %v6055_v36  ;;  %v7308_v36 = vld [vmem:[%s15015_s14 + $0xf] ss:$0 sm:$0xff] }
 0xa78   :  { %10040 = vmatprep.subr.bf16.mxu1 %v10443_v14 }
 0xa79   :  { %v9277_v16 = vpop.f32.mrb[106].mxu1 }
 0xa7a   :  { %v14743_v51 = vpop.f32.mrb[107].mxu1 }
 0xa7b   :  { %10042 = vmatpush3.bf16.msra.mxu1 %v10041_v57  ;;  %v6058_v57 = vld [vmem:[%s15023_s10 + $0xb8] sm:$0xff] }
 0xa7c   :  { %10043 = vmatprep.subr.bf16.mxu1 %v10443_v14 }
 0xa7d   :  { %v9280_v34 = vpop.f32.mrb[108].mxu1 }
 0xa7e   :  { %v14753_v37 = vpop.f32.mrb[109].mxu1 }
 0xa7f   :  { %10045 = vmatpush3.bf16.msra.mxu1 %v10044_v53 }
 0xa80   :  { %10046 = vmatprep.subr.bf16.mxu1 %v10443_v14 }
 0xa81   :  { %v9283_v24 = vpop.f32.mrb[110].mxu1 }
 0xa82   :  { %v14763_v28 = vpop.f32.mrb[111].mxu1 }
 0xa83   :  { %10048 = vmatpush3.bf16.msra.mxu1 %v10047_v44  ;;  %v6147_v44 = vld [vmem:[%s15023_s10 + $0x138] sm:$0xff] }
 0xa84   :  { %10049 = vmatprep.subr.bf16.mxu1 %v10443_v14 }
 0xa86   :  { %9320 = vmatmul.mubr.msk.f32.vlgmr.msra.gmra.mrb[112].mxu1 %vm15721_vm2, %v9277_v16  ;;  %v6142_v16 = vld [vmem:[%s15023_s10 + $0x110] sm:$0xff] }
 0xa87   :  { %10051 = vmatpush3.bf16.msra.mxu1 %v10050_v63  ;;  %9338 = vmatprep.mubr.msk.f32.mxu1 %vm10444_vm3, %v10445_v15  ;;  %v10101_v53 = vpack.c.bf16 %v6143_v62, %v6142_v16 }
 0xa88   :  { %10052 = vmatprep.subr.bf16.mxu1 %v10443_v14 }
 0xa8b   :  { %10054 = vmatpush3.bf16.msra.mxu1 %v10053_v33  ;;  %v10113_v33 = vpack.c.bf16 %v6232_v59, %v6231_v32 }
 0xa8c   :  { %10055 = vmatprep.subr.bf16.mxu1 %v10443_v14 }
 0xa8f   :  { %10057 = vmatpush3.bf16.msra.mxu1 %v10056_v55  ;;  %v10116_v55 = vpack.c.bf16 %v6234_v47, %v6233_v19 }
 0xa90   :  { %10058 = vmatprep.subr.bf16.mxu1 %v10443_v14 }
 0xa93   :  { %10060 = vmatpush3.bf16.msra.mxu1 %v10059_v54  ;;  %v6640_v54 = vld [vmem:[%s15024_s11 + $0x60] sm:$0xff] }
 0xa94   :  { %10061 = vmatprep.subr.bf16.mxu1 %v10443_v14 }
 0xa96   :  { %9339 = vmatmul.mubr.msk.f32.vlgmr.msra.gmra.mrb[112].mxu1 %vm15722_vm13, %v9280_v34  ;;  %v10104_v34 = vpack.c.bf16 %v6145_v22, %v6144_v12 }
 0xa97   :  { %10063 = vmatpush3.bf16.msra.mxu1 %v10062_v27  ;;  %9357 = vmatprep.mubr.msk.f32.mxu1 %vm10444_vm3, %v10445_v15  ;;  %v10140_v27 = vpack.c.bf16 %v6641_v11, %v6640_v54 }
 0xa98   :  { %10064 = vmatprep.subr.bf16.mxu1 %v10443_v14 }
 0xa99   :  { %10141 = vmatpush3.bf16.msra.mxu0 %v10140_v27 }
 0xa9a   :  { %10142 = vmatprep.subr.bf16.mxu0 %v10443_v14 }
 0xa9b   :  { %10066 = vmatpush3.bf16.msra.mxu1 %v10065_v39 }
 0xa9c   :  { %10067 = vmatprep.subr.bf16.mxu1 %v10443_v14 }
 0xa9d   :  { %10144 = vmatpush3.bf16.msra.mxu0 %v10143_v41 }
 0xa9e   :  { %10145 = vmatprep.subr.bf16.mxu0 %v10443_v14 }
 0xa9f   :  { %10069 = vmatpush3.bf16.msra.mxu1 %v10068_v25 }
 0xaa0   :  { %10070 = vmatprep.subr.bf16.mxu1 %v10443_v14 }
 0xaa3   :  { %10072 = vmatpush3.bf16.msra.mxu1 %v10071_v21 }
 0xaa4   :  { %10073 = vmatprep.subr.bf16.mxu1 %v10443_v14 }
 0xaa6   :  { %9358 = vmatmul.mubr.msk.f32.vlgmr.msra.gmra.mrb[112].mxu1 %vm15723_vm8, %v9283_v24  ;;  %v6230_v24 = vld [vmem:[%s15023_s10 + $0x188] sm:$0xff] }
 0xaa7   :  { %10075 = vmatpush3.bf16.msra.mxu1 %v10074_v9  ;;  %9376 = vmatprep.mubr.msk.f32.mxu1 %vm10444_vm3, %v10445_v15  ;;  %v10110_v63 = vpack.c.bf16 %v6230_v24, %v6229_v17  ;;  %v6731_v9 = vld [vmem:[%s15025_s12 + $0x10] sm:$0xff] }
 0xaa8   :  { %10076 = vmatprep.subr.bf16.mxu1 %v10443_v14 }
 0xaab   :  { %10078 = vmatpush3.bf16.msra.mxu1 %v10077_v8  ;;  %v10149_v8 = vpack.c.bf16 %v6732_v6, %v6731_v9 }
 0xaac   :  { %10079 = vmatprep.subr.bf16.mxu1 %v10443_v14 }
 0xaaf   :  { %10081 = vmatpush3.bf16.msra.mxu1 %v10080_v13  ;;  %v7305_v13 = vld [vmem:[%s15015_s14 + $0xd] ss:$0 sm:$0xff] }
 0xab0   :  { %10082 = vmatprep.subr.bf16.mxu1 %v10443_v14 }
 0xab3   :  { %10084 = vmatpush3.bf16.msra.mxu1 %v10083_v10 }
 0xab4   :  { %10085 = vmatprep.subr.bf16.mxu1 %v10443_v14 }
 0xab6   :  { %9377 = vmatmul.mubr.msk.f32.vlgmr.msra.gmra.mrb[112].mxu1 %vm15724_vm4, %v14725_v7  ;;  %v6057_v7 = vld [vmem:[%s15023_s10 + $0xb0] sm:$0xff] }
 0xab7   :  { %10087 = vmatpush3.bf16.msra.mxu1 %v10086_v30  ;;  %9395 = vmatprep.mubr.msk.f32.mxu1 %vm10444_vm3, %v10445_v15  ;;  %v10095_v3 = vpack.c.bf16 %v6058_v57, %v6057_v7  ;;  %v6823_v30 = vld [vmem:[%s15026_s13 + $0x8] sm:$0xff] }
 0xab8   :  { %10088 = vmatprep.subr.bf16.mxu1 %v10443_v14 }
 0xabb   :  { %10090 = vmatpush3.bf16.msra.mxu1 %v10089_v56 }
 0xabc   :  { %10091 = vmatprep.subr.bf16.mxu1 %v10443_v14 }
 0xabf   :  { %10093 = vmatpush3.bf16.msra.mxu1 %v10092_v58 }
 0xac0   :  { %10094 = vmatprep.subr.bf16.mxu1 %v10443_v14 }
 0xac3   :  { %10096 = vmatpush3.bf16.msra.mxu1 %v10095_v3  ;;  %v7309_v3 = vld [vmem:[%s15015_s14 + $0x10] ss:$0 sm:$0xff] }
 0xac4   :  { %10097 = vmatprep.subr.bf16.mxu1 %v10443_v14 }
 0xac6   :  { %9396 = vmatmul.mubr.msk.f32.vlgmr.msra.gmra.mrb[112].mxu1 %vm15725_vm1, %v14743_v51  ;;  %v6146_v51 = vld [vmem:[%s15023_s10 + $0x130] sm:$0xff] }
 0xac7   :  { %10099 = vmatpush3.bf16.msra.mxu1 %v10098_v46  ;;  %9414 = vmatprep.mubr.msk.f32.mxu1 %vm10444_vm3, %v10445_v15  ;;  %v10107_v18 = vpack.c.bf16 %v6147_v44, %v6146_v51 }
 0xac8   :  { %10100 = vmatprep.subr.bf16.mxu1 %v10443_v14 }
 0xacb   :  { %10102 = vmatpush3.bf16.msra.mxu1 %v10101_v53 }
 0xacc   :  { %10103 = vmatprep.subr.bf16.mxu1 %v10443_v14 }
 0xacf   :  { %10105 = vmatpush3.bf16.msra.mxu1 %v10104_v34 }
 0xad0   :  { %10106 = vmatprep.subr.bf16.mxu1 %v10443_v14 }
 0xad3   :  { %10108 = vmatpush3.bf16.msra.mxu1 %v10107_v18 }
 0xad4   :  { %10109 = vmatprep.subr.bf16.mxu1 %v10443_v14 }
 0xad6   :  { %9415 = vmatmul.mubr.msk.f32.vlgmr.msra.gmra.mrb[112].mxu1 %vm15726_vm11, %v14753_v37  ;;  %v6235_v37 = vld [vmem:[%s15023_s10 + $0x1b0] sm:$0xff] }
 0xad7   :  { %10111 = vmatpush3.bf16.msra.mxu1 %v10110_v63  ;;  %9433 = vmatprep.mubr.msk.f32.mxu1 %vm10444_vm3, %v10445_v15  ;;  %v10119_v26 = vpack.c.bf16 %v6236_v1, %v6235_v37 }
 0xad8   :  { %10112 = vmatprep.subr.bf16.mxu1 %v10443_v14 }
 0xadb   :  { %10114 = vmatpush3.bf16.msra.mxu1 %v10113_v33 }
 0xadc   :  { %10115 = vmatprep.subr.bf16.mxu1 %v10443_v14 }
 0xadf   :  { %10117 = vmatpush3.bf16.msra.mxu1 %v10116_v55 }
 0xae0   :  { %10118 = vmatprep.subr.bf16.mxu1 %v10443_v14 }
 0xae3   :  { %10120 = vmatpush3.bf16.msra.mxu1 %v10119_v26 }
 0xae6   :  { %9434 = vmatmul.mubr.msk.f32.vlgmr.msra.gmra.mrb[112].mxu1 %vm15727_vm15, %v14763_v28  ;;  %v7302_v28 = vld [vmem:[%s15015_s14 + $0xa] ss:$0 sm:$0xff] }
 0xbb9   :  { %v6607_v39 = vpop.f32.mrb[112].mxu1 }
 0xbba   :  { %v6618_v23 = vmul.f32 %v7302_v28, %v6607_v39  ;;  %v9435_v25 = vpop.f32.mrb[113].mxu1 }
 0xbbc   :  { %v6624_v49 = vadd.f32 %v7303_v20, %v6618_v23 }
 0xbbe   :  { %vm6625_vm10 = vcmp.gt.f32.partialorder %v6624_v49, 0.0  ;;  %v6626_v4 = vmul.f32 0.01, %v6624_v49 }
 0xbc0   :  { %v6627_v21 = vsel %vm6625_vm10, %v6624_v49, %v6626_v4 }
 0xbc1   :  { %9469 = vmatmul.mubr.f32.vlgmr.msra.gmra.mrb[96].mxu0 %v6627_v21 }
 0xbc2   :  { %9479 = vmatprep.mubr.msk.f32.mxu0 %vm10444_vm3, %v10445_v15  ;;  %10147 = vmatpush3.bf16.msra.mxu0 %v10146_v45 }
 0xbc3   :  { %10148 = vmatprep.subr.bf16.mxu0 %v10443_v14 }
 0xbc6   :  { %10150 = vmatpush3.bf16.msra.mxu0 %v10149_v8 }
 0xbc7   :  { %10151 = vmatprep.subr.bf16.mxu0 %v10443_v14  ;;  %v6822_v14 = vld [vmem:[%s15026_s13] sm:$0xff] }
 0xbc8   :  { %v10152_v2 = vpack.c.bf16 %v6823_v30, %v6822_v14 }
 0xc94   :  { %v6710_v0 = vpop.f32.mrb[96].mxu0 }
 0xc95   :  { %v6719_v50 = vmul.f32 %v7304_v29, %v6710_v0  ;;  %v9470_v43 = vpop.f32.mrb[97].mxu0 }
 0xc97   :  { %v6725_v10 = vadd.f32 %v7305_v13, %v6719_v50 }
 0xc99   :  { %vm6726_vm6 = vcmp.gt.f32.partialorder %v6725_v10, 0.0  ;;  %v6727_v52 = vmul.f32 0.01, %v6725_v10 }
 0xc9b   :  { %v6728_v35 = vsel %vm6726_vm6, %v6725_v10, %v6727_v52 }
 0xc9c   :  { %9480 = vmatmul.mubr.msk.f32.vlgmr.msra.gmra.mrb[98].mxu0 %vm6733_vm9, %v6728_v35 }
 0xc9d   :  { %9486 = vmatprep.mubr.msk.f32.mxu0 %vm10444_vm3, %v10445_v15  ;;  %10153 = vmatpush3.bf16.msra.mxu0 %v10152_v2 }
 0xd6f   :  { %v6803_v56 = vpop.f32.mrb[98].mxu0 }
 0xd70   :  { %v6812_v15 = vmul.f32 %v7307_v5, %v6803_v56  ;;  %v9481_v42 = vpop.f32.mrb[99].mxu0 }
 0xd72   :  { %v6818_v58 = vadd.f32 %v7308_v36, %v6812_v15 }
 0xd74   :  { %vm6819_vm7 = vcmp.gt.f32.partialorder %v6818_v58, 0.0  ;;  %v6820_v7 = vmul.f32 0.01, %v6818_v58 }
 0xd76   :  { %v6821_v57 = vsel %vm6819_vm7, %v6818_v58, %v6820_v7 }
 0xd77   :  { %9487 = vmatmul.mubr.msk.f32.vlgmr.msra.gmra.mrb[100].mxu0 %vm6829_vm5, %v6821_v57 }
 0xe4a   :  { %v6899_v40 = vpop.f32.mrb[100].mxu0 }
 0xe4b   :  { %v6900_v61 = vadd.f32 %v7309_v3, %v6899_v40  ;;  %v9488_v46 = vpop.f32.mrb[101].mxu0 }
 0xe4d   :  { %6903 = vst [vmem:[%s15027_s15] sm:$0xff] %v6900_v61 }

</bundles_post_ra>
